<compile_context>
chip_gen: v6e
topology: v6e:2x2x1
jax: 0.10.0
libtpu: 0.0.40
codegen_flags: <defaults>
</compile_context>

<pallas_src>
import jax
import jax.numpy as jnp
import numpy as np
from jax import lax
from jax.experimental import pallas as pl
from jax.experimental.pallas import tpu as pltpu


# Fixed RainbowBody stack: Conv(in,32,8,4) -> Conv(32,64,4,2) -> Conv(64,64,3,1)
_C1, _C2, _C3 = 32, 64, 64
_KH1, _S1 = 8, 4
_KH2, _S2 = 4, 2
_KH3, _S3 = 3, 1


# ----------------------------------------------------------------------------
# Fused kernel builder (all sizes static Python ints -> fully unrolled body)
# ----------------------------------------------------------------------------
def _make_fused_kernel(oh1, ow1):
    assert ow1 % 2 == 0, "phase-split im2col needs an even conv1 output width"
    oh2 = (oh1 - _KH2) // _S2 + 1
    ow2 = (ow1 - _KH2) // _S2 + 1
    oh3 = (oh2 - _KH3) // _S3 + 1
    ow3 = (ow2 - _KH3) // _S3 + 1
    g = ow1 // 2  # x-groups per row in the phase-split h1 layout

    def kernel(p1_ref, w1_ref, b1_ref, w2_ref, b2_ref, w3_ref, b3_ref,
               out_ref, h1_ref, p2_ref, h2_ref, p3_ref):
        # ---- conv1: pre-built bf16 patches @ w1, f32 bias + ReLU -> VMEM ----
        a1 = jnp.dot(p1_ref[0], w1_ref[...], preferred_element_type=jnp.float32)
        h1_ref[...] = jnp.maximum(a1 + b1_ref[...], 0.0)

        # ---- conv2 (4x4, stride 2): in-kernel im2col from phase-split h1 ----
        # h1 row = y*ow1 + (x % 2)*g + x//2, so each (ki, kj) tap over a full
        # output row is a contiguous, unit-stride slice of a 4-row band.
        for oy in range(oh2):
            band = h1_ref[2 * oy * ow1:(2 * oy + _KH2) * ow1, :]   # (4*ow1, 32)
            chunks = []
            for ki in range(_KH2):
                for kj in range(_KH2):
                    lb = ki * ow1 + (kj % 2) * g + kj // 2
                    chunks.append(band[lb:lb + ow2, :])            # (ow2, 32)
            p2_ref[oy * ow2:(oy + 1) * ow2, :] = jnp.concatenate(chunks, axis=1)

        a2 = jnp.dot(p2_ref[...].astype(jnp.bfloat16), w2_ref[...],
                     preferred_element_type=jnp.float32)
        h2_ref[...] = jnp.maximum(a2 + b2_ref[...], 0.0)

        # ---- conv3 (3x3, stride 1): in-kernel im2col from h2 (row = y*ow2+x) ----
        for oy in range(oh3):
            band = h2_ref[oy * ow2:(oy + _KH3) * ow2, :]           # (3*ow2, 64)
            chunks = []
            for ki in range(_KH3):
                for kj in range(_KH3):
                    lb = ki * ow2 + kj
                    chunks.append(band[lb:lb + ow3, :])            # (ow3, 64)
            p3_ref[oy * ow3:(oy + 1) * ow3, :] = jnp.concatenate(chunks, axis=1)

        a3 = jnp.dot(p3_ref[...].astype(jnp.bfloat16), w3_ref[...],
                     preferred_element_type=jnp.float32)
        out_ref[0] = jnp.maximum(a3 + b3_ref[...], 0.0)            # f32 output

    return kernel, (oh2, ow2, oh3, ow3)


# ----------------------------------------------------------------------------
# conv1 patch extraction (JAX/XLA), column order (ki, kj, c) to match HWIO
# ----------------------------------------------------------------------------
def _im2col_conv1(x_nhwc, kh, kw, stride):
    n, h, w, c = x_nhwc.shape
    oh = (h - kh) // stride + 1
    ow = (w - kw) // stride + 1
    cols = []
    for i in range(kh):
        for j in range(kw):
            cols.append(
                x_nhwc[:, i: i + stride * (oh - 1) + 1: stride,
                          j: j + stride * (ow - 1) + 1: stride, :])
    patches = jnp.stack(cols, axis=3)                  # (n, oh, ow, kh*kw, c)
    return patches.reshape(n, oh, ow, kh * kw * c), oh, ow


# ----------------------------------------------------------------------------
# RainbowBody forward (PyTorch-equivalent, NCHW in / NCHW out)
# ----------------------------------------------------------------------------
def rainbow_body_forward(x_nchw, params):
    n = x_nchw.shape[0]
    x = jnp.transpose(x_nchw, (0, 2, 3, 1)).astype(jnp.bfloat16)   # NHWC bf16

    # conv1 im2col in JAX; reorder rows to (y, x%2, x//2) so the fused kernel
    # extracts conv2 patches with unit-stride slices only.
    p1, oh1, ow1 = _im2col_conv1(x, _KH1, _KH1, _S1)
    k1 = p1.shape[-1]
    p1 = (p1.reshape(n, oh1, ow1 // 2, 2, k1)
             .transpose(0, 1, 3, 2, 4)
             .reshape(n, oh1 * ow1, k1))

    kernel, (oh2, ow2, oh3, ow3) = _make_fused_kernel(oh1, ow1)
    m1, m2, m3 = oh1 * ow1, oh2 * ow2, oh3 * ow3
    k2, k3 = _KH2 * _KH2 * _C1, _KH3 * _KH3 * _C2

    w1 = params["w1"].reshape(k1, _C1).astype(jnp.bfloat16)
    w2 = params["w2"].reshape(k2, _C2).astype(jnp.bfloat16)
    w3 = params["w3"].reshape(k3, _C3).astype(jnp.bfloat16)
    b1 = params["b1"].reshape(1, _C1).astype(jnp.float32)
    b2 = params["b2"].reshape(1, _C2).astype(jnp.float32)
    b3 = params["b3"].reshape(1, _C3).astype(jnp.float32)

    cost = pl.CostEstimate(
        flops=2 * n * (m1 * k1 * _C1 + m2 * k2 * _C2 + m3 * k3 * _C3),
        transcendentals=0,
        bytes_accessed=(p1.size + w1.size + w2.size + w3.size) * 2
                       + (b1.size + b2.size + b3.size) * 4
                       + n * m3 * _C3 * 4,
    )

    out = pl.pallas_call(
        kernel,
        out_shape=jax.ShapeDtypeStruct((n, m3, _C3), jnp.float32),
        grid=(n,),                      # one image per step; "parallel" lets
                                        # v7x's two TensorCores take one each.
        in_specs=[
            pl.BlockSpec((1, m1, k1), lambda b: (b, 0, 0)),    # conv1 patches
            pl.BlockSpec((k1, _C1), lambda b: (0, 0)),         # w1 (resident)
            pl.BlockSpec((1, _C1), lambda b: (0, 0)),          # b1
            pl.BlockSpec((k2, _C2), lambda b: (0, 0)),         # w2
            pl.BlockSpec((1, _C2), lambda b: (0, 0)),          # b2
            pl.BlockSpec((k3, _C3), lambda b: (0, 0)),         # w3
            pl.BlockSpec((1, _C3), lambda b: (0, 0)),          # b3
        ],
        out_specs=pl.BlockSpec((1, m3, _C3), lambda b: (b, 0, 0)),
        scratch_shapes=[
            pltpu.VMEM((m1, _C1), jnp.float32),   # h1: conv1 out, phase-split rows
            pltpu.VMEM((m2, k2), jnp.float32),    # p2: conv2 patches
            pltpu.VMEM((m2, _C2), jnp.float32),   # h2: conv2 out
            pltpu.VMEM((m3, k3), jnp.float32),    # p3: conv3 patches
        ],
        compiler_params=pltpu.CompilerParams(
            dimension_semantics=("parallel",),
            vmem_limit_bytes=32 * 1024 * 1024,
        ),
        cost_estimate=cost,
    )(p1, w1, b1, w2, b2, w3, b3)

    out = out.reshape(n, oh3, ow3, _C3)
    return jnp.transpose(out, (0, 3, 1, 2))                        # NHWC -> NCHW


# ----------------------------------------------------------------------------
# Params (PyTorch-style init, HWIO layout; w_pt = transpose(w_hwio, (3,2,0,1)))
# ----------------------------------------------------------------------------
def init_params(key, in_ch):
    def conv_init(k, kh, kw, cin, cout):
        kw_key, kb_key = jax.random.split(k)
        bound = 1.0 / np.sqrt(cin * kh * kw)
        w = jax.random.uniform(kw_key, (kh, kw, cin, cout), jnp.float32,
                               -bound, bound)
        b = jax.random.uniform(kb_key, (cout,), jnp.float32, -bound, bound)
        return w, b

    k1, k2, k3 = jax.random.split(key, 3)
    w1, b1 = conv_init(k1, 8, 8, in_ch, 32)
    w2, b2 = conv_init(k2, 4, 4, 32, 64)
    w3, b3 = conv_init(k3, 3, 3, 64, 64)
    return {"w1": w1, "b1": b1, "w2": w2, "b2": b2, "w3": w3, "b3": b3}


# ----------------------------------------------------------------------------
# Pure-JAX reference (XLA conv), precision-matched: bf16 operands, f32 accum
# ----------------------------------------------------------------------------
def _ref_conv_relu(x_nhwc, w_hwio, b, stride):
    y = lax.conv_general_dilated(
        x_nhwc.astype(jnp.bfloat16), w_hwio.astype(jnp.bfloat16),
        window_strides=(stride, stride), padding="VALID",
        dimension_numbers=("NHWC", "HWIO", "NHWC"),
        preferred_element_type=jnp.float32,
    )
    return jnp.maximum(y + b.astype(jnp.float32), 0.0)


def rainbow_body_reference(x_nchw, params):
    x = jnp.transpose(x_nchw, (0, 2, 3, 1))
    x = _ref_conv_relu(x, params["w1"], params["b1"], 4)
    x = _ref_conv_relu(x, params["w2"], params["b2"], 2)
    x = _ref_conv_relu(x, params["w3"], params["b3"], 1)
    return jnp.transpose(x, (0, 3, 1, 2))


if __name__ == "__main__":
    key = jax.random.PRNGKey(0)
    key_x, key_p = jax.random.split(key)

    batch, in_ch, spatial = 2, 4, 84   # 84x84 -> 20x20 -> 9x9 -> 7x7
    x = jax.random.normal(key_x, (batch, in_ch, spatial, spatial), jnp.float32)
    params = init_params(key_p, in_ch)

    fwd = jax.jit(rainbow_body_forward)
    out = jax.block_until_ready(fwd(x, params))

    assert out.shape == (batch, 64, 7, 7), out.shape
    assert out.dtype == jnp.float32, out.dtype

    ref = jax.block_until_ready(jax.jit(rainbow_body_reference)(x, params))
    # Both pipelines use bf16-rounded operands with f32 accumulation; residual
    # differences come only from summation order / per-layer rounding.
    np.testing.assert_allclose(np.asarray(out), np.asarray(ref),
                               rtol=5e-3, atol=5e-3)

    print("KERNEL_OK")
</pallas_src>

<mosaic_0001>
module attributes {stable_mosaic.version = 11 : i64} {
  func.func @kernel(%arg0: i32, %arg1: memref<1x400x256xbf16, #tpu.memory_space<vmem>>, %arg2: memref<256x32xbf16, #tpu.memory_space<vmem>>, %arg3: memref<1x32xf32, #tpu.memory_space<vmem>>, %arg4: memref<512x64xbf16, #tpu.memory_space<vmem>>, %arg5: memref<1x64xf32, #tpu.memory_space<vmem>>, %arg6: memref<576x64xbf16, #tpu.memory_space<vmem>>, %arg7: memref<1x64xf32, #tpu.memory_space<vmem>>, %arg8: memref<1x49x64xf32, #tpu.memory_space<vmem>>, %arg9: memref<400x32xf32, #tpu.memory_space<vmem>>, %arg10: memref<81x512xf32, #tpu.memory_space<vmem>>, %arg11: memref<81x64xf32, #tpu.memory_space<vmem>>, %arg12: memref<49x576xf32, #tpu.memory_space<vmem>>) attributes {dimension_semantics = [#tpu.dimension_semantics<parallel>], iteration_bounds = array<i64: 2>, scalar_prefetch = 0 : i64, scratch_operands = 4 : i64, tpu.core_type = #tpu.core_type<tc>, window_params = [{transform_indices = @transform_0, window_bounds = array<i64: 1, 400, 256>}, {pipeline_mode = #tpu.pipeline_mode<synchronous>, transform_indices = @transform_1, window_bounds = array<i64: 256, 32>}, {pipeline_mode = #tpu.pipeline_mode<synchronous>, transform_indices = @transform_2, window_bounds = array<i64: 1, 32>}, {pipeline_mode = #tpu.pipeline_mode<synchronous>, transform_indices = @transform_3, window_bounds = array<i64: 512, 64>}, {pipeline_mode = #tpu.pipeline_mode<synchronous>, transform_indices = @transform_4, window_bounds = array<i64: 1, 64>}, {pipeline_mode = #tpu.pipeline_mode<synchronous>, transform_indices = @transform_5, window_bounds = array<i64: 576, 64>}, {pipeline_mode = #tpu.pipeline_mode<synchronous>, transform_indices = @transform_6, window_bounds = array<i64: 1, 64>}, {transform_indices = @transform_7, window_bounds = array<i64: 1, 49, 64>}]} {
    %c0 = arith.constant 0 : index
    %c0_0 = arith.constant 0 : index
    %c0_1 = arith.constant 0 : index
    %0 = vector.load %arg1[%c0, %c0_0, %c0_1] : memref<1x400x256xbf16, #tpu.memory_space<vmem>>, vector<1x400x256xbf16>
    %1 = vector.shape_cast %0 : vector<1x400x256xbf16> to vector<400x256xbf16>
    %c0_2 = arith.constant 0 : index
    %c0_3 = arith.constant 0 : index
    %2 = vector.load %arg2[%c0_2, %c0_3] : memref<256x32xbf16, #tpu.memory_space<vmem>>, vector<256x32xbf16>
    %cst = arith.constant dense<0.000000e+00> : vector<400x32xf32>
    %3 = tpu.matmul %1, %2, %cst {dimension_numbers = #tpu.dot_dimension_numbers<[1], [0], [0], [1], [0, 0, 1, 1], [], []>} : vector<400x256xbf16>, vector<256x32xbf16>, vector<400x32xf32> -> vector<400x32xf32>
    %c0_4 = arith.constant 0 : index
    %c0_5 = arith.constant 0 : index
    %4 = vector.load %arg3[%c0_4, %c0_5] : memref<1x32xf32, #tpu.memory_space<vmem>>, vector<1x32xf32>
    %5 = vector.broadcast %4 : vector<1x32xf32> to vector<400x32xf32>
    %6 = arith.addf %3, %5 : vector<400x32xf32>
    %cst_6 = arith.constant 0.000000e+00 : f32
    %7 = vector.broadcast %cst_6 : f32 to vector<400x32xf32>
    %8 = arith.maximumf %6, %7 : vector<400x32xf32>
    %c0_7 = arith.constant 0 : index
    %c0_8 = arith.constant 0 : index
    %9 = vector.load %arg9[%c0_7, %c0_8] : memref<400x32xf32, #tpu.memory_space<vmem>>, vector<400x32xf32>
    tpu.vector_store %arg9[%c0_7, %c0_8], %8 {strides = array<i32>} : memref<400x32xf32, #tpu.memory_space<vmem>>, vector<400x32xf32>,
    %c0_9 = arith.constant 0 : index
    %c0_10 = arith.constant 0 : index
    %10 = vector.load %arg9[%c0_9, %c0_10] : memref<400x32xf32, #tpu.memory_space<vmem>>, vector<80x32xf32>
    %11 = vector.extract_strided_slice %10 {offsets = [0, 0], sizes = [9, 32], strides = [1, 1]} : vector<80x32xf32> to vector<9x32xf32>
    %12 = vector.extract_strided_slice %10 {offsets = [10, 0], sizes = [9, 32], strides = [1, 1]} : vector<80x32xf32> to vector<9x32xf32>
    %13 = vector.extract_strided_slice %10 {offsets = [1, 0], sizes = [9, 32], strides = [1, 1]} : vector<80x32xf32> to vector<9x32xf32>
    %14 = vector.extract_strided_slice %10 {offsets = [11, 0], sizes = [9, 32], strides = [1, 1]} : vector<80x32xf32> to vector<9x32xf32>
    %15 = vector.extract_strided_slice %10 {offsets = [20, 0], sizes = [9, 32], strides = [1, 1]} : vector<80x32xf32> to vector<9x32xf32>
    %16 = vector.extract_strided_slice %10 {offsets = [30, 0], sizes = [9, 32], strides = [1, 1]} : vector<80x32xf32> to vector<9x32xf32>
    %17 = vector.extract_strided_slice %10 {offsets = [21, 0], sizes = [9, 32], strides = [1, 1]} : vector<80x32xf32> to vector<9x32xf32>
    %18 = vector.extract_strided_slice %10 {offsets = [31, 0], sizes = [9, 32], strides = [1, 1]} : vector<80x32xf32> to vector<9x32xf32>
    %19 = vector.extract_strided_slice %10 {offsets = [40, 0], sizes = [9, 32], strides = [1, 1]} : vector<80x32xf32> to vector<9x32xf32>
    %20 = vector.extract_strided_slice %10 {offsets = [50, 0], sizes = [9, 32], strides = [1, 1]} : vector<80x32xf32> to vector<9x32xf32>
    %21 = vector.extract_strided_slice %10 {offsets = [41, 0], sizes = [9, 32], strides = [1, 1]} : vector<80x32xf32> to vector<9x32xf32>
    %22 = vector.extract_strided_slice %10 {offsets = [51, 0], sizes = [9, 32], strides = [1, 1]} : vector<80x32xf32> to vector<9x32xf32>
    %23 = vector.extract_strided_slice %10 {offsets = [60, 0], sizes = [9, 32], strides = [1, 1]} : vector<80x32xf32> to vector<9x32xf32>
    %24 = vector.extract_strided_slice %10 {offsets = [70, 0], sizes = [9, 32], strides = [1, 1]} : vector<80x32xf32> to vector<9x32xf32>
    %25 = vector.extract_strided_slice %10 {offsets = [61, 0], sizes = [9, 32], strides = [1, 1]} : vector<80x32xf32> to vector<9x32xf32>
    %26 = vector.extract_strided_slice %10 {offsets = [71, 0], sizes = [9, 32], strides = [1, 1]} : vector<80x32xf32> to vector<9x32xf32>
    %27 = tpu.concatenate %11, %12, %13, %14, %15, %16, %17, %18, %19, %20, %21, %22, %23, %24, %25, %26 in 1 : vector<9x32xf32>, vector<9x32xf32>, vector<9x32xf32>, vector<9x32xf32>, vector<9x32xf32>, vector<9x32xf32>, vector<9x32xf32>, vector<9x32xf32>, vector<9x32xf32>, vector<9x32xf32>, vector<9x32xf32>, vector<9x32xf32>, vector<9x32xf32>, vector<9x32xf32>, vector<9x32xf32>, vector<9x32xf32> -> vector<9x512xf32>
    %c0_11 = arith.constant 0 : index
    %c0_12 = arith.constant 0 : index
    %28 = vector.load %arg10[%c0_11, %c0_12] : memref<81x512xf32, #tpu.memory_space<vmem>>, vector<9x512xf32>
    tpu.vector_store %arg10[%c0_11, %c0_12], %27 {strides = array<i32>} : memref<81x512xf32, #tpu.memory_space<vmem>>, vector<9x512xf32>,
    %c40 = arith.constant 40 : index
    %c0_13 = arith.constant 0 : index
    %29 = vector.load %arg9[%c40, %c0_13] : memref<400x32xf32, #tpu.memory_space<vmem>>, vector<80x32xf32>
    %30 = vector.extract_strided_slice %29 {offsets = [0, 0], sizes = [9, 32], strides = [1, 1]} : vector<80x32xf32> to vector<9x32xf32>
    %31 = vector.extract_strided_slice %29 {offsets = [10, 0], sizes = [9, 32], strides = [1, 1]} : vector<80x32xf32> to vector<9x32xf32>
    %32 = vector.extract_strided_slice %29 {offsets = [1, 0], sizes = [9, 32], strides = [1, 1]} : vector<80x32xf32> to vector<9x32xf32>
    %33 = vector.extract_strided_slice %29 {offsets = [11, 0], sizes = [9, 32], strides = [1, 1]} : vector<80x32xf32> to vector<9x32xf32>
    %34 = vector.extract_strided_slice %29 {offsets = [20, 0], sizes = [9, 32], strides = [1, 1]} : vector<80x32xf32> to vector<9x32xf32>
    %35 = vector.extract_strided_slice %29 {offsets = [30, 0], sizes = [9, 32], strides = [1, 1]} : vector<80x32xf32> to vector<9x32xf32>
    %36 = vector.extract_strided_slice %29 {offsets = [21, 0], sizes = [9, 32], strides = [1, 1]} : vector<80x32xf32> to vector<9x32xf32>
    %37 = vector.extract_strided_slice %29 {offsets = [31, 0], sizes = [9, 32], strides = [1, 1]} : vector<80x32xf32> to vector<9x32xf32>
    %38 = vector.extract_strided_slice %29 {offsets = [40, 0], sizes = [9, 32], strides = [1, 1]} : vector<80x32xf32> to vector<9x32xf32>
    %39 = vector.extract_strided_slice %29 {offsets = [50, 0], sizes = [9, 32], strides = [1, 1]} : vector<80x32xf32> to vector<9x32xf32>
    %40 = vector.extract_strided_slice %29 {offsets = [41, 0], sizes = [9, 32], strides = [1, 1]} : vector<80x32xf32> to vector<9x32xf32>
    %41 = vector.extract_strided_slice %29 {offsets = [51, 0], sizes = [9, 32], strides = [1, 1]} : vector<80x32xf32> to vector<9x32xf32>
    %42 = vector.extract_strided_slice %29 {offsets = [60, 0], sizes = [9, 32], strides = [1, 1]} : vector<80x32xf32> to vector<9x32xf32>
    %43 = vector.extract_strided_slice %29 {offsets = [70, 0], sizes = [9, 32], strides = [1, 1]} : vector<80x32xf32> to vector<9x32xf32>
    %44 = vector.extract_strided_slice %29 {offsets = [61, 0], sizes = [9, 32], strides = [1, 1]} : vector<80x32xf32> to vector<9x32xf32>
    %45 = vector.extract_strided_slice %29 {offsets = [71, 0], sizes = [9, 32], strides = [1, 1]} : vector<80x32xf32> to vector<9x32xf32>
    %46 = tpu.concatenate %30, %31, %32, %33, %34, %35, %36, %37, %38, %39, %40, %41, %42, %43, %44, %45 in 1 : vector<9x32xf32>, vector<9x32xf32>, vector<9x32xf32>, vector<9x32xf32>, vector<9x32xf32>, vector<9x32xf32>, vector<9x32xf32>, vector<9x32xf32>, vector<9x32xf32>, vector<9x32xf32>, vector<9x32xf32>, vector<9x32xf32>, vector<9x32xf32>, vector<9x32xf32>, vector<9x32xf32>, vector<9x32xf32> -> vector<9x512xf32>
    %c9 = arith.constant 9 : index
    %c0_14 = arith.constant 0 : index
    %47 = vector.load %arg10[%c9, %c0_14] : memref<81x512xf32, #tpu.memory_space<vmem>>, vector<9x512xf32>
    tpu.vector_store %arg10[%c9, %c0_14], %46 {strides = array<i32>} : memref<81x512xf32, #tpu.memory_space<vmem>>, vector<9x512xf32>,
    %c80 = arith.constant 80 : index
    %c0_15 = arith.constant 0 : index
    %48 = vector.load %arg9[%c80, %c0_15] : memref<400x32xf32, #tpu.memory_space<vmem>>, vector<80x32xf32>
    %49 = vector.extract_strided_slice %48 {offsets = [0, 0], sizes = [9, 32], strides = [1, 1]} : vector<80x32xf32> to vector<9x32xf32>
    %50 = vector.extract_strided_slice %48 {offsets = [10, 0], sizes = [9, 32], strides = [1, 1]} : vector<80x32xf32> to vector<9x32xf32>
    %51 = vector.extract_strided_slice %48 {offsets = [1, 0], sizes = [9, 32], strides = [1, 1]} : vector<80x32xf32> to vector<9x32xf32>
    %52 = vector.extract_strided_slice %48 {offsets = [11, 0], sizes = [9, 32], strides = [1, 1]} : vector<80x32xf32> to vector<9x32xf32>
    %53 = vector.extract_strided_slice %48 {offsets = [20, 0], sizes = [9, 32], strides = [1, 1]} : vector<80x32xf32> to vector<9x32xf32>
    %54 = vector.extract_strided_slice %48 {offsets = [30, 0], sizes = [9, 32], strides = [1, 1]} : vector<80x32xf32> to vector<9x32xf32>
    %55 = vector.extract_strided_slice %48 {offsets = [21, 0], sizes = [9, 32], strides = [1, 1]} : vector<80x32xf32> to vector<9x32xf32>
    %56 = vector.extract_strided_slice %48 {offsets = [31, 0], sizes = [9, 32], strides = [1, 1]} : vector<80x32xf32> to vector<9x32xf32>
    %57 = vector.extract_strided_slice %48 {offsets = [40, 0], sizes = [9, 32], strides = [1, 1]} : vector<80x32xf32> to vector<9x32xf32>
    %58 = vector.extract_strided_slice %48 {offsets = [50, 0], sizes = [9, 32], strides = [1, 1]} : vector<80x32xf32> to vector<9x32xf32>
    %59 = vector.extract_strided_slice %48 {offsets = [41, 0], sizes = [9, 32], strides = [1, 1]} : vector<80x32xf32> to vector<9x32xf32>
    %60 = vector.extract_strided_slice %48 {offsets = [51, 0], sizes = [9, 32], strides = [1, 1]} : vector<80x32xf32> to vector<9x32xf32>
    %61 = vector.extract_strided_slice %48 {offsets = [60, 0], sizes = [9, 32], strides = [1, 1]} : vector<80x32xf32> to vector<9x32xf32>
    %62 = vector.extract_strided_slice %48 {offsets = [70, 0], sizes = [9, 32], strides = [1, 1]} : vector<80x32xf32> to vector<9x32xf32>
    %63 = vector.extract_strided_slice %48 {offsets = [61, 0], sizes = [9, 32], strides = [1, 1]} : vector<80x32xf32> to vector<9x32xf32>
    %64 = vector.extract_strided_slice %48 {offsets = [71, 0], sizes = [9, 32], strides = [1, 1]} : vector<80x32xf32> to vector<9x32xf32>
    %65 = tpu.concatenate %49, %50, %51, %52, %53, %54, %55, %56, %57, %58, %59, %60, %61, %62, %63, %64 in 1 : vector<9x32xf32>, vector<9x32xf32>, vector<9x32xf32>, vector<9x32xf32>, vector<9x32xf32>, vector<9x32xf32>, vector<9x32xf32>, vector<9x32xf32>, vector<9x32xf32>, vector<9x32xf32>, vector<9x32xf32>, vector<9x32xf32>, vector<9x32xf32>, vector<9x32xf32>, vector<9x32xf32>, vector<9x32xf32> -> vector<9x512xf32>
    %c18 = arith.constant 18 : index
    %c0_16 = arith.constant 0 : index
    %66 = vector.load %arg10[%c18, %c0_16] : memref<81x512xf32, #tpu.memory_space<vmem>>, vector<9x512xf32>
    tpu.vector_store %arg10[%c18, %c0_16], %65 {strides = array<i32>} : memref<81x512xf32, #tpu.memory_space<vmem>>, vector<9x512xf32>,
    %c120 = arith.constant 120 : index
    %c0_17 = arith.constant 0 : index
    %67 = vector.load %arg9[%c120, %c0_17] : memref<400x32xf32, #tpu.memory_space<vmem>>, vector<80x32xf32>
    %68 = vector.extract_strided_slice %67 {offsets = [0, 0], sizes = [9, 32], strides = [1, 1]} : vector<80x32xf32> to vector<9x32xf32>
    %69 = vector.extract_strided_slice %67 {offsets = [10, 0], sizes = [9, 32], strides = [1, 1]} : vector<80x32xf32> to vector<9x32xf32>
    %70 = vector.extract_strided_slice %67 {offsets = [1, 0], sizes = [9, 32], strides = [1, 1]} : vector<80x32xf32> to vector<9x32xf32>
    %71 = vector.extract_strided_slice %67 {offsets = [11, 0], sizes = [9, 32], strides = [1, 1]} : vector<80x32xf32> to vector<9x32xf32>
    %72 = vector.extract_strided_slice %67 {offsets = [20, 0], sizes = [9, 32], strides = [1, 1]} : vector<80x32xf32> to vector<9x32xf32>
    %73 = vector.extract_strided_slice %67 {offsets = [30, 0], sizes = [9, 32], strides = [1, 1]} : vector<80x32xf32> to vector<9x32xf32>
    %74 = vector.extract_strided_slice %67 {offsets = [21, 0], sizes = [9, 32], strides = [1, 1]} : vector<80x32xf32> to vector<9x32xf32>
    %75 = vector.extract_strided_slice %67 {offsets = [31, 0], sizes = [9, 32], strides = [1, 1]} : vector<80x32xf32> to vector<9x32xf32>
    %76 = vector.extract_strided_slice %67 {offsets = [40, 0], sizes = [9, 32], strides = [1, 1]} : vector<80x32xf32> to vector<9x32xf32>
    %77 = vector.extract_strided_slice %67 {offsets = [50, 0], sizes = [9, 32], strides = [1, 1]} : vector<80x32xf32> to vector<9x32xf32>
    %78 = vector.extract_strided_slice %67 {offsets = [41, 0], sizes = [9, 32], strides = [1, 1]} : vector<80x32xf32> to vector<9x32xf32>
    %79 = vector.extract_strided_slice %67 {offsets = [51, 0], sizes = [9, 32], strides = [1, 1]} : vector<80x32xf32> to vector<9x32xf32>
    %80 = vector.extract_strided_slice %67 {offsets = [60, 0], sizes = [9, 32], strides = [1, 1]} : vector<80x32xf32> to vector<9x32xf32>
    %81 = vector.extract_strided_slice %67 {offsets = [70, 0], sizes = [9, 32], strides = [1, 1]} : vector<80x32xf32> to vector<9x32xf32>
    %82 = vector.extract_strided_slice %67 {offsets = [61, 0], sizes = [9, 32], strides = [1, 1]} : vector<80x32xf32> to vector<9x32xf32>
    %83 = vector.extract_strided_slice %67 {offsets = [71, 0], sizes = [9, 32], strides = [1, 1]} : vector<80x32xf32> to vector<9x32xf32>
    %84 = tpu.concatenate %68, %69, %70, %71, %72, %73, %74, %75, %76, %77, %78, %79, %80, %81, %82, %83 in 1 : vector<9x32xf32>, vector<9x32xf32>, vector<9x32xf32>, vector<9x32xf32>, vector<9x32xf32>, vector<9x32xf32>, vector<9x32xf32>, vector<9x32xf32>, vector<9x32xf32>, vector<9x32xf32>, vector<9x32xf32>, vector<9x32xf32>, vector<9x32xf32>, vector<9x32xf32>, vector<9x32xf32>, vector<9x32xf32> -> vector<9x512xf32>
    %c27 = arith.constant 27 : index
    %c0_18 = arith.constant 0 : index
    %85 = vector.load %arg10[%c27, %c0_18] : memref<81x512xf32, #tpu.memory_space<vmem>>, vector<9x512xf32>
    tpu.vector_store %arg10[%c27, %c0_18], %84 {strides = array<i32>} : memref<81x512xf32, #tpu.memory_space<vmem>>, vector<9x512xf32>,
    %c160 = arith.constant 160 : index
    %c0_19 = arith.constant 0 : index
    %86 = vector.load %arg9[%c160, %c0_19] : memref<400x32xf32, #tpu.memory_space<vmem>>, vector<80x32xf32>
    %87 = vector.extract_strided_slice %86 {offsets = [0, 0], sizes = [9, 32], strides = [1, 1]} : vector<80x32xf32> to vector<9x32xf32>
    %88 = vector.extract_strided_slice %86 {offsets = [10, 0], sizes = [9, 32], strides = [1, 1]} : vector<80x32xf32> to vector<9x32xf32>
    %89 = vector.extract_strided_slice %86 {offsets = [1, 0], sizes = [9, 32], strides = [1, 1]} : vector<80x32xf32> to vector<9x32xf32>
    %90 = vector.extract_strided_slice %86 {offsets = [11, 0], sizes = [9, 32], strides = [1, 1]} : vector<80x32xf32> to vector<9x32xf32>
    %91 = vector.extract_strided_slice %86 {offsets = [20, 0], sizes = [9, 32], strides = [1, 1]} : vector<80x32xf32> to vector<9x32xf32>
    %92 = vector.extract_strided_slice %86 {offsets = [30, 0], sizes = [9, 32], strides = [1, 1]} : vector<80x32xf32> to vector<9x32xf32>
    %93 = vector.extract_strided_slice %86 {offsets = [21, 0], sizes = [9, 32], strides = [1, 1]} : vector<80x32xf32> to vector<9x32xf32>
    %94 = vector.extract_strided_slice %86 {offsets = [31, 0], sizes = [9, 32], strides = [1, 1]} : vector<80x32xf32> to vector<9x32xf32>
    %95 = vector.extract_strided_slice %86 {offsets = [40, 0], sizes = [9, 32], strides = [1, 1]} : vector<80x32xf32> to vector<9x32xf32>
    %96 = vector.extract_strided_slice %86 {offsets = [50, 0], sizes = [9, 32], strides = [1, 1]} : vector<80x32xf32> to vector<9x32xf32>
    %97 = vector.extract_strided_slice %86 {offsets = [41, 0], sizes = [9, 32], strides = [1, 1]} : vector<80x32xf32> to vector<9x32xf32>
    %98 = vector.extract_strided_slice %86 {offsets = [51, 0], sizes = [9, 32], strides = [1, 1]} : vector<80x32xf32> to vector<9x32xf32>
    %99 = vector.extract_strided_slice %86 {offsets = [60, 0], sizes = [9, 32], strides = [1, 1]} : vector<80x32xf32> to vector<9x32xf32>
    %100 = vector.extract_strided_slice %86 {offsets = [70, 0], sizes = [9, 32], strides = [1, 1]} : vector<80x32xf32> to vector<9x32xf32>
    %101 = vector.extract_strided_slice %86 {offsets = [61, 0], sizes = [9, 32], strides = [1, 1]} : vector<80x32xf32> to vector<9x32xf32>
    %102 = vector.extract_strided_slice %86 {offsets = [71, 0], sizes = [9, 32], strides = [1, 1]} : vector<80x32xf32> to vector<9x32xf32>
    %103 = tpu.concatenate %87, %88, %89, %90, %91, %92, %93, %94, %95, %96, %97, %98, %99, %100, %101, %102 in 1 : vector<9x32xf32>, vector<9x32xf32>, vector<9x32xf32>, vector<9x32xf32>, vector<9x32xf32>, vector<9x32xf32>, vector<9x32xf32>, vector<9x32xf32>, vector<9x32xf32>, vector<9x32xf32>, vector<9x32xf32>, vector<9x32xf32>, vector<9x32xf32>, vector<9x32xf32>, vector<9x32xf32>, vector<9x32xf32> -> vector<9x512xf32>
    %c36 = arith.constant 36 : index
    %c0_20 = arith.constant 0 : index
    %104 = vector.load %arg10[%c36, %c0_20] : memref<81x512xf32, #tpu.memory_space<vmem>>, vector<9x512xf32>
    tpu.vector_store %arg10[%c36, %c0_20], %103 {strides = array<i32>} : memref<81x512xf32, #tpu.memory_space<vmem>>, vector<9x512xf32>,
    %c200 = arith.constant 200 : index
    %c0_21 = arith.constant 0 : index
    %105 = vector.load %arg9[%c200, %c0_21] : memref<400x32xf32, #tpu.memory_space<vmem>>, vector<80x32xf32>
    %106 = vector.extract_strided_slice %105 {offsets = [0, 0], sizes = [9, 32], strides = [1, 1]} : vector<80x32xf32> to vector<9x32xf32>
    %107 = vector.extract_strided_slice %105 {offsets = [10, 0], sizes = [9, 32], strides = [1, 1]} : vector<80x32xf32> to vector<9x32xf32>
    %108 = vector.extract_strided_slice %105 {offsets = [1, 0], sizes = [9, 32], strides = [1, 1]} : vector<80x32xf32> to vector<9x32xf32>
    %109 = vector.extract_strided_slice %105 {offsets = [11, 0], sizes = [9, 32], strides = [1, 1]} : vector<80x32xf32> to vector<9x32xf32>
    %110 = vector.extract_strided_slice %105 {offsets = [20, 0], sizes = [9, 32], strides = [1, 1]} : vector<80x32xf32> to vector<9x32xf32>
    %111 = vector.extract_strided_slice %105 {offsets = [30, 0], sizes = [9, 32], strides = [1, 1]} : vector<80x32xf32> to vector<9x32xf32>
    %112 = vector.extract_strided_slice %105 {offsets = [21, 0], sizes = [9, 32], strides = [1, 1]} : vector<80x32xf32> to vector<9x32xf32>
    %113 = vector.extract_strided_slice %105 {offsets = [31, 0], sizes = [9, 32], strides = [1, 1]} : vector<80x32xf32> to vector<9x32xf32>
    %114 = vector.extract_strided_slice %105 {offsets = [40, 0], sizes = [9, 32], strides = [1, 1]} : vector<80x32xf32> to vector<9x32xf32>
    %115 = vector.extract_strided_slice %105 {offsets = [50, 0], sizes = [9, 32], strides = [1, 1]} : vector<80x32xf32> to vector<9x32xf32>
    %116 = vector.extract_strided_slice %105 {offsets = [41, 0], sizes = [9, 32], strides = [1, 1]} : vector<80x32xf32> to vector<9x32xf32>
    %117 = vector.extract_strided_slice %105 {offsets = [51, 0], sizes = [9, 32], strides = [1, 1]} : vector<80x32xf32> to vector<9x32xf32>
    %118 = vector.extract_strided_slice %105 {offsets = [60, 0], sizes = [9, 32], strides = [1, 1]} : vector<80x32xf32> to vector<9x32xf32>
    %119 = vector.extract_strided_slice %105 {offsets = [70, 0], sizes = [9, 32], strides = [1, 1]} : vector<80x32xf32> to vector<9x32xf32>
    %120 = vector.extract_strided_slice %105 {offsets = [61, 0], sizes = [9, 32], strides = [1, 1]} : vector<80x32xf32> to vector<9x32xf32>
    %121 = vector.extract_strided_slice %105 {offsets = [71, 0], sizes = [9, 32], strides = [1, 1]} : vector<80x32xf32> to vector<9x32xf32>
    %122 = tpu.concatenate %106, %107, %108, %109, %110, %111, %112, %113, %114, %115, %116, %117, %118, %119, %120, %121 in 1 : vector<9x32xf32>, vector<9x32xf32>, vector<9x32xf32>, vector<9x32xf32>, vector<9x32xf32>, vector<9x32xf32>, vector<9x32xf32>, vector<9x32xf32>, vector<9x32xf32>, vector<9x32xf32>, vector<9x32xf32>, vector<9x32xf32>, vector<9x32xf32>, vector<9x32xf32>, vector<9x32xf32>, vector<9x32xf32> -> vector<9x512xf32>
    %c45 = arith.constant 45 : index
    %c0_22 = arith.constant 0 : index
    %123 = vector.load %arg10[%c45, %c0_22] : memref<81x512xf32, #tpu.memory_space<vmem>>, vector<9x512xf32>
    tpu.vector_store %arg10[%c45, %c0_22], %122 {strides = array<i32>} : memref<81x512xf32, #tpu.memory_space<vmem>>, vector<9x512xf32>,
    %c240 = arith.constant 240 : index
    %c0_23 = arith.constant 0 : index
    %124 = vector.load %arg9[%c240, %c0_23] : memref<400x32xf32, #tpu.memory_space<vmem>>, vector<80x32xf32>
    %125 = vector.extract_strided_slice %124 {offsets = [0, 0], sizes = [9, 32], strides = [1, 1]} : vector<80x32xf32> to vector<9x32xf32>
    %126 = vector.extract_strided_slice %124 {offsets = [10, 0], sizes = [9, 32], strides = [1, 1]} : vector<80x32xf32> to vector<9x32xf32>
    %127 = vector.extract_strided_slice %124 {offsets = [1, 0], sizes = [9, 32], strides = [1, 1]} : vector<80x32xf32> to vector<9x32xf32>
    %128 = vector.extract_strided_slice %124 {offsets = [11, 0], sizes = [9, 32], strides = [1, 1]} : vector<80x32xf32> to vector<9x32xf32>
    %129 = vector.extract_strided_slice %124 {offsets = [20, 0], sizes = [9, 32], strides = [1, 1]} : vector<80x32xf32> to vector<9x32xf32>
    %130 = vector.extract_strided_slice %124 {offsets = [30, 0], sizes = [9, 32], strides = [1, 1]} : vector<80x32xf32> to vector<9x32xf32>
    %131 = vector.extract_strided_slice %124 {offsets = [21, 0], sizes = [9, 32], strides = [1, 1]} : vector<80x32xf32> to vector<9x32xf32>
    %132 = vector.extract_strided_slice %124 {offsets = [31, 0], sizes = [9, 32], strides = [1, 1]} : vector<80x32xf32> to vector<9x32xf32>
    %133 = vector.extract_strided_slice %124 {offsets = [40, 0], sizes = [9, 32], strides = [1, 1]} : vector<80x32xf32> to vector<9x32xf32>
    %134 = vector.extract_strided_slice %124 {offsets = [50, 0], sizes = [9, 32], strides = [1, 1]} : vector<80x32xf32> to vector<9x32xf32>
    %135 = vector.extract_strided_slice %124 {offsets = [41, 0], sizes = [9, 32], strides = [1, 1]} : vector<80x32xf32> to vector<9x32xf32>
    %136 = vector.extract_strided_slice %124 {offsets = [51, 0], sizes = [9, 32], strides = [1, 1]} : vector<80x32xf32> to vector<9x32xf32>
    %137 = vector.extract_strided_slice %124 {offsets = [60, 0], sizes = [9, 32], strides = [1, 1]} : vector<80x32xf32> to vector<9x32xf32>
    %138 = vector.extract_strided_slice %124 {offsets = [70, 0], sizes = [9, 32], strides = [1, 1]} : vector<80x32xf32> to vector<9x32xf32>
    %139 = vector.extract_strided_slice %124 {offsets = [61, 0], sizes = [9, 32], strides = [1, 1]} : vector<80x32xf32> to vector<9x32xf32>
    %140 = vector.extract_strided_slice %124 {offsets = [71, 0], sizes = [9, 32], strides = [1, 1]} : vector<80x32xf32> to vector<9x32xf32>
    %141 = tpu.concatenate %125, %126, %127, %128, %129, %130, %131, %132, %133, %134, %135, %136, %137, %138, %139, %140 in 1 : vector<9x32xf32>, vector<9x32xf32>, vector<9x32xf32>, vector<9x32xf32>, vector<9x32xf32>, vector<9x32xf32>, vector<9x32xf32>, vector<9x32xf32>, vector<9x32xf32>, vector<9x32xf32>, vector<9x32xf32>, vector<9x32xf32>, vector<9x32xf32>, vector<9x32xf32>, vector<9x32xf32>, vector<9x32xf32> -> vector<9x512xf32>
    %c54 = arith.constant 54 : index
    %c0_24 = arith.constant 0 : index
    %142 = vector.load %arg10[%c54, %c0_24] : memref<81x512xf32, #tpu.memory_space<vmem>>, vector<9x512xf32>
    tpu.vector_store %arg10[%c54, %c0_24], %141 {strides = array<i32>} : memref<81x512xf32, #tpu.memory_space<vmem>>, vector<9x512xf32>,
    %c280 = arith.constant 280 : index
    %c0_25 = arith.constant 0 : index
    %143 = vector.load %arg9[%c280, %c0_25] : memref<400x32xf32, #tpu.memory_space<vmem>>, vector<80x32xf32>
    %144 = vector.extract_strided_slice %143 {offsets = [0, 0], sizes = [9, 32], strides = [1, 1]} : vector<80x32xf32> to vector<9x32xf32>
    %145 = vector.extract_strided_slice %143 {offsets = [10, 0], sizes = [9, 32], strides = [1, 1]} : vector<80x32xf32> to vector<9x32xf32>
    %146 = vector.extract_strided_slice %143 {offsets = [1, 0], sizes = [9, 32], strides = [1, 1]} : vector<80x32xf32> to vector<9x32xf32>
    %147 = vector.extract_strided_slice %143 {offsets = [11, 0], sizes = [9, 32], strides = [1, 1]} : vector<80x32xf32> to vector<9x32xf32>
    %148 = vector.extract_strided_slice %143 {offsets = [20, 0], sizes = [9, 32], strides = [1, 1]} : vector<80x32xf32> to vector<9x32xf32>
    %149 = vector.extract_strided_slice %143 {offsets = [30, 0], sizes = [9, 32], strides = [1, 1]} : vector<80x32xf32> to vector<9x32xf32>
    %150 = vector.extract_strided_slice %143 {offsets = [21, 0], sizes = [9, 32], strides = [1, 1]} : vector<80x32xf32> to vector<9x32xf32>
    %151 = vector.extract_strided_slice %143 {offsets = [31, 0], sizes = [9, 32], strides = [1, 1]} : vector<80x32xf32> to vector<9x32xf32>
    %152 = vector.extract_strided_slice %143 {offsets = [40, 0], sizes = [9, 32], strides = [1, 1]} : vector<80x32xf32> to vector<9x32xf32>
    %153 = vector.extract_strided_slice %143 {offsets = [50, 0], sizes = [9, 32], strides = [1, 1]} : vector<80x32xf32> to vector<9x32xf32>
    %154 = vector.extract_strided_slice %143 {offsets = [41, 0], sizes = [9, 32], strides = [1, 1]} : vector<80x32xf32> to vector<9x32xf32>
    %155 = vector.extract_strided_slice %143 {offsets = [51, 0], sizes = [9, 32], strides = [1, 1]} : vector<80x32xf32> to vector<9x32xf32>
    %156 = vector.extract_strided_slice %143 {offsets = [60, 0], sizes = [9, 32], strides = [1, 1]} : vector<80x32xf32> to vector<9x32xf32>
    %157 = vector.extract_strided_slice %143 {offsets = [70, 0], sizes = [9, 32], strides = [1, 1]} : vector<80x32xf32> to vector<9x32xf32>
    %158 = vector.extract_strided_slice %143 {offsets = [61, 0], sizes = [9, 32], strides = [1, 1]} : vector<80x32xf32> to vector<9x32xf32>
    %159 = vector.extract_strided_slice %143 {offsets = [71, 0], sizes = [9, 32], strides = [1, 1]} : vector<80x32xf32> to vector<9x32xf32>
    %160 = tpu.concatenate %144, %145, %146, %147, %148, %149, %150, %151, %152, %153, %154, %155, %156, %157, %158, %159 in 1 : vector<9x32xf32>, vector<9x32xf32>, vector<9x32xf32>, vector<9x32xf32>, vector<9x32xf32>, vector<9x32xf32>, vector<9x32xf32>, vector<9x32xf32>, vector<9x32xf32>, vector<9x32xf32>, vector<9x32xf32>, vector<9x32xf32>, vector<9x32xf32>, vector<9x32xf32>, vector<9x32xf32>, vector<9x32xf32> -> vector<9x512xf32>
    %c63 = arith.constant 63 : index
    %c0_26 = arith.constant 0 : index
    %161 = vector.load %arg10[%c63, %c0_26] : memref<81x512xf32, #tpu.memory_space<vmem>>, vector<9x512xf32>
    tpu.vector_store %arg10[%c63, %c0_26], %160 {strides = array<i32>} : memref<81x512xf32, #tpu.memory_space<vmem>>, vector<9x512xf32>,
    %c320 = arith.constant 320 : index
    %c0_27 = arith.constant 0 : index
    %162 = vector.load %arg9[%c320, %c0_27] : memref<400x32xf32, #tpu.memory_space<vmem>>, vector<80x32xf32>
    %163 = vector.extract_strided_slice %162 {offsets = [0, 0], sizes = [9, 32], strides = [1, 1]} : vector<80x32xf32> to vector<9x32xf32>
    %164 = vector.extract_strided_slice %162 {offsets = [10, 0], sizes = [9, 32], strides = [1, 1]} : vector<80x32xf32> to vector<9x32xf32>
    %165 = vector.extract_strided_slice %162 {offsets = [1, 0], sizes = [9, 32], strides = [1, 1]} : vector<80x32xf32> to vector<9x32xf32>
    %166 = vector.extract_strided_slice %162 {offsets = [11, 0], sizes = [9, 32], strides = [1, 1]} : vector<80x32xf32> to vector<9x32xf32>
    %167 = vector.extract_strided_slice %162 {offsets = [20, 0], sizes = [9, 32], strides = [1, 1]} : vector<80x32xf32> to vector<9x32xf32>
    %168 = vector.extract_strided_slice %162 {offsets = [30, 0], sizes = [9, 32], strides = [1, 1]} : vector<80x32xf32> to vector<9x32xf32>
    %169 = vector.extract_strided_slice %162 {offsets = [21, 0], sizes = [9, 32], strides = [1, 1]} : vector<80x32xf32> to vector<9x32xf32>
    %170 = vector.extract_strided_slice %162 {offsets = [31, 0], sizes = [9, 32], strides = [1, 1]} : vector<80x32xf32> to vector<9x32xf32>
    %171 = vector.extract_strided_slice %162 {offsets = [40, 0], sizes = [9, 32], strides = [1, 1]} : vector<80x32xf32> to vector<9x32xf32>
    %172 = vector.extract_strided_slice %162 {offsets = [50, 0], sizes = [9, 32], strides = [1, 1]} : vector<80x32xf32> to vector<9x32xf32>
    %173 = vector.extract_strided_slice %162 {offsets = [41, 0], sizes = [9, 32], strides = [1, 1]} : vector<80x32xf32> to vector<9x32xf32>
    %174 = vector.extract_strided_slice %162 {offsets = [51, 0], sizes = [9, 32], strides = [1, 1]} : vector<80x32xf32> to vector<9x32xf32>
    %175 = vector.extract_strided_slice %162 {offsets = [60, 0], sizes = [9, 32], strides = [1, 1]} : vector<80x32xf32> to vector<9x32xf32>
    %176 = vector.extract_strided_slice %162 {offsets = [70, 0], sizes = [9, 32], strides = [1, 1]} : vector<80x32xf32> to vector<9x32xf32>
    %177 = vector.extract_strided_slice %162 {offsets = [61, 0], sizes = [9, 32], strides = [1, 1]} : vector<80x32xf32> to vector<9x32xf32>
    %178 = vector.extract_strided_slice %162 {offsets = [71, 0], sizes = [9, 32], strides = [1, 1]} : vector<80x32xf32> to vector<9x32xf32>
    %179 = tpu.concatenate %163, %164, %165, %166, %167, %168, %169, %170, %171, %172, %173, %174, %175, %176, %177, %178 in 1 : vector<9x32xf32>, vector<9x32xf32>, vector<9x32xf32>, vector<9x32xf32>, vector<9x32xf32>, vector<9x32xf32>, vector<9x32xf32>, vector<9x32xf32>, vector<9x32xf32>, vector<9x32xf32>, vector<9x32xf32>, vector<9x32xf32>, vector<9x32xf32>, vector<9x32xf32>, vector<9x32xf32>, vector<9x32xf32> -> vector<9x512xf32>
    %c72 = arith.constant 72 : index
    %c0_28 = arith.constant 0 : index
    %180 = vector.load %arg10[%c72, %c0_28] : memref<81x512xf32, #tpu.memory_space<vmem>>, vector<9x512xf32>
    tpu.vector_store %arg10[%c72, %c0_28], %179 {strides = array<i32>} : memref<81x512xf32, #tpu.memory_space<vmem>>, vector<9x512xf32>,
    %c0_29 = arith.constant 0 : index
    %c0_30 = arith.constant 0 : index
    %181 = vector.load %arg10[%c0_29, %c0_30] : memref<81x512xf32, #tpu.memory_space<vmem>>, vector<81x512xf32>
    %182 = arith.truncf %181 : vector<81x512xf32> to vector<81x512xbf16>
    %c0_31 = arith.constant 0 : index
    %c0_32 = arith.constant 0 : index
    %183 = vector.load %arg4[%c0_31, %c0_32] : memref<512x64xbf16, #tpu.memory_space<vmem>>, vector<512x64xbf16>
    %cst_33 = arith.constant dense<0.000000e+00> : vector<81x64xf32>
    %184 = tpu.matmul %182, %183, %cst_33 {dimension_numbers = #tpu.dot_dimension_numbers<[1], [0], [0], [1], [0, 0, 1, 1], [], []>} : vector<81x512xbf16>, vector<512x64xbf16>, vector<81x64xf32> -> vector<81x64xf32>
    %c0_34 = arith.constant 0 : index
    %c0_35 = arith.constant 0 : index
    %185 = vector.load %arg5[%c0_34, %c0_35] : memref<1x64xf32, #tpu.memory_space<vmem>>, vector<1x64xf32>
    %186 = vector.broadcast %185 : vector<1x64xf32> to vector<81x64xf32>
    %187 = arith.addf %184, %186 : vector<81x64xf32>
    %cst_36 = arith.constant 0.000000e+00 : f32
    %188 = vector.broadcast %cst_36 : f32 to vector<81x64xf32>
    %189 = arith.maximumf %187, %188 : vector<81x64xf32>
    %c0_37 = arith.constant 0 : index
    %c0_38 = arith.constant 0 : index
    %190 = vector.load %arg11[%c0_37, %c0_38] : memref<81x64xf32, #tpu.memory_space<vmem>>, vector<81x64xf32>
    tpu.vector_store %arg11[%c0_37, %c0_38], %189 {strides = array<i32>} : memref<81x64xf32, #tpu.memory_space<vmem>>, vector<81x64xf32>,
    %c0_39 = arith.constant 0 : index
    %c0_40 = arith.constant 0 : index
    %191 = vector.load %arg11[%c0_39, %c0_40] : memref<81x64xf32, #tpu.memory_space<vmem>>, vector<27x64xf32>
    %192 = vector.extract_strided_slice %191 {offsets = [0, 0], sizes = [7, 64], strides = [1, 1]} : vector<27x64xf32> to vector<7x64xf32>
    %193 = vector.extract_strided_slice %191 {offsets = [1, 0], sizes = [7, 64], strides = [1, 1]} : vector<27x64xf32> to vector<7x64xf32>
    %194 = vector.extract_strided_slice %191 {offsets = [2, 0], sizes = [7, 64], strides = [1, 1]} : vector<27x64xf32> to vector<7x64xf32>
    %195 = vector.extract_strided_slice %191 {offsets = [9, 0], sizes = [7, 64], strides = [1, 1]} : vector<27x64xf32> to vector<7x64xf32>
    %196 = vector.extract_strided_slice %191 {offsets = [10, 0], sizes = [7, 64], strides = [1, 1]} : vector<27x64xf32> to vector<7x64xf32>
    %197 = vector.extract_strided_slice %191 {offsets = [11, 0], sizes = [7, 64], strides = [1, 1]} : vector<27x64xf32> to vector<7x64xf32>
    %198 = vector.extract_strided_slice %191 {offsets = [18, 0], sizes = [7, 64], strides = [1, 1]} : vector<27x64xf32> to vector<7x64xf32>
    %199 = vector.extract_strided_slice %191 {offsets = [19, 0], sizes = [7, 64], strides = [1, 1]} : vector<27x64xf32> to vector<7x64xf32>
    %200 = vector.extract_strided_slice %191 {offsets = [20, 0], sizes = [7, 64], strides = [1, 1]} : vector<27x64xf32> to vector<7x64xf32>
    %201 = tpu.concatenate %192, %193, %194, %195, %196, %197, %198, %199, %200 in 1 : vector<7x64xf32>, vector<7x64xf32>, vector<7x64xf32>, vector<7x64xf32>, vector<7x64xf32>, vector<7x64xf32>, vector<7x64xf32>, vector<7x64xf32>, vector<7x64xf32> -> vector<7x576xf32>
    %c0_41 = arith.constant 0 : index
    %c0_42 = arith.constant 0 : index
    %202 = vector.load %arg12[%c0_41, %c0_42] : memref<49x576xf32, #tpu.memory_space<vmem>>, vector<7x576xf32>
    tpu.vector_store %arg12[%c0_41, %c0_42], %201 {strides = array<i32>} : memref<49x576xf32, #tpu.memory_space<vmem>>, vector<7x576xf32>,
    %c9_43 = arith.constant 9 : index
    %c0_44 = arith.constant 0 : index
    %203 = vector.load %arg11[%c9_43, %c0_44] : memref<81x64xf32, #tpu.memory_space<vmem>>, vector<27x64xf32>
    %204 = vector.extract_strided_slice %203 {offsets = [0, 0], sizes = [7, 64], strides = [1, 1]} : vector<27x64xf32> to vector<7x64xf32>
    %205 = vector.extract_strided_slice %203 {offsets = [1, 0], sizes = [7, 64], strides = [1, 1]} : vector<27x64xf32> to vector<7x64xf32>
    %206 = vector.extract_strided_slice %203 {offsets = [2, 0], sizes = [7, 64], strides = [1, 1]} : vector<27x64xf32> to vector<7x64xf32>
    %207 = vector.extract_strided_slice %203 {offsets = [9, 0], sizes = [7, 64], strides = [1, 1]} : vector<27x64xf32> to vector<7x64xf32>
    %208 = vector.extract_strided_slice %203 {offsets = [10, 0], sizes = [7, 64], strides = [1, 1]} : vector<27x64xf32> to vector<7x64xf32>
    %209 = vector.extract_strided_slice %203 {offsets = [11, 0], sizes = [7, 64], strides = [1, 1]} : vector<27x64xf32> to vector<7x64xf32>
    %210 = vector.extract_strided_slice %203 {offsets = [18, 0], sizes = [7, 64], strides = [1, 1]} : vector<27x64xf32> to vector<7x64xf32>
    %211 = vector.extract_strided_slice %203 {offsets = [19, 0], sizes = [7, 64], strides = [1, 1]} : vector<27x64xf32> to vector<7x64xf32>
    %212 = vector.extract_strided_slice %203 {offsets = [20, 0], sizes = [7, 64], strides = [1, 1]} : vector<27x64xf32> to vector<7x64xf32>
    %213 = tpu.concatenate %204, %205, %206, %207, %208, %209, %210, %211, %212 in 1 : vector<7x64xf32>, vector<7x64xf32>, vector<7x64xf32>, vector<7x64xf32>, vector<7x64xf32>, vector<7x64xf32>, vector<7x64xf32>, vector<7x64xf32>, vector<7x64xf32> -> vector<7x576xf32>
    %c7 = arith.constant 7 : index
    %c0_45 = arith.constant 0 : index
    %214 = vector.load %arg12[%c7, %c0_45] : memref<49x576xf32, #tpu.memory_space<vmem>>, vector<7x576xf32>
    tpu.vector_store %arg12[%c7, %c0_45], %213 {strides = array<i32>} : memref<49x576xf32, #tpu.memory_space<vmem>>, vector<7x576xf32>,
    %c18_46 = arith.constant 18 : index
    %c0_47 = arith.constant 0 : index
    %215 = vector.load %arg11[%c18_46, %c0_47] : memref<81x64xf32, #tpu.memory_space<vmem>>, vector<27x64xf32>
    %216 = vector.extract_strided_slice %215 {offsets = [0, 0], sizes = [7, 64], strides = [1, 1]} : vector<27x64xf32> to vector<7x64xf32>
    %217 = vector.extract_strided_slice %215 {offsets = [1, 0], sizes = [7, 64], strides = [1, 1]} : vector<27x64xf32> to vector<7x64xf32>
    %218 = vector.extract_strided_slice %215 {offsets = [2, 0], sizes = [7, 64], strides = [1, 1]} : vector<27x64xf32> to vector<7x64xf32>
    %219 = vector.extract_strided_slice %215 {offsets = [9, 0], sizes = [7, 64], strides = [1, 1]} : vector<27x64xf32> to vector<7x64xf32>
    %220 = vector.extract_strided_slice %215 {offsets = [10, 0], sizes = [7, 64], strides = [1, 1]} : vector<27x64xf32> to vector<7x64xf32>
    %221 = vector.extract_strided_slice %215 {offsets = [11, 0], sizes = [7, 64], strides = [1, 1]} : vector<27x64xf32> to vector<7x64xf32>
    %222 = vector.extract_strided_slice %215 {offsets = [18, 0], sizes = [7, 64], strides = [1, 1]} : vector<27x64xf32> to vector<7x64xf32>
    %223 = vector.extract_strided_slice %215 {offsets = [19, 0], sizes = [7, 64], strides = [1, 1]} : vector<27x64xf32> to vector<7x64xf32>
    %224 = vector.extract_strided_slice %215 {offsets = [20, 0], sizes = [7, 64], strides = [1, 1]} : vector<27x64xf32> to vector<7x64xf32>
    %225 = tpu.concatenate %216, %217, %218, %219, %220, %221, %222, %223, %224 in 1 : vector<7x64xf32>, vector<7x64xf32>, vector<7x64xf32>, vector<7x64xf32>, vector<7x64xf32>, vector<7x64xf32>, vector<7x64xf32>, vector<7x64xf32>, vector<7x64xf32> -> vector<7x576xf32>
    %c14 = arith.constant 14 : index
    %c0_48 = arith.constant 0 : index
    %226 = vector.load %arg12[%c14, %c0_48] : memref<49x576xf32, #tpu.memory_space<vmem>>, vector<7x576xf32>
    tpu.vector_store %arg12[%c14, %c0_48], %225 {strides = array<i32>} : memref<49x576xf32, #tpu.memory_space<vmem>>, vector<7x576xf32>,
    %c27_49 = arith.constant 27 : index
    %c0_50 = arith.constant 0 : index
    %227 = vector.load %arg11[%c27_49, %c0_50] : memref<81x64xf32, #tpu.memory_space<vmem>>, vector<27x64xf32>
    %228 = vector.extract_strided_slice %227 {offsets = [0, 0], sizes = [7, 64], strides = [1, 1]} : vector<27x64xf32> to vector<7x64xf32>
    %229 = vector.extract_strided_slice %227 {offsets = [1, 0], sizes = [7, 64], strides = [1, 1]} : vector<27x64xf32> to vector<7x64xf32>
    %230 = vector.extract_strided_slice %227 {offsets = [2, 0], sizes = [7, 64], strides = [1, 1]} : vector<27x64xf32> to vector<7x64xf32>
    %231 = vector.extract_strided_slice %227 {offsets = [9, 0], sizes = [7, 64], strides = [1, 1]} : vector<27x64xf32> to vector<7x64xf32>
    %232 = vector.extract_strided_slice %227 {offsets = [10, 0], sizes = [7, 64], strides = [1, 1]} : vector<27x64xf32> to vector<7x64xf32>
    %233 = vector.extract_strided_slice %227 {offsets = [11, 0], sizes = [7, 64], strides = [1, 1]} : vector<27x64xf32> to vector<7x64xf32>
    %234 = vector.extract_strided_slice %227 {offsets = [18, 0], sizes = [7, 64], strides = [1, 1]} : vector<27x64xf32> to vector<7x64xf32>
    %235 = vector.extract_strided_slice %227 {offsets = [19, 0], sizes = [7, 64], strides = [1, 1]} : vector<27x64xf32> to vector<7x64xf32>
    %236 = vector.extract_strided_slice %227 {offsets = [20, 0], sizes = [7, 64], strides = [1, 1]} : vector<27x64xf32> to vector<7x64xf32>
    %237 = tpu.concatenate %228, %229, %230, %231, %232, %233, %234, %235, %236 in 1 : vector<7x64xf32>, vector<7x64xf32>, vector<7x64xf32>, vector<7x64xf32>, vector<7x64xf32>, vector<7x64xf32>, vector<7x64xf32>, vector<7x64xf32>, vector<7x64xf32> -> vector<7x576xf32>
    %c21 = arith.constant 21 : index
    %c0_51 = arith.constant 0 : index
    %238 = vector.load %arg12[%c21, %c0_51] : memref<49x576xf32, #tpu.memory_space<vmem>>, vector<7x576xf32>
    tpu.vector_store %arg12[%c21, %c0_51], %237 {strides = array<i32>} : memref<49x576xf32, #tpu.memory_space<vmem>>, vector<7x576xf32>,
    %c36_52 = arith.constant 36 : index
    %c0_53 = arith.constant 0 : index
    %239 = vector.load %arg11[%c36_52, %c0_53] : memref<81x64xf32, #tpu.memory_space<vmem>>, vector<27x64xf32>
    %240 = vector.extract_strided_slice %239 {offsets = [0, 0], sizes = [7, 64], strides = [1, 1]} : vector<27x64xf32> to vector<7x64xf32>
    %241 = vector.extract_strided_slice %239 {offsets = [1, 0], sizes = [7, 64], strides = [1, 1]} : vector<27x64xf32> to vector<7x64xf32>
    %242 = vector.extract_strided_slice %239 {offsets = [2, 0], sizes = [7, 64], strides = [1, 1]} : vector<27x64xf32> to vector<7x64xf32>
    %243 = vector.extract_strided_slice %239 {offsets = [9, 0], sizes = [7, 64], strides = [1, 1]} : vector<27x64xf32> to vector<7x64xf32>
    %244 = vector.extract_strided_slice %239 {offsets = [10, 0], sizes = [7, 64], strides = [1, 1]} : vector<27x64xf32> to vector<7x64xf32>
    %245 = vector.extract_strided_slice %239 {offsets = [11, 0], sizes = [7, 64], strides = [1, 1]} : vector<27x64xf32> to vector<7x64xf32>
    %246 = vector.extract_strided_slice %239 {offsets = [18, 0], sizes = [7, 64], strides = [1, 1]} : vector<27x64xf32> to vector<7x64xf32>
    %247 = vector.extract_strided_slice %239 {offsets = [19, 0], sizes = [7, 64], strides = [1, 1]} : vector<27x64xf32> to vector<7x64xf32>
    %248 = vector.extract_strided_slice %239 {offsets = [20, 0], sizes = [7, 64], strides = [1, 1]} : vector<27x64xf32> to vector<7x64xf32>
    %249 = tpu.concatenate %240, %241, %242, %243, %244, %245, %246, %247, %248 in 1 : vector<7x64xf32>, vector<7x64xf32>, vector<7x64xf32>, vector<7x64xf32>, vector<7x64xf32>, vector<7x64xf32>, vector<7x64xf32>, vector<7x64xf32>, vector<7x64xf32> -> vector<7x576xf32>
    %c28 = arith.constant 28 : index
    %c0_54 = arith.constant 0 : index
    %250 = vector.load %arg12[%c28, %c0_54] : memref<49x576xf32, #tpu.memory_space<vmem>>, vector<7x576xf32>
    tpu.vector_store %arg12[%c28, %c0_54], %249 {strides = array<i32>} : memref<49x576xf32, #tpu.memory_space<vmem>>, vector<7x576xf32>,
    %c45_55 = arith.constant 45 : index
    %c0_56 = arith.constant 0 : index
    %251 = vector.load %arg11[%c45_55, %c0_56] : memref<81x64xf32, #tpu.memory_space<vmem>>, vector<27x64xf32>
    %252 = vector.extract_strided_slice %251 {offsets = [0, 0], sizes = [7, 64], strides = [1, 1]} : vector<27x64xf32> to vector<7x64xf32>
    %253 = vector.extract_strided_slice %251 {offsets = [1, 0], sizes = [7, 64], strides = [1, 1]} : vector<27x64xf32> to vector<7x64xf32>
    %254 = vector.extract_strided_slice %251 {offsets = [2, 0], sizes = [7, 64], strides = [1, 1]} : vector<27x64xf32> to vector<7x64xf32>
    %255 = vector.extract_strided_slice %251 {offsets = [9, 0], sizes = [7, 64], strides = [1, 1]} : vector<27x64xf32> to vector<7x64xf32>
    %256 = vector.extract_strided_slice %251 {offsets = [10, 0], sizes = [7, 64], strides = [1, 1]} : vector<27x64xf32> to vector<7x64xf32>
    %257 = vector.extract_strided_slice %251 {offsets = [11, 0], sizes = [7, 64], strides = [1, 1]} : vector<27x64xf32> to vector<7x64xf32>
    %258 = vector.extract_strided_slice %251 {offsets = [18, 0], sizes = [7, 64], strides = [1, 1]} : vector<27x64xf32> to vector<7x64xf32>
    %259 = vector.extract_strided_slice %251 {offsets = [19, 0], sizes = [7, 64], strides = [1, 1]} : vector<27x64xf32> to vector<7x64xf32>
    %260 = vector.extract_strided_slice %251 {offsets = [20, 0], sizes = [7, 64], strides = [1, 1]} : vector<27x64xf32> to vector<7x64xf32>
    %261 = tpu.concatenate %252, %253, %254, %255, %256, %257, %258, %259, %260 in 1 : vector<7x64xf32>, vector<7x64xf32>, vector<7x64xf32>, vector<7x64xf32>, vector<7x64xf32>, vector<7x64xf32>, vector<7x64xf32>, vector<7x64xf32>, vector<7x64xf32> -> vector<7x576xf32>
    %c35 = arith.constant 35 : index
    %c0_57 = arith.constant 0 : index
    %262 = vector.load %arg12[%c35, %c0_57] : memref<49x576xf32, #tpu.memory_space<vmem>>, vector<7x576xf32>
    tpu.vector_store %arg12[%c35, %c0_57], %261 {strides = array<i32>} : memref<49x576xf32, #tpu.memory_space<vmem>>, vector<7x576xf32>,
    %c54_58 = arith.constant 54 : index
    %c0_59 = arith.constant 0 : index
    %263 = vector.load %arg11[%c54_58, %c0_59] : memref<81x64xf32, #tpu.memory_space<vmem>>, vector<27x64xf32>
    %264 = vector.extract_strided_slice %263 {offsets = [0, 0], sizes = [7, 64], strides = [1, 1]} : vector<27x64xf32> to vector<7x64xf32>
    %265 = vector.extract_strided_slice %263 {offsets = [1, 0], sizes = [7, 64], strides = [1, 1]} : vector<27x64xf32> to vector<7x64xf32>
    %266 = vector.extract_strided_slice %263 {offsets = [2, 0], sizes = [7, 64], strides = [1, 1]} : vector<27x64xf32> to vector<7x64xf32>
    %267 = vector.extract_strided_slice %263 {offsets = [9, 0], sizes = [7, 64], strides = [1, 1]} : vector<27x64xf32> to vector<7x64xf32>
    %268 = vector.extract_strided_slice %263 {offsets = [10, 0], sizes = [7, 64], strides = [1, 1]} : vector<27x64xf32> to vector<7x64xf32>
    %269 = vector.extract_strided_slice %263 {offsets = [11, 0], sizes = [7, 64], strides = [1, 1]} : vector<27x64xf32> to vector<7x64xf32>
    %270 = vector.extract_strided_slice %263 {offsets = [18, 0], sizes = [7, 64], strides = [1, 1]} : vector<27x64xf32> to vector<7x64xf32>
    %271 = vector.extract_strided_slice %263 {offsets = [19, 0], sizes = [7, 64], strides = [1, 1]} : vector<27x64xf32> to vector<7x64xf32>
    %272 = vector.extract_strided_slice %263 {offsets = [20, 0], sizes = [7, 64], strides = [1, 1]} : vector<27x64xf32> to vector<7x64xf32>
    %273 = tpu.concatenate %264, %265, %266, %267, %268, %269, %270, %271, %272 in 1 : vector<7x64xf32>, vector<7x64xf32>, vector<7x64xf32>, vector<7x64xf32>, vector<7x64xf32>, vector<7x64xf32>, vector<7x64xf32>, vector<7x64xf32>, vector<7x64xf32> -> vector<7x576xf32>
    %c42 = arith.constant 42 : index
    %c0_60 = arith.constant 0 : index
    %274 = vector.load %arg12[%c42, %c0_60] : memref<49x576xf32, #tpu.memory_space<vmem>>, vector<7x576xf32>
    tpu.vector_store %arg12[%c42, %c0_60], %273 {strides = array<i32>} : memref<49x576xf32, #tpu.memory_space<vmem>>, vector<7x576xf32>,
    %c0_61 = arith.constant 0 : index
    %c0_62 = arith.constant 0 : index
    %275 = vector.load %arg12[%c0_61, %c0_62] : memref<49x576xf32, #tpu.memory_space<vmem>>, vector<49x576xf32>
    %276 = arith.truncf %275 : vector<49x576xf32> to vector<49x576xbf16>
    %c0_63 = arith.constant 0 : index
    %c0_64 = arith.constant 0 : index
    %277 = vector.load %arg6[%c0_63, %c0_64] : memref<576x64xbf16, #tpu.memory_space<vmem>>, vector<576x64xbf16>
    %cst_65 = arith.constant dense<0.000000e+00> : vector<49x64xf32>
    %278 = tpu.matmul %276, %277, %cst_65 {dimension_numbers = #tpu.dot_dimension_numbers<[1], [0], [0], [1], [0, 0, 1, 1], [], []>} : vector<49x576xbf16>, vector<576x64xbf16>, vector<49x64xf32> -> vector<49x64xf32>
    %c0_66 = arith.constant 0 : index
    %c0_67 = arith.constant 0 : index
    %279 = vector.load %arg7[%c0_66, %c0_67] : memref<1x64xf32, #tpu.memory_space<vmem>>, vector<1x64xf32>
    %280 = vector.broadcast %279 : vector<1x64xf32> to vector<49x64xf32>
    %281 = arith.addf %278, %280 : vector<49x64xf32>
    %cst_68 = arith.constant 0.000000e+00 : f32
    %282 = vector.broadcast %cst_68 : f32 to vector<49x64xf32>
    %283 = arith.maximumf %281, %282 : vector<49x64xf32>
    %c0_69 = arith.constant 0 : index
    %c0_70 = arith.constant 0 : index
    %c0_71 = arith.constant 0 : index
    %284 = vector.load %arg8[%c0_69, %c0_70, %c0_71] : memref<1x49x64xf32, #tpu.memory_space<vmem>>, vector<1x49x64xf32>
    %285 = vector.shape_cast %284 : vector<1x49x64xf32> to vector<49x64xf32>
    %286 = vector.shape_cast %283 : vector<49x64xf32> to vector<1x49x64xf32>
    tpu.vector_store %arg8[%c0_69, %c0_70, %c0_71], %286 {strides = array<i32>} : memref<1x49x64xf32, #tpu.memory_space<vmem>>, vector<1x49x64xf32>,
    return
  }
  func.func @transform_0(%arg0: i32) -> (i32, i32, i32) {
    %c0_i32 = arith.constant 0 : i32
    %c0_i32_0 = arith.constant 0 : i32
    %c0_i32_1 = arith.constant 0 : i32
    return %arg0, %c0_i32, %c0_i32_0 : i32, i32, i32
  }
  func.func @transform_1(%arg0: i32) -> (i32, i32) {
    %c0_i32 = arith.constant 0 : i32
    %c0_i32_0 = arith.constant 0 : i32
    %c0_i32_1 = arith.constant 0 : i32
    return %c0_i32, %c0_i32_0 : i32, i32
  }
  func.func @transform_2(%arg0: i32) -> (i32, i32) {
    %c0_i32 = arith.constant 0 : i32
    %c0_i32_0 = arith.constant 0 : i32
    %c0_i32_1 = arith.constant 0 : i32
    return %c0_i32, %c0_i32_0 : i32, i32
  }
  func.func @transform_3(%arg0: i32) -> (i32, i32) {
    %c0_i32 = arith.constant 0 : i32
    %c0_i32_0 = arith.constant 0 : i32
    %c0_i32_1 = arith.constant 0 : i32
    return %c0_i32, %c0_i32_0 : i32, i32
  }
  func.func @transform_4(%arg0: i32) -> (i32, i32) {
    %c0_i32 = arith.constant 0 : i32
    %c0_i32_0 = arith.constant 0 : i32
    %c0_i32_1 = arith.constant 0 : i32
    return %c0_i32, %c0_i32_0 : i32, i32
  }
  func.func @transform_5(%arg0: i32) -> (i32, i32) {
    %c0_i32 = arith.constant 0 : i32
    %c0_i32_0 = arith.constant 0 : i32
    %c0_i32_1 = arith.constant 0 : i32
    return %c0_i32, %c0_i32_0 : i32, i32
  }
  func.func @transform_6(%arg0: i32) -> (i32, i32) {
    %c0_i32 = arith.constant 0 : i32
    %c0_i32_0 = arith.constant 0 : i32
    %c0_i32_1 = arith.constant 0 : i32
    return %c0_i32, %c0_i32_0 : i32, i32
  }
  func.func @transform_7(%arg0: i32) -> (i32, i32, i32) {
    %c0_i32 = arith.constant 0 : i32
    %c0_i32_0 = arith.constant 0 : i32
    %c0_i32_1 = arith.constant 0 : i32
    return %arg0, %c0_i32, %c0_i32_0 : i32, i32, i32
  }
}

</mosaic_0001>

<bundles_post_ra>
// kernel: rainbow_body_forward.1
= control target key start
LH: loop header
LB: loop body
LE: loop exit
PB: predicated region body
PF: predicated region fallthrough
CT: control target
= control target key end

     0   :  { %s4972_s24 = smov 0   ;;  %s6921_s0 = inlined_call_operand.vmem [shape: bf16[2,400,256], index: 0, kind: input, shape index: {}]   ;;  %s6922_s1 = inlined_call_operand.vmem [shape: bf16[256,32], index: 1, kind: input, shape index: {}]   ;;  %s6923_s2 = inlined_call_operand.vmem [shape: f32[1,32], index: 2, kind: input, shape index: {}]   ;;  %s6924_s3 = inlined_call_operand.vmem [shape: bf16[512,64], index: 3, kind: input, shape index: {}]   ;;  %s6925_s4 = inlined_call_operand.vmem [shape: f32[1,64], index: 4, kind: input, shape index: {}]   ;;  %s6926_s5 = inlined_call_operand.vmem [shape: bf16[576,64], index: 5, kind: input, shape index: {}]   ;;  %s6927_s6 = inlined_call_operand.vmem [shape: f32[1,64], index: 6, kind: input, shape index: {}]   ;;  %s6928_s7 = inlined_call_operand.vmem [shape: f32[2,49,64], index: 7, kind: output, shape index: {}]  }
   0x1 LB: > { %s4391_s25 = sadd.s32 4294967295, %s4926_s24   ;;  %p4395_p0 = scmp.ge.s32.totalorder %s4926_s24, 1  ;;  %s4926_s24 = sphi %s4972_s24, %s17_s24  }
   0x2   : > { %p237_p1 = scmp.lt.s32.totalorder %s4926_s24, 3 }
   0x4   : > { %p238_p2 = pnand %p4395_p0, %p237_p1 }
   0x5   : > { %p269_p3 = scmp.lt.s32.totalorder (!%p238_p2), %s4391_s25, 1  ;;  %s4929_s21 = smov (!%p238_p2), 64  }
   0x6   : > { %241 = sbr.rel (%p238_p2) target bundleno = 1432 (0x598), region = 48  ;;  %s4930_s22 = smov (!%p238_p2), 96  }
   0x7   : > { %s4931_s23 = smov (!%p238_p2), 32  }
   0xb   : > { %v4763_v0 = vld [vmem:[%s6922_s1 + $0x38] sm:$0xff]   ;;  %v4928_v1 = vmov 0   ;;  %v4764_v2 = vld [vmem:[%s6922_s1 + $0x30] sm:$0xff]   ;;  %v4765_v3 = vld [vmem:[%s6922_s1 + $0x28] sm:$0xff]   ;;  %s6930_s25 = smov (!%p269_p3, %s4391_s25), 1  ;;  %vm998_vm0 = vcmask 261120  }
   0xc   : > { %715 = vmatprep.subr.bf16.mxu0 %v4928_v1  ;;  %v4766_v4 = vld [vmem:[%s6922_s1 + $0x20] sm:$0xff]   ;;  %s4749_s11 = smul.u32 400, %s6930_s25  ;;  %v4767_v5 = vld [vmem:[%s6922_s1 + $0x18] sm:$0xff]   ;;  %v4768_v7 = vld [vmem:[%s6922_s1 + $0x10] sm:$0xff]   ;;  %vm1072_vm1 = vcmask 1046528   ;;  %vm1061_vm2 = vcmask 1045504  }
   0xd   : > { %716 = vmatpush1.bf16.msra.mxu0 %v4763_v0  ;;  %v4769_v8 = vld [vmem:[%s6922_s1 + $0x8] sm:$0xff]   ;;  %v4770_v9 = vld [vmem:[%s6922_s1] sm:$0xff]   ;;  %v4771_v10 = vld [vmem:[%s6922_s1 + $0x78] sm:$0xff]   ;;  %vm1082_vm3 = vcmask 1044480   ;;  %vm1093_vm4 = vcmask 1043456   ;;  %vm1110_vm5 = vcmask 1042432  }
   0xe   : > { %717 = vmatprep.subr.bf16.mxu0 %v4928_v1  ;;  %s5001_s16 = scalar_lea.vmem %s6921_s0, %s4749_s11  ;;  %v4772_v11 = vld [vmem:[%s6922_s1 + $0x70] sm:$0xff]   ;;  %v4773_v12 = vld [vmem:[%s6922_s1 + $0x68] sm:$0xff]   ;;  %v4774_v13 = vld [vmem:[%s6922_s1 + $0x60] sm:$0xff]   ;;  %vm1100_vm6 = vcmask 1041408   ;;  %vm1120_vm7 = vcmask 1040384   ;;  %vm1196_vm8 = vcmask 523264  }
   0xf   : > { %v4781_v6 = vld [vmem:[%s5001_s16 + $0x4] ss:$8 sps:$4 sm:$0xff]   ;;  %v4775_v14 = vld [vmem:[%s6922_s1 + $0x58] sm:$0xff]   ;;  %v4776_v15 = vld [vmem:[%s6922_s1 + $0x50] sm:$0xff]   ;;  %vm1199_vm9 = vcmask 785408   ;;  %vm3347_vm10 = vcmask 522240  }
  0x10   : > { %747 = vmatprep.mubr.bf16.mxu0 %v4781_v6  ;;  %v4777_v16 = vld [vmem:[%s6922_s1 + $0x48] sm:$0xff]   ;;  %v4778_v17 = vld [vmem:[%s6922_s1 + $0x40] sm:$0xff]   ;;  %v4782_v19 = vld [vmem:[%s5001_s16 + $0x14] ss:$8 sps:$4 sm:$0xff]   ;;  %vm3411_vm11 = vcmask 523271   ;;  %vm3417_vm12 = vcmask 521216  }
  0x11   : > { %718 = vmatpush1.bf16.msra.mxu0 %v4764_v2  ;;  %v4779_v18 = vld [vmem:[%s5001_s16] ss:$8 sps:$4 sm:$0xff]   ;;  %v4784_v20 = vld [vmem:[%s5001_s16 + $0x10] ss:$8 sps:$4 sm:$0xff]   ;;  %v4785_v21 = vld [vmem:[%s5001_s16 + $0x24] ss:$8 sps:$4 sm:$0xff]  }
  0x12   : > { %719 = vmatprep.subr.bf16.mxu0 %v4928_v1  ;;  %v4787_v22 = vld [vmem:[%s5001_s16 + $0x20] ss:$8 sps:$4 sm:$0xff]   ;;  %v4788_v23 = vld [vmem:[%s5001_s16 + $0x34] ss:$8 sps:$4 sm:$0xff]   ;;  %v4790_v24 = vld [vmem:[%s5001_s16 + $0x30] ss:$8 sps:$4 sm:$0xff]  }
  0x13   : > { %v4791_v25 = vld [vmem:[%s5001_s16 + $0x44] ss:$8 sps:$4 sm:$0xff]   ;;  %v4793_v26 = vld [vmem:[%s5001_s16 + $0x40] ss:$8 sps:$4 sm:$0xff]   ;;  %v4794_v27 = vld [vmem:[%s5001_s16 + $0x54] ss:$8 sps:$4 sm:$0xff]  }
  0x14   : > { %v4796_v28 = vld [vmem:[%s5001_s16 + $0x50] ss:$8 sps:$4 sm:$0xff]   ;;  %v4797_v29 = vld [vmem:[%s5001_s16 + $0x64] ss:$8 sps:$4 sm:$0xff]   ;;  %v4799_v30 = vld [vmem:[%s5001_s16 + $0x60] ss:$8 sps:$4 sm:$0xff]  }
  0x15   : > { %720 = vmatpush1.bf16.msra.mxu0 %v4765_v3  ;;  %v4800_v31 = vld [vmem:[%s5001_s16 + $0x74] ss:$8 sps:$4 sm:$0xff]   ;;  %v4802_v32 = vld [vmem:[%s5001_s16 + $0x70] ss:$8 sps:$4 sm:$0xff]   ;;  %v4803_v33 = vld [vmem:[%s5001_s16 + $0x84] ss:$8 sps:$4 sm:$0xff]  }
  0x16   : > { %721 = vmatprep.subr.bf16.mxu0 %v4928_v1  ;;  %v4805_v34 = vld [vmem:[%s5001_s16 + $0x80] ss:$8 sps:$4 sm:$0xff]   ;;  %v4806_v35 = vld [vmem:[%s5001_s16 + $0x94] ss:$8 sps:$4 sm:$0xff]   ;;  %v4808_v36 = vld [vmem:[%s5001_s16 + $0x90] ss:$8 sps:$4 sm:$0xff]  }
  0x17   : > { %v4809_v37 = vld [vmem:[%s5001_s16 + $0xa4] ss:$8 sps:$4 sm:$0xff]   ;;  %v4811_v38 = vld [vmem:[%s5001_s16 + $0xa0] ss:$8 sps:$4 sm:$0xff]   ;;  %v4812_v39 = vld [vmem:[%s5001_s16 + $0xb4] ss:$8 sps:$4 sm:$0xff]  }
  0x18   : > { %v4814_v40 = vld [vmem:[%s5001_s16 + $0xb0] ss:$8 sps:$4 sm:$0xff]   ;;  %v4815_v41 = vld [vmem:[%s5001_s16 + $0xc4] ss:$8 sps:$4 sm:$0xff]   ;;  %v4817_v42 = vld [vmem:[%s5001_s16 + $0xc0] ss:$8 sps:$4 sm:$0xff]  }
  0x19   : > { %722 = vmatpush1.bf16.msra.mxu0 %v4766_v4  ;;  %v4818_v43 = vld [vmem:[%s5001_s16 + $0xd4] ss:$8 sps:$4 sm:$0xff]   ;;  %v4820_v44 = vld [vmem:[%s5001_s16 + $0xd0] ss:$8 sps:$4 sm:$0xff]   ;;  %v4821_v45 = vld [vmem:[%s5001_s16 + $0xe4] ss:$8 sps:$4 sm:$0xff]  }
  0x1a   : > { %723 = vmatprep.subr.bf16.mxu0 %v4928_v1  ;;  %v4823_v46 = vld [vmem:[%s5001_s16 + $0xe0] ss:$8 sps:$4 sm:$0xff]   ;;  %v4824_v47 = vld [vmem:[%s5001_s16 + $0xf4] ss:$8 sps:$4 sm:$0xff]   ;;  %v4826_v48 = vld [vmem:[%s5001_s16 + $0xf0] ss:$8 sps:$4 sm:$0xff]  }
  0x1b   : > { %v312_v49 = vld [vmem:[%s5001_s16 + $0x100] sm:$0xff]  ;;  %v313_v50 = vld [vmem:[%s5001_s16 + $0x108] sm:$0xff]  ;;  %v314_v53 = vld [vmem:[%s5001_s16 + $0x110] sm:$0xff]  ;;  %vm3481_vm13 = vcmask 523270   ;;  %vm3487_vm14 = vcmask 520192   ;;  %vm3551_vm15 = vcmask 523269  }
  0x1c   : > { %v4827_v51 = vld [vmem:[%s5001_s16 + $0x104] ss:$8 sps:$4 sm:$0xff]   ;;  %v4431_v52 = vcombine.low %v312_v49, %v313_v50  ;;  %v315_v54 = vld [vmem:[%s5001_s16 + $0x118] sm:$0xff]  ;;  %v318_v61 = vld [vmem:[%s5001_s16 + $0x130] sm:$0xff]  ;;  %s4750_s10 = smul.u32 56, %s6930_s25 }
  0x1d   : > { %724 = vmatpush1.bf16.msra.mxu0 %v4767_v5  ;;  %v4829_v55 = vld [vmem:[%s5001_s16 + $0x114] ss:$8 sps:$4 sm:$0xff]   ;;  %v4433_v56 = vcombine.low %v314_v53, %v315_v54  ;;  %v316_v57 = vld [vmem:[%s5001_s16 + $0x120] sm:$0xff]  ;;  %v317_v58 = vld [vmem:[%s5001_s16 + $0x128] sm:$0xff] }
  0x1e   : > { %725 = vmatprep.subr.bf16.mxu0 %v4928_v1  ;;  %v4831_v59 = vld [vmem:[%s5001_s16 + $0x124] ss:$8 sps:$4 sm:$0xff]   ;;  %v4435_v60 = vcombine.low %v316_v57, %v317_v58  ;;  %v319_v62 = vld [vmem:[%s5001_s16 + $0x138] sm:$0xff]  ;;  %v4843_v54 = vld [vmem:[%s5001_s16 + $0x160] ss:$8 sps:$4 sm:$0xff]   ;;  %s6902_s12 = scalar_lea.vmem %s6928_s7, %s4750_s10 }
  0x1f   : > { %v4833_v63 = vld [vmem:[%s5001_s16 + $0x134] ss:$8 sps:$4 sm:$0xff]   ;;  %v4437_v0 = vcombine.low %v318_v61, %v319_v62  ;;  %v4841_v50 = vld [vmem:[%s5001_s16 + $0x164] ss:$8 sps:$4 sm:$0xff]  }
  0x21   : > { %726 = vmatpush1.bf16.msra.mxu0 %v4768_v7 }
  0x22   : > { %727 = vmatprep.subr.bf16.mxu0 %v4928_v1 }
  0x25   : > { %728 = vmatpush1.bf16.msra.mxu0 %v4769_v8 }
  0x26   : > { %729 = vmatprep.subr.bf16.mxu0 %v4928_v1 }
  0x29   : > { %730 = vmatpush1.bf16.msra.mxu0 %v4770_v9 }
  0x2a   : > { %731 = vmatprep.subr.bf16.mxu0 %v4928_v1 }
  0x2d   : > { %732 = vmatpush2.bf16.msra.mxu0 %v4771_v10 }
  0x2e   : > { %733 = vmatprep.subr.bf16.mxu0 %v4928_v1 }
  0x31   : > { %734 = vmatpush2.bf16.msra.mxu0 %v4772_v11 }
  0x32   : > { %735 = vmatprep.subr.bf16.mxu0 %v4928_v1 }
  0x35   : > { %736 = vmatpush2.bf16.msra.mxu0 %v4773_v12 }
  0x36   : > { %737 = vmatprep.subr.bf16.mxu0 %v4928_v1 }
  0x39   : > { %738 = vmatpush2.bf16.msra.mxu0 %v4774_v13  ;;  %v4835_v13 = vld [vmem:[%s5001_s16 + $0x144] ss:$8 sps:$4 sm:$0xff]  }
  0x3a   : > { %739 = vmatprep.subr.bf16.mxu0 %v4928_v1 }
  0x3d   : > { %740 = vmatpush2.bf16.msra.mxu0 %v4775_v14 }
  0x3e   : > { %741 = vmatprep.subr.bf16.mxu0 %v4928_v1 }
  0x41   : > { %742 = vmatpush2.bf16.msra.mxu0 %v4776_v15  ;;  %v4837_v15 = vld [vmem:[%s5001_s16 + $0x140] ss:$8 sps:$4 sm:$0xff]  }
  0x42   : > { %743 = vmatprep.subr.bf16.mxu0 %v4928_v1 }
  0x45   : > { %744 = vmatpush2.bf16.msra.mxu0 %v4777_v16 }
  0x46   : > { %745 = vmatprep.subr.bf16.mxu0 %v4928_v1  ;;  %v5083_v1 = vld [vmem:[%s6923_s2] ss:$0 sm:$0xff] }
  0x49   : > { %746 = vmatpush2.bf16.msra.mxu0 %v4778_v17 }
  0x4c   : > { %748 = vmatmul.mubr.bf16.vlgmr.msra.gmra.mxu0 %v4779_v18 }
  0x4d   : > { %755 = vmatprep.mubr.bf16.mxu0 %v4782_v19 }
  0x54   : > { %756 = vmatmul.mubr.bf16.gmra.mxu0 %v4784_v20 }
  0x55   : > { %763 = vmatprep.mubr.bf16.mxu0 %v4785_v21 }
  0x5c   : > { %764 = vmatmul.mubr.bf16.gmra.mxu0 %v4787_v22 }
  0x5d   : > { %771 = vmatprep.mubr.bf16.mxu0 %v4788_v23 }
  0x64   : > { %772 = vmatmul.mubr.bf16.gmra.mxu0 %v4790_v24 }
  0x65   : > { %779 = vmatprep.mubr.bf16.mxu0 %v4791_v25 }
  0x6c   : > { %780 = vmatmul.mubr.bf16.gmra.mxu0 %v4793_v26 }
  0x6d   : > { %787 = vmatprep.mubr.bf16.mxu0 %v4794_v27  ;;  %v4838_v27 = vld [vmem:[%s5001_s16 + $0x154] ss:$8 sps:$4 sm:$0xff]  }
  0x74   : > { %788 = vmatmul.mubr.bf16.gmra.mxu0 %v4796_v28 }
  0x75   : > { %795 = vmatprep.mubr.bf16.mxu0 %v4797_v29 }
  0x7c   : > { %796 = vmatmul.mubr.bf16.gmra.mxu0 %v4799_v30  ;;  %v4840_v30 = vld [vmem:[%s5001_s16 + $0x150] ss:$8 sps:$4 sm:$0xff]  }
  0x7d   : > { %803 = vmatprep.mubr.bf16.mxu0 %v4800_v31 }
  0x84   : > { %804 = vmatmul.mubr.bf16.gmra.mxu0 %v4802_v32 }
  0x85   : > { %811 = vmatprep.mubr.bf16.mxu0 %v4803_v33 }
  0x8c   : > { %812 = vmatmul.mubr.bf16.gmra.mxu0 %v4805_v34 }
  0x8d   : > { %819 = vmatprep.mubr.bf16.mxu0 %v4806_v35 }
  0x94   : > { %820 = vmatmul.mubr.bf16.gmra.mxu0 %v4808_v36 }
  0x95   : > { %827 = vmatprep.mubr.bf16.mxu0 %v4809_v37 }
  0x9c   : > { %828 = vmatmul.mubr.bf16.gmra.mxu0 %v4811_v38 }
  0x9d   : > { %835 = vmatprep.mubr.bf16.mxu0 %v4812_v39 }
  0xa4   : > { %836 = vmatmul.mubr.bf16.gmra.mxu0 %v4814_v40 }
  0xa5   : > { %843 = vmatprep.mubr.bf16.mxu0 %v4815_v41 }
  0xac   : > { %844 = vmatmul.mubr.bf16.gmra.mxu0 %v4817_v42 }
  0xad   : > { %851 = vmatprep.mubr.bf16.mxu0 %v4818_v43 }
  0xb4   : > { %852 = vmatmul.mubr.bf16.gmra.mxu0 %v4820_v44 }
  0xb5   : > { %859 = vmatprep.mubr.bf16.mxu0 %v4821_v45 }
  0xbc   : > { %860 = vmatmul.mubr.bf16.gmra.mxu0 %v4823_v46 }
  0xbd   : > { %867 = vmatprep.mubr.bf16.mxu0 %v4824_v47 }
  0xc4   : > { %868 = vmatmul.mubr.bf16.gmra.mxu0 %v4826_v48 }
  0xc5   : > { %875 = vmatprep.mubr.bf16.mxu0 %v4827_v51 }
  0xcc   : > { %876 = vmatmul.mubr.bf16.gmra.mxu0 %v4431_v52 }
  0xcd   : > { %883 = vmatprep.mubr.bf16.mxu0 %v4829_v55 }
  0xd4   : > { %884 = vmatmul.mubr.bf16.gmra.mxu0 %v4433_v56 }
  0xd5   : > { %891 = vmatprep.mubr.bf16.mxu0 %v4831_v59 }
  0xdc   : > { %892 = vmatmul.mubr.bf16.gmra.mxu0 %v4435_v60 }
  0xdd   : > { %899 = vmatprep.mubr.bf16.mxu0 %v4833_v63 }
  0xe4   : > { %900 = vmatmul.mubr.bf16.gmra.mxu0 %v4437_v0 }
  0xe5   : > { %907 = vmatprep.mubr.bf16.mxu0 %v4835_v13 }
  0xec   : > { %908 = vmatmul.mubr.bf16.gmra.mxu0 %v4837_v15 }
  0xed   : > { %915 = vmatprep.mubr.bf16.mxu0 %v4838_v27 }
  0xf4   : > { %916 = vmatmul.mubr.bf16.gmra.mxu0 %v4840_v30 }
  0xf5   : > { %923 = vmatprep.mubr.bf16.mxu0 %v4841_v50  ;;  %v4848_v50 = vld [vmem:[%s6924_s3 + $0x38] sm:$0xff]  }
  0xfc   : > { %924 = vmatmul.mubr.bf16.gmra.mxu0 %v4843_v54 }
 0x10c   : > { %v749_v2 = vpop.f32.mrf.mxu0 }
 0x10d   : > { %v750_v3 = vadd.f32 %v5083_v1, %v749_v2 }
 0x10e   : > { %v751_v4 = vpop.f32.mrf.mxu0 }
 0x10f   : > { %v948_v5 = vmax.f32 %v750_v3, 0.0 }
 0x110   : > { %v752_v6 = vpop.f32.mrf.mxu0 }
 0x111   : > { %999 = vst.msk [vmem:[#allocation2] sm:$0xff] %vm998_vm0, %v948_v5  ;;  %v753_v7 = vadd.f32 %v5083_v1, %v752_v6 }
 0x112   : > { %v754_v8 = vpop.f32.mrf.mxu0 }
 0x113   : > { %v949_v9 = vmax.f32 %v753_v7, 0.0 }
 0x114   : > { %v757_v10 = vpop.f32.mrf.mxu0 }
 0x115   : > { %1000 = vst.msk [vmem:[#allocation2 + $0x8] sm:$0xff] %vm998_vm0, %v949_v9  ;;  %v758_v11 = vadd.f32 %v5083_v1, %v757_v10 }
 0x116   : > { %v759_v12 = vpop.f32.mrf.mxu0 }
 0x117   : > { %v950_v14 = vmax.f32 %v758_v11, 0.0  ;;  %v4844_v12 = vld [vmem:[%s5001_s16 + $0x174] ss:$8 sps:$4 sm:$0xff]  }
 0x118   : > { %v760_v16 = vpop.f32.mrf.mxu0  ;;  %v5094_v19 = vld [vmem:[#allocation2] sm:$0xff]  ;;  %931 = vmatprep.mubr.bf16.mxu0 %v4844_v12 }
 0x119   : > { %1001 = vst.msk [vmem:[#allocation2 + $0x10] sm:$0xff] %vm998_vm0, %v950_v14  ;;  %v761_v17 = vadd.f32 %v5083_v1, %v760_v16  ;;  %v1073_v25 = vrot.slane %v5094_v19, 1  ;;  %v4846_v14 = vld [vmem:[%s5001_s16 + $0x170] ss:$8 sps:$4 sm:$0xff]  }
 0x11a   : > { %v762_v18 = vpop.f32.mrf.mxu0  ;;  %932 = vmatmul.mubr.bf16.gmra.mxu0 %v4846_v14  ;;  %v4853_v14 = vld [vmem:[%s6924_s3 + $0x60] sm:$0xff]  }
 0x11b   : > { %v951_v20 = vmax.f32 %v761_v17, 0.0 }
 0x11c   : > { %v765_v21 = vpop.f32.mrf.mxu0  ;;  %v5096_v22 = vld [vmem:[#allocation2 + $0x8] sm:$0xff] }
 0x11d   : > { %1002 = vst.msk [vmem:[#allocation2 + $0x18] sm:$0xff] %vm998_vm0, %v951_v20  ;;  %v766_v23 = vadd.f32 %v5083_v1, %v765_v21  ;;  %v1074_v24 = vrot.slane %v5096_v22, 1  ;;  %v1062_v39 = vrot.slane %v5096_v22, 2  ;;  %v1083_v42 = vrot.slane %v5096_v22, 3 }
 0x11e   : > { %v767_v26 = vpop.f32.mrf.mxu0 }
 0x11f   : > { %v952_v28 = vmax.f32 %v766_v23, 0.0  ;;  %1078 = vrot.lane.b32.xlu1 %v1074_v24, %s4929_s21  ;;  %v1075_v29 = vsel %vm1072_vm1, %v1073_v25, %v1074_v24 }
 0x120   : > { %v768_v31 = vpop.f32.mrf.mxu0  ;;  %1076 = vrot.lane.b32.xlu0 %v1075_v29, %s4929_s21  ;;  %v1051_v32 = vld [vmem:[#allocation2 + $0x10] sm:$0xff] }
 0x121   : > { %1003 = vst.msk [vmem:[#allocation2 + $0x20] sm:$0xff] %vm998_vm0, %v952_v28  ;;  %v769_v33 = vadd.f32 %v5083_v1, %v768_v31  ;;  %v1084_v34 = vrot.slane %v1051_v32, 3  ;;  %v1063_v35 = vrot.slane %v1051_v32, 2  ;;  %v1094_v47 = vrot.slane %v1051_v32, 4 }
 0x122   : > { %v770_v36 = vpop.f32.mrf.mxu0  ;;  %v1111_v52 = vrot.slane %v1051_v32, 5 }
 0x123   : > { %v953_v37 = vmax.f32 %v769_v33, 0.0  ;;  %1088 = vrot.lane.b32.xlu1 %v1084_v34, %s4930_s22  ;;  %v1064_v44 = vsel %vm1061_vm2, %v1062_v39, %v1063_v35  ;;  %v1085_v49 = vsel %vm1082_vm3, %v1083_v42, %v1084_v34 }
 0x124   : > { %v773_v38 = vpop.f32.mrf.mxu0  ;;  %1067 = vrot.lane.b32.xlu0 %v1063_v35, %s4931_s23  ;;  %v5112_v40 = vld [vmem:[#allocation2 + $0x18] sm:$0xff] }
 0x125   : > { %1004 = vst.msk [vmem:[#allocation2 + $0x28] sm:$0xff] %vm998_vm0, %v953_v37  ;;  %v774_v41 = vadd.f32 %v5083_v1, %v773_v38  ;;  %v1112_v45 = vrot.slane %v5112_v40, 5  ;;  %v1095_v46 = vrot.slane %v5112_v40, 4  ;;  %v1101_v3 = vrot.slane %v5112_v40, 6 }
 0x126   : > { %v775_v43 = vpop.f32.mrf.mxu0  ;;  %v1121_v5 = vrot.slane %v5112_v40, 7 }
 0x127   : > { %v954_v48 = vmax.f32 %v774_v41, 0.0  ;;  %1065 = vrot.lane.b32.xlu1 %v1064_v44, %s4931_s23  ;;  %v5127_v53 = vsel %vm1093_vm4, %v1094_v47, %v1095_v46  ;;  %v1113_v57 = vsel %vm1110_vm5, %v1111_v52, %v1112_v45 }
 0x128   : > { %v776_v51 = vpop.f32.mrf.mxu0  ;;  %1086 = vrot.lane.b32.xlu0 %v1085_v49, %s4930_s22  ;;  %v1053_v58 = vld [vmem:[#allocation2 + $0x20] sm:$0xff] }
 0x129   : > { %1005 = vst.msk [vmem:[#allocation2 + $0x30] sm:$0xff] %vm998_vm0, %v954_v48  ;;  %v777_v55 = vadd.f32 %v5083_v1, %v776_v51  ;;  %v1122_v62 = vrot.slane %v1053_v58, 7  ;;  %v1102_v63 = vrot.slane %v1053_v58, 6  ;;  %v4847_v48 = vld [vmem:[%s6924_s3 + $0x78] sm:$0xff]  }
 0x12a   : > { %v778_v56 = vpop.f32.mrf.mxu0  ;;  %4541 = vmatprep.subr.bf16.mxu1 %v4847_v48 }
 0x12b   : > { %v955_v59 = vmax.f32 %v777_v55, 0.0  ;;  %1114 = vrot.lane.b32.xlu1 %v1113_v57, %s4929_s21  ;;  %v1103_v7 = vsel %vm1100_vm6, %v1101_v3, %v1102_v63  ;;  %v1123_v10 = vsel %vm1120_vm7, %v1121_v5, %v1122_v62  ;;  %4542 = vmatpush3.bf16.msra.mxu1 %v4848_v50  ;;  %v4849_v57 = vld [vmem:[%s6924_s3 + $0x70] sm:$0xff]  }
 0x12c   : > { %v781_v60 = vpop.f32.mrf.mxu0  ;;  %1116 = vrot.lane.b32.xlu0 %v1112_v45, %s4929_s21  ;;  %v5152_v16 = vld [vmem:[#allocation2 + $0x28] sm:$0xff]  ;;  %4543 = vmatprep.subr.bf16.mxu1 %v4849_v57 }
 0x12d   : > { %1006 = vst.msk [vmem:[#allocation2 + $0x38] sm:$0xff] %vm998_vm0, %v955_v59  ;;  %v782_v61 = vadd.f32 %v5083_v1, %v781_v60  ;;  %v1250_v23 = vrot.slane %v5152_v16, 1  ;;  %v4850_v59 = vld [vmem:[%s6924_s3 + $0x30] sm:$0xff]   ;;  %v4861_v57 = vld [vmem:[%s5001_s16 + $0x184] ss:$8 sps:$4 sm:$0xff]  }
 0x12e   : > { %v783_v0 = vpop.f32.mrf.mxu0  ;;  %939 = vmatprep.mubr.bf16.mxu0 %v4861_v57 }
 0x12f   : > { %v956_v2 = vmax.f32 %v782_v61, 0.0  ;;  %1126 = vrot.lane.b32.xlu1 %v1122_v62, %s4930_s22  ;;  %4544 = vmatpush3.bf16.msra.mxu1 %v4850_v59 }
 0x130   : > { %1106 = vrot.lane.b32.xlu0 %v1102_v63, %s4931_s23  ;;  %v784_v4 = vpop.f32.mrf.mxu0  ;;  %v5144_v8 = vld [vmem:[#allocation2 + $0x30] sm:$0xff] }
 0x131   : > { %1007 = vst.msk [vmem:[#allocation2 + $0x40] sm:$0xff] %vm998_vm0, %v956_v2  ;;  %v785_v6 = vadd.f32 %v5083_v1, %v784_v4  ;;  %v1143_v15 = vrot.slane %v5144_v8, 1  ;;  %v1259_v42 = vrot.slane %v5144_v8, 3  ;;  %v1240_v44 = vrot.slane %v5144_v8, 2  ;;  %v4851_v4 = vld [vmem:[%s6924_s3 + $0x68] sm:$0xff]  }
 0x132   : > { %v786_v9 = vpop.f32.mrf.mxu0  ;;  %4545 = vmatprep.subr.bf16.mxu1 %v4851_v4 }
 0x133   : > { %1104 = vrot.lane.b32.xlu1 %v1103_v7, %s4931_s23  ;;  %v957_v11 = vmax.f32 %v785_v6, 0.0  ;;  %v1252_v27 = vsel %vm1072_vm1, %v1250_v23, %v1143_v15  ;;  %v4852_v7 = vld [vmem:[%s6924_s3 + $0x28] sm:$0xff]  }
 0x134   : > { %1124 = vrot.lane.b32.xlu0 %v1123_v10, %s4930_s22  ;;  %v789_v13 = vpop.f32.mrf.mxu0  ;;  %v5157_v20 = vld [vmem:[#allocation2 + $0x38] sm:$0xff]  ;;  %4546 = vmatpush3.bf16.msra.mxu1 %v4852_v7 }
 0x135   : > { %1008 = vst.msk [vmem:[#allocation2 + $0x48] sm:$0xff] %vm998_vm0, %v957_v11  ;;  %v790_v17 = vadd.f32 %v5083_v1, %v789_v13  ;;  %v1161_v30 = vrot.slane %v5157_v20, 4  ;;  %v1241_v34 = vrot.slane %v5157_v20, 2  ;;  %v1260_v36 = vrot.slane %v5157_v20, 3  ;;  %4547 = vmatprep.subr.bf16.mxu1 %v4853_v14 }
 0x136   : > { %v791_v18 = vpop.f32.mrf.mxu0  ;;  %v1284_v0 = vrot.slane %v5157_v20, 5 }
 0x137   : > { %1147 = vrot.lane.b32.xlu1 %v1143_v15, %s4929_s21  ;;  %v958_v21 = vmax.f32 %v790_v17, 0.0  ;;  %v1261_v51 = vsel %vm1082_vm3, %v1259_v42, %v1260_v36  ;;  %v1242_v54 = vsel %vm1061_vm2, %v1240_v44, %v1241_v34  ;;  %v4854_v18 = vld [vmem:[%s6924_s3 + $0x20] sm:$0xff]  }
 0x138   : > { %1255 = vrot.lane.b32.xlu0 %v1143_v15, %s4929_s21  ;;  %v792_v24 = vpop.f32.mrf.mxu0  ;;  %v5161_v25 = vld [vmem:[#allocation2 + $0x40] sm:$0xff]  ;;  %4548 = vmatpush3.bf16.msra.mxu1 %v4854_v18 }
 0x139   : > { %1009 = vst.msk [vmem:[#allocation2 + $0x50] sm:$0xff] %vm998_vm0, %v958_v21  ;;  %v793_v26 = vadd.f32 %v5083_v1, %v792_v24  ;;  %v5167_v29 = vrot.slane %v5161_v25, 4  ;;  %v1285_v60 = vrot.slane %v5161_v25, 5 }
 0x13a   : > { %v794_v28 = vpop.f32.mrf.mxu0 }
 0x13b   : > { %1253 = vrot.lane.b32.xlu1 %v1252_v27, %s4929_s21  ;;  %v959_v31 = vmax.f32 %v793_v26, 0.0  ;;  %v5174_v33 = vsel %vm1093_vm4, %v1161_v30, %v5167_v29  ;;  %v1286_v9 = vsel %vm1110_vm5, %v1284_v0, %v1285_v60  ;;  %v4855_v26 = vld [vmem:[%s6924_s3 + $0x58] sm:$0xff]   ;;  %v4865_v0 = vld [vmem:[%s6924_s3] sm:$0xff]  }
 0x13c   : > { %1145 = vrot.lane.b32.xlu0 %v1252_v27, %s4929_s21  ;;  %v797_v32 = vpop.f32.mrf.mxu0  ;;  %v1232_v20 = vld [vmem:[#allocation2 + $0x48] sm:$0xff]  ;;  %v4856_v30 = vld [vmem:[%s6924_s3 + $0x18] sm:$0xff]   ;;  %4549 = vmatprep.subr.bf16.mxu1 %v4855_v26 }
 0x13d   : > { %1010 = vst.msk [vmem:[#allocation2 + $0x58] sm:$0xff] %vm998_vm0, %v959_v31  ;;  %v798_v35 = vadd.f32 %v5083_v1, %v797_v32  ;;  %v1294_v27 = vrot.slane %v1232_v20, 7  ;;  %v1276_v31 = vrot.slane %v1232_v20, 6  ;;  %4550 = vmatpush3.bf16.msra.mxu1 %v4856_v30 }
 0x13e   : > { %v799_v37 = vpop.f32.mrf.mxu0 }
 0x13f   : > { %1245 = vrot.lane.b32.xlu1 %v1241_v34, %s4931_s23  ;;  %v960_v38 = vmax.f32 %v798_v35, 0.0 }
 0x140   : > { %1264 = vrot.lane.b32.xlu0 %v1260_v36, %s4930_s22  ;;  %v800_v39 = vpop.f32.mrf.mxu0 }
 0x141   : > { %1011 = vst.msk [vmem:[#allocation2 + $0x60] sm:$0xff] %vm998_vm0, %v960_v38  ;;  %v801_v41 = vadd.f32 %v5083_v1, %v800_v39  ;;  %v4858_v38 = vld [vmem:[%s6924_s3 + $0x10] sm:$0xff]   ;;  %v1167_v39 = vrot.slane %v5161_v25, 6 }
 0x142   : > { %v802_v43 = vpop.f32.mrf.mxu0 }
 0x143   : > { %1156 = vrot.lane.b32.xlu1 %v1260_v36, %s4930_s22  ;;  %v961_v45 = vmax.f32 %v801_v41, 0.0  ;;  %v4857_v36 = vld [vmem:[%s6924_s3 + $0x50] sm:$0xff]   ;;  %v1169_v50 = vsel %vm1100_vm6, %v1167_v39, %v1276_v31 }
 0x144   : > { %1137 = vrot.lane.b32.xlu0 %v1241_v34, %s4931_s23  ;;  %v805_v47 = vpop.f32.mrf.mxu0  ;;  %4551 = vmatprep.subr.bf16.mxu1 %v4857_v36  ;;  %v5266_v43 = vld [vmem:[#allocation2 + $0x58] sm:$0xff] }
 0x145   : > { %1012 = vst.msk [vmem:[#allocation2 + $0x68] sm:$0xff] %vm998_vm0, %v961_v45  ;;  %v806_v49 = vadd.f32 %v5083_v1, %v805_v47  ;;  %4552 = vmatpush3.bf16.msra.mxu1 %v4858_v38  ;;  %v4859_v45 = vld [vmem:[%s6924_s3 + $0x48] sm:$0xff]  }
 0x146   : > { %v807_v52 = vpop.f32.mrf.mxu0  ;;  %4553 = vmatprep.subr.bf16.mxu1 %v4859_v45 }
 0x147   : > { %1262 = vrot.lane.b32.xlu1 %v1261_v51, %s4930_s22  ;;  %v962_v55 = vmax.f32 %v806_v49, 0.0  ;;  %v4860_v49 = vld [vmem:[%s6924_s3 + $0x8] sm:$0xff]   ;;  %v5280_v52 = vld [vmem:[#allocation2 + $0x50] sm:$0xff] }
 0x148   : > { %1243 = vrot.lane.b32.xlu0 %v1242_v54, %s4931_s23  ;;  %v808_v56 = vpop.f32.mrf.mxu0  ;;  %v5210_v62 = vld [vmem:[#allocation2 + $0x60] sm:$0xff] }
 0x149   : > { %1013 = vst.msk [vmem:[#allocation2 + $0x70] sm:$0xff] %vm998_vm0, %v962_v55  ;;  %v809_v58 = vadd.f32 %v5083_v1, %v808_v56  ;;  %v1467_v5 = vrot.slane %v5210_v62, 4  ;;  %v1449_v55 = vrot.slane %v5266_v43, 1  ;;  %4554 = vmatpush3.bf16.msra.mxu1 %v4860_v49  ;;  %v1305_v20 = vrot.slane %v5210_v62, 2 }
 0x14a   : > { %v810_v61 = vpop.f32.mrf.mxu0 }
 0x14b   : > { %1135 = vrot.lane.b32.xlu1 %v1242_v54, %s4931_s23  ;;  %v963_v63 = vmax.f32 %v809_v58, 0.0  ;;  %v4863_v58 = vld [vmem:[%s5001_s16 + $0x180] ss:$8 sps:$4 sm:$0xff]  }
 0x14c   : > { %1154 = vrot.lane.b32.xlu0 %v1261_v51, %s4930_s22  ;;  %v813_v2 = vpop.f32.mrf.mxu0  ;;  %v5214_v3 = vld [vmem:[#allocation2 + $0x68] sm:$0xff]  ;;  %v1293_v51 = vrot.slane %v5161_v25, 7  ;;  %v4864_v25 = vld [vmem:[%s6924_s3 + $0x40] sm:$0xff]   ;;  %940 = vmatmul.mubr.bf16.gmra.mxu0 %v4863_v58  ;;  %v1482_v58 = vrot.slane %v5210_v62, 5 }
 0x14d   : > { %1014 = vst.msk [vmem:[#allocation2 + $0x78] sm:$0xff] %vm998_vm0, %v963_v63  ;;  %v814_v6 = vadd.f32 %v5083_v1, %v813_v2  ;;  %v5227_v11 = vrot.slane %v5214_v3, 4  ;;  %v1314_v2 = vrot.slane %v5280_v52, 1  ;;  %4555 = vmatprep.subr.bf16.mxu1 %v4864_v25 }
 0x14e   : > { %v815_v10 = vpop.f32.mrf.mxu0  ;;  %4556 = vmatpush3.bf16.msra.mxu1 %v4865_v0 }
 0x14f   : > { %1287 = vrot.lane.b32.xlu1 %v1286_v9, %s4929_s21  ;;  %v964_v12 = vmax.f32 %v814_v6, 0.0  ;;  %v5236_v15 = vsel %vm1093_vm4, %v1467_v5, %v5227_v11  ;;  %v1295_v6 = vsel %vm1120_vm7, %v1293_v51, %v1294_v27 }
 0x150   : > { %1289 = vrot.lane.b32.xlu0 %v1285_v60, %s4929_s21  ;;  %v816_v13 = vpop.f32.mrf.mxu0 }
 0x151   : > { %1015 = vst.msk [vmem:[#allocation2 + $0x80] sm:$0xff] %vm998_vm0, %v964_v12  ;;  %v817_v17 = vadd.f32 %v5083_v1, %v816_v13  ;;  %v1316_v13 = vsel %vm1072_vm1, %v1314_v2, %v1449_v55 }
 0x152   : > { %v818_v21 = vpop.f32.mrf.mxu0 }
 0x153   : > { %1179 = vrot.lane.b32.xlu1 %v1286_v9, %s4929_s21  ;;  %v965_v23 = vmax.f32 %v817_v17, 0.0 }
 0x154   : > { %1181 = vrot.lane.b32.xlu0 %v1285_v60, %s4929_s21  ;;  %v821_v24 = vpop.f32.mrf.mxu0 }
 0x155   : > { %1016 = vst.msk [vmem:[#allocation2 + $0x88] sm:$0xff] %vm998_vm0, %v965_v23  ;;  %v822_v28 = vadd.f32 %v5083_v1, %v821_v24  ;;  %v1438_v23 = vrot.slane %v5266_v43, 2 }
 0x156   : > { %v823_v32 = vpop.f32.mrf.mxu0 }
 0x157   : > { %1298 = vrot.lane.b32.xlu1 %v1294_v27, %s4930_s22  ;;  %v966_v34 = vmax.f32 %v822_v28, 0.0  ;;  %v1440_v30 = vsel %vm1061_vm2, %v1438_v23, %v1305_v20  ;;  %v1458_v32 = vrot.slane %v5210_v62, 3 }
 0x158   : > { %1280 = vrot.lane.b32.xlu0 %v1276_v31, %s4931_s23  ;;  %v824_v35 = vpop.f32.mrf.mxu0 }
 0x159   : > { %1017 = vst.msk [vmem:[#allocation2 + $0x90] sm:$0xff] %vm998_vm0, %v966_v34  ;;  %v825_v37 = vadd.f32 %v5083_v1, %v824_v35 }
 0x15a   : > { %v826_v41 = vpop.f32.mrf.mxu0 }
 0x15b   : > { %1190 = vrot.lane.b32.xlu1 %v1294_v27, %s4930_s22  ;;  %v967_v42 = vmax.f32 %v825_v37, 0.0 }
 0x15c   : > { %1172 = vrot.lane.b32.xlu0 %v1276_v31, %s4931_s23  ;;  %v829_v44 = vpop.f32.mrf.mxu0  ;;  %v5272_v47 = vld [vmem:[#allocation2 + $0x88] sm:$0xff]  ;;  %v1457_v31 = vrot.slane %v5266_v43, 3 }
 0x15d   : > { %1018 = vst.msk [vmem:[#allocation2 + $0x98] sm:$0xff] %vm998_vm0, %v967_v42  ;;  %v830_v48 = vadd.f32 %v5083_v1, %v829_v44  ;;  %v1665_v61 = vrot.slane %v5272_v47, 4 }
 0x15e   : > { %v831_v54 = vpop.f32.mrf.mxu0  ;;  %v1459_v38 = vsel %vm1082_vm3, %v1457_v31, %v1458_v32  ;;  %v5377_v31 = vld [vmem:[#allocation2 + $0x80] sm:$0xff] }
 0x15f   : > { %1170 = vrot.lane.b32.xlu1 %v1169_v50, %s4931_s23  ;;  %v968_v56 = vmax.f32 %v830_v48, 0.0 }
 0x160   : > { %1278 = vrot.lane.b32.xlu0 %v1169_v50, %s4931_s23  ;;  %v5287_v59 = vld [vmem:[#allocation2 + $0x90] sm:$0xff]  ;;  %v832_v60 = vpop.f32.mrf.mxu0 }
 0x161   : > { %1019 = vst.msk [vmem:[#allocation2 + $0xa0] sm:$0xff] %vm998_vm0, %v968_v56  ;;  %v833_v63 = vadd.f32 %v5083_v1, %v832_v60  ;;  %v5300_v5 = vrot.slane %v5287_v59, 4  ;;  %v1483_v60 = vrot.slane %v5214_v3, 5 }
 0x162   : > { %v834_v4 = vpop.f32.mrf.mxu0 }
 0x163   : > { %1453 = vrot.lane.b32.xlu1 %v1449_v55, %s4929_s21  ;;  %v969_v7 = vmax.f32 %v833_v63, 0.0  ;;  %v5307_v10 = vsel %vm1093_vm4, %v1665_v61, %v5300_v5  ;;  %v1484_v2 = vsel %vm1110_vm5, %v1482_v58, %v1483_v60  ;;  %v1430_v4 = vld [vmem:[#allocation2 + $0x70] sm:$0xff] }
 0x164   : > { %1296 = vrot.lane.b32.xlu0 %v1295_v6, %s4930_s22  ;;  %v837_v9 = vpop.f32.mrf.mxu0 }
 0x165   : > { %1020 = vst.msk [vmem:[#allocation2 + $0xa8] sm:$0xff] %vm998_vm0, %v969_v7  ;;  %v838_v12 = vadd.f32 %v5083_v1, %v837_v9  ;;  %v1492_v9 = vrot.slane %v1430_v4, 7 }
 0x166   : > { %v839_v14 = vpop.f32.mrf.mxu0 }
 0x167   : > { %1317 = vrot.lane.b32.xlu1 %v1316_v13, %s4929_s21  ;;  %v970_v17 = vmax.f32 %v838_v12, 0.0 }
 0x168   : > { %1188 = vrot.lane.b32.xlu0 %v1295_v6, %s4930_s22  ;;  %v840_v18 = vpop.f32.mrf.mxu0 }
 0x169   : > { %1021 = vst.msk [vmem:[#allocation2 + $0xb0] sm:$0xff] %vm998_vm0, %v970_v17  ;;  %v841_v21 = vadd.f32 %v5083_v1, %v840_v18  ;;  %v1474_v18 = vrot.slane %v1430_v4, 6  ;;  %v5404_v4 = vrot.slane %v5272_v47, 3 }
 0x16a   : > { %v842_v24 = vpop.f32.mrf.mxu0 }
 0x16b   : > { %1309 = vrot.lane.b32.xlu1 %v1305_v20, %s4931_s23  ;;  %v971_v26 = vmax.f32 %v841_v21, 0.0 }
 0x16c   : > { %1319 = vrot.lane.b32.xlu0 %v1449_v55, %s4929_s21  ;;  %v845_v27 = vpop.f32.mrf.mxu0 }
 0x16d   : > { %1022 = vst.msk [vmem:[#allocation2 + $0xb8] sm:$0xff] %vm998_vm0, %v971_v26  ;;  %v846_v28 = vadd.f32 %v5083_v1, %v845_v27 }
 0x16e   : > { %v847_v34 = vpop.f32.mrf.mxu0 }
 0x16f   : > { %1441 = vrot.lane.b32.xlu1 %v1440_v30, %s4931_s23  ;;  %v972_v35 = vmax.f32 %v846_v28, 0.0  ;;  %v5380_v34 = vld [vmem:[#allocation2 + $0x78] sm:$0xff] }
 0x170   : > { %1451 = vrot.lane.b32.xlu0 %v1316_v13, %s4929_s21  ;;  %v848_v36 = vpop.f32.mrf.mxu0  ;;  %v5331_v41 = vld [vmem:[#allocation2 + $0xb0] sm:$0xff] }
 0x171   : > { %1023 = vst.msk [vmem:[#allocation2 + $0xc0] sm:$0xff] %vm998_vm0, %v972_v35  ;;  %v849_v37 = vadd.f32 %v5083_v1, %v848_v36  ;;  %v1863_v48 = vrot.slane %v5331_v41, 4 }
 0x172   : > { %v850_v39 = vpop.f32.mrf.mxu0 }
 0x173   : > { %1460 = vrot.lane.b32.xlu1 %v1459_v38, %s4930_s22  ;;  %v973_v42 = vmax.f32 %v849_v37, 0.0 }
 0x174   : > { %1443 = vrot.lane.b32.xlu0 %v1305_v20, %s4931_s23  ;;  %v853_v44 = vpop.f32.mrf.mxu0  ;;  %v5334_v45 = vld [vmem:[#allocation2 + $0xb8] sm:$0xff]  ;;  %v1473_v20 = vrot.slane %v5214_v3, 6 }
 0x175   : > { %1024 = vst.msk [vmem:[#allocation2 + $0xc8] sm:$0xff] %vm998_vm0, %v973_v42  ;;  %v854_v49 = vadd.f32 %v5083_v1, %v853_v44  ;;  %v5340_v51 = vrot.slane %v5334_v45, 4  ;;  %v1646_v42 = vrot.slane %v5380_v34, 1 }
 0x176   : > { %v855_v50 = vpop.f32.mrf.mxu0 }
 0x177   : > { %1307 = vrot.lane.b32.xlu1 %v1440_v30, %s4931_s23  ;;  %v974_v54 = vmax.f32 %v854_v49, 0.0  ;;  %v5346_v56 = vsel %vm1093_vm4, %v1863_v48, %v5340_v51  ;;  %v1475_v30 = vsel %vm1100_vm6, %v1473_v20, %v1474_v18  ;;  %v1491_v48 = vrot.slane %v5214_v3, 7 }
 0x178   : > { %1462 = vrot.lane.b32.xlu0 %v1458_v32, %s4930_s22  ;;  %v856_v55 = vpop.f32.mrf.mxu0 }
 0x179   : > { %1025 = vst.msk [vmem:[#allocation2 + $0xd0] sm:$0xff] %vm998_vm0, %v974_v54  ;;  %v857_v57 = vadd.f32 %v5083_v1, %v856_v55 }
 0x17a   : > { %v858_v25 = vpop.f32.mrf.mxu0 }
 0x17b   : > { %1326 = vrot.lane.b32.xlu1 %v1459_v38, %s4930_s22  ;;  %v975_v61 = vmax.f32 %v857_v57, 0.0  ;;  %v1513_v38 = vrot.slane %v5377_v31, 1  ;;  %v1493_v25 = vsel %vm1120_vm7, %v1491_v48, %v1492_v9  ;;  %v1680_v48 = vrot.slane %v5272_v47, 5 }
 0x17c   : > { %1328 = vrot.lane.b32.xlu0 %v1458_v32, %s4930_s22  ;;  %v861_v63 = vpop.f32.mrf.mxu0 }
 0x17d   : > { %1026 = vst.msk [vmem:[#allocation2 + $0xd8] sm:$0xff] %vm998_vm0, %v975_v61  ;;  %v862_v0 = vadd.f32 %v5083_v1, %v861_v63  ;;  %v1648_v58 = vsel %vm1072_vm1, %v1646_v42, %v1513_v38  ;;  %v1637_v61 = vrot.slane %v5272_v47, 2 }
 0x17e   : > { %v863_v6 = vpop.f32.mrf.mxu0 }
 0x17f   : > { %1485 = vrot.lane.b32.xlu1 %v1484_v2, %s4929_s21  ;;  %v976_v62 = vmax.f32 %v862_v0, 0.0 }
 0x180   : > { %1487 = vrot.lane.b32.xlu0 %v1483_v60, %s4929_s21  ;;  %v864_v7 = vpop.f32.mrf.mxu0 }
 0x181   : > { %1027 = vst.msk [vmem:[#allocation2 + $0xe0] sm:$0xff] %vm998_vm0, %v976_v62  ;;  %v865_v12 = vadd.f32 %v5083_v1, %v864_v7 }
 0x182   : > { %v866_v13 = vpop.f32.mrf.mxu0 }
 0x183   : > { %1496 = vrot.lane.b32.xlu1 %v1492_v9, %s4930_s22  ;;  %v977_v14 = vmax.f32 %v865_v12, 0.0 }
 0x184   : > { %1353 = vrot.lane.b32.xlu0 %v1483_v60, %s4929_s21  ;;  %v5363_v17 = vld [vmem:[#allocation2 + $0xd8] sm:$0xff]  ;;  %v869_v21 = vpop.f32.mrf.mxu0 }
 0x185   : > { %1028 = vst.msk [vmem:[#allocation2 + $0xe8] sm:$0xff] %vm998_vm0, %v977_v14  ;;  %v2061_v23 = vrot.slane %v5363_v17, 4  ;;  %v870_v24 = vadd.f32 %v5083_v1, %v869_v21 }
 0x186   : > { %v871_v27 = vpop.f32.mrf.mxu0 }
 0x187   : > { %1362 = vrot.lane.b32.xlu1 %v1492_v9, %s4930_s22  ;;  %v978_v32 = vmax.f32 %v870_v24, 0.0 }
 0x188   : > { %1351 = vrot.lane.b32.xlu0 %v1484_v2, %s4929_s21  ;;  %v5371_v26 = vld [vmem:[#allocation2 + $0xe0] sm:$0xff]  ;;  %v872_v35 = vpop.f32.mrf.mxu0  ;;  %v1655_v2 = vrot.slane %v5377_v31, 3 }
 0x189   : > { %v5374_v28 = vrot.slane %v5371_v26, 4  ;;  %1029 = vst.msk [vmem:[#allocation2 + $0xf0] sm:$0xff] %vm998_vm0, %v978_v32  ;;  %v873_v37 = vadd.f32 %v5083_v1, %v872_v35 }
 0x18a   : > { %v874_v39 = vpop.f32.mrf.mxu0  ;;  %v1657_v21 = vsel %vm1082_vm3, %v1655_v2, %v5404_v4 }
 0x18b   : > { %1476 = vrot.lane.b32.xlu1 %v1475_v30, %s4931_s23  ;;  %v5384_v36 = vsel %vm1093_vm4, %v2061_v23, %v5374_v28  ;;  %v979_v44 = vmax.f32 %v873_v37, 0.0 }
 0x18c   : > { %1478 = vrot.lane.b32.xlu0 %v1474_v18, %s4931_s23  ;;  %v877_v49 = vpop.f32.mrf.mxu0 }
 0x18d   : > { %1030 = vst.msk [vmem:[#allocation2 + $0xf8] sm:$0xff] %vm998_vm0, %v979_v44  ;;  %v878_v50 = vadd.f32 %v5083_v1, %v877_v49  ;;  %v5432_v49 = vrot.slane %v5287_v59, 5 }
 0x18e   : > { %v879_v55 = vpop.f32.mrf.mxu0 }
 0x18f   : > { %1517 = vrot.lane.b32.xlu1 %v1513_v38, %s4929_s21  ;;  %v980_v60 = vmax.f32 %v878_v50, 0.0 }
 0x190   : > { %1344 = vrot.lane.b32.xlu0 %v1474_v18, %s4931_s23  ;;  %v880_v63 = vpop.f32.mrf.mxu0 }
 0x191   : > { %v1079_v54 = vpop.permute.xlu1 %1078  ;;  %1031 = vst.msk [vmem:[#allocation2 + $0x100] sm:$0xff] %vm998_vm0, %v980_v60  ;;  %v881_v6 = vadd.f32 %v5083_v1, %v880_v63  ;;  %v1682_v60 = vsel %vm1110_vm5, %v1680_v48, %v5432_v49  ;;  %v1628_v63 = vld [vmem:[#allocation2 + $0x98] sm:$0xff] }
 0x192   : > { %v1077_v57 = vpop.permute.xlu0 %1076  ;;  %v882_v7 = vpop.f32.mrf.mxu0 }
 0x193   : > { %1649 = vrot.lane.b32.xlu1 %v1648_v58, %s4929_s21  ;;  %v981_v12 = vmax.f32 %v881_v6, 0.0  ;;  %v5466_v7 = vrot.slane %v1628_v63, 7 }
 0x194   : > { %1494 = vrot.lane.b32.xlu0 %v1493_v25, %s4930_s22  ;;  %v885_v24 = vpop.f32.mrf.mxu0 }
 0x195   : > { %v1089_v3 = vpop.permute.xlu1 %1088  ;;  %1032 = vst.msk [vmem:[#allocation2 + $0x108] sm:$0xff] %vm998_vm0, %v981_v12 }
 0x196   : > { %v1068_v0 = vpop.permute.xlu0 %1067  ;;  %v887_v32 = vpop.f32.mrf.mxu0 }
 0x197   : > { %v1195_v62 = vsel %vm998_vm0, %v5096_v22, %v1068_v0  ;;  %1641 = vrot.lane.b32.xlu1 %v1637_v61, %s4931_s23  ;;  %v1502_v22 = vrot.slane %v5377_v31, 2 }
 0x198   : > { %v1198_v9 = vsel %vm1196_vm8, %v1195_v62, %v1079_v54  ;;  %1342 = vrot.lane.b32.xlu0 %v1475_v30, %s4931_s23  ;;  %v888_v12 = vpop.f32.mrf.mxu0 }
 0x199   : > { %v1201_v13 = vsel %vm1199_vm9, %v1198_v9, %v1089_v3  ;;  %v1066_v14 = vpop.permute.xlu1 %1065  ;;  %v1504_v37 = vsel %vm1061_vm2, %v1502_v22, %v1637_v61  ;;  %v5454_v3 = vld [vmem:[#allocation2 + $0x100] sm:$0xff]  ;;  %v1671_v22 = vrot.slane %v5287_v59, 6 }
 0x19a   : > { %1224 = vst [vmem:[#allocation3 + $0x120] sm:$0x1] %v1201_v13  ;;  %v1194_v18 = vsel %vm998_vm0, %v5094_v19, %v1066_v14  ;;  %v1087_v20 = vpop.permute.xlu0 %1086  ;;  %v886_v19 = vadd.f32 %v5083_v1, %v885_v24  ;;  %v2259_v0 = vrot.slane %v5454_v3, 4  ;;  %v889_v13 = vadd.f32 %v5083_v1, %v888_v12  ;;  %v890_v14 = vpop.f32.mrf.mxu0 }
 0x19b   : > { %v1197_v23 = vsel %vm1196_vm8, %v1194_v18, %v1077_v57  ;;  %1658 = vrot.lane.b32.xlu1 %v1657_v21, %s4930_s22 }
 0x19c   : > { %v5422_v27 = vsel %vm1199_vm9, %v1197_v23, %v1087_v20  ;;  %1360 = vrot.lane.b32.xlu0 %v1493_v25, %s4930_s22  ;;  %v982_v39 = vmax.f32 %v886_v19, 0.0  ;;  %v1672_v20 = vrot.slane %v1628_v63, 6  ;;  %v893_v23 = vpop.f32.mrf.mxu0 }
 0x19d   : > { %v1115_v30 = vpop.permute.xlu1 %1114  ;;  %v894_v24 = vadd.f32 %v5083_v1, %v893_v23  ;;  %v5489_v1 = vld [vmem:[#allocation2 + $0xa8] sm:$0xff] }
 0x19e   : > { %v1117_v35 = vpop.permute.xlu0 %1116  ;;  %1033 = vst.msk [vmem:[#allocation2 + $0x110] sm:$0xff] %vm998_vm0, %v982_v39 }
 0x19f   : > { %1505 = vrot.lane.b32.xlu1 %v1504_v37, %s4931_s23  ;;  %v984_v39 = vmax.f32 %v894_v24, 0.0  ;;  %v1689_v24 = vrot.slane %v5287_v59, 7 }
 0x1a0   : > { %1651 = vrot.lane.b32.xlu0 %v1513_v38, %s4929_s21 }
 0x1a1   : > { %v1127_v42 = vpop.permute.xlu1 %1126  ;;  %1035 = vst.msk [vmem:[#allocation2 + $0x120] sm:$0xff] %vm998_vm0, %v984_v39  ;;  %v1691_v59 = vsel %vm1120_vm7, %v1689_v24, %v5466_v7 }
 0x1a2   : > { %v1107_v44 = vpop.permute.xlu0 %1106 }
 0x1a3   : > { %v1203_v50 = vsel %vm998_vm0, %v1095_v46, %v1107_v44  ;;  %1524 = vrot.lane.b32.xlu1 %v1657_v21, %s4930_s22 }
 0x1a4   : > { %v1205_v54 = vsel %vm1196_vm8, %v1203_v50, %v1117_v35  ;;  %1515 = vrot.lane.b32.xlu0 %v1648_v58, %s4929_s21  ;;  %v5452_v58 = vld [vmem:[#allocation2 + $0x108] sm:$0xff]  ;;  %v1673_v35 = vsel %vm1100_vm6, %v1671_v22, %v1672_v20 }
 0x1a5   : > { %v1207_v38 = vsel %vm1199_vm9, %v1205_v54, %v1127_v42  ;;  %v1105_v55 = vpop.permute.xlu1 %1104  ;;  %v5458_v2 = vrot.slane %v5452_v58, 4 }
 0x1a6   : > { %1225 = vst [vmem:[#allocation3 + $0x38] sm:$0x1] %v1207_v38  ;;  %v1202_v47 = vsel %vm998_vm0, %v5127_v53, %v1105_v55  ;;  %v1125_v57 = vpop.permute.xlu0 %1124  ;;  %v1845_v55 = vrot.slane %v5489_v1, 1 }
 0x1a7   : > { %v1204_v40 = vsel %vm1196_vm8, %v1202_v47, %v1115_v30  ;;  %1683 = vrot.lane.b32.xlu1 %v1682_v60, %s4929_s21  ;;  %v5464_v6 = vsel %vm1093_vm4, %v2259_v0, %v5458_v2  ;;  %v895_v30 = vpop.f32.mrf.mxu0  ;;  %v5498_v47 = vld [vmem:[#allocation2 + $0xa0] sm:$0xff] }
 0x1a8   : > { %v5448_v46 = vsel %vm1199_vm9, %v1204_v40, %v1125_v57  ;;  %1660 = vrot.lane.b32.xlu0 %v5404_v4, %s4930_s22  ;;  %v1710_v12 = vrot.slane %v5498_v47, 1 }
 0x1a9   : > { %v1148_v25 = vpop.permute.xlu1 %1147  ;;  %v896_v14 = vpop.f32.mrf.mxu0 }
 0x1aa   : > { %v1256_v53 = vpop.permute.xlu0 %1255  ;;  %v1712_v22 = vsel %vm1072_vm1, %v1710_v12, %v1845_v55 }
 0x1ab   : > { %1549 = vrot.lane.b32.xlu1 %v1682_v60, %s4929_s21 }
 0x1ac   : > { %1507 = vrot.lane.b32.xlu0 %v1637_v61, %s4931_s23  ;;  %v983_v61 = vmax.f32 %v889_v13, 0.0 }
 0x1ad   : > { %v1254_v62 = vpop.permute.xlu1 %1253 }
 0x1ae   : > { %v1146_v9 = vpop.permute.xlu0 %1145  ;;  %1034 = vst.msk [vmem:[#allocation2 + $0x118] sm:$0xff] %vm998_vm0, %v983_v61  ;;  %v898_v61 = vpop.f32.mrf.mxu0 }
 0x1af   : > { %1694 = vrot.lane.b32.xlu1 %v5466_v7, %s4930_s22 }
 0x1b0   : > { %1526 = vrot.lane.b32.xlu0 %v5404_v4, %s4930_s22 }
 0x1b1   : > { %v1246_v18 = vpop.permute.xlu1 %1245 }
 0x1b2   : > { %v1265_v21 = vpop.permute.xlu0 %1264  ;;  %v1367_v4 = vsel %vm998_vm0, %v5144_v8, %v1246_v18  ;;  %v5515_v18 = vld [vmem:[%s6923_s2] ss:$0 sm:$0xff] }
 0x1b3   : > { %1560 = vrot.lane.b32.xlu1 %v5466_v7, %s4930_s22  ;;  %v1369_v44 = vsel %vm1196_vm8, %v1367_v4, %v1256_v53  ;;  %v901_v4 = vpop.f32.mrf.mxu0 }
 0x1b4   : > { %1639 = vrot.lane.b32.xlu0 %v1504_v37, %s4931_s23 }
 0x1b5   : > { %v1157_v19 = vpop.permute.xlu1 %1156 }
 0x1b6   : > { %v1138_v32 = vpop.permute.xlu0 %1137 }
 0x1b7   : > { %v1209_v42 = vsel %vm998_vm0, %v5144_v8, %v1138_v32  ;;  %1674 = vrot.lane.b32.xlu1 %v1673_v35, %s4931_s23  ;;  %v1371_v8 = vsel %vm1199_vm9, %v1369_v44, %v1265_v21  ;;  %v1701_v32 = vrot.slane %v5331_v41, 2 }
 0x1b8   : > { %v1211_v37 = vsel %vm1196_vm8, %v1209_v42, %v1148_v25  ;;  %1685 = vrot.lane.b32.xlu0 %v5432_v49, %s4929_s21  ;;  %v1402_v25 = vrot.slane %v1371_v8, 7  ;;  %v1834_v42 = vrot.slane %v5489_v1, 2 }
 0x1b9   : > { %v1213_v48 = vsel %vm1199_vm9, %v1211_v37, %v1157_v19  ;;  %v1263_v50 = vpop.permute.xlu1 %1262  ;;  %v902_v19 = vadd.f32 %v5515_v18, %v901_v4 }
 0x1ba   : > { %1226 = vst [vmem:[#allocation3 + $0xf8] sm:$0x1] %v1213_v48  ;;  %v1244_v54 = vpop.permute.xlu0 %1243  ;;  %v5532_v48 = vsel %vm1061_vm2, %v1834_v42, %v1701_v32 }
 0x1bb   : > { %v1366_v38 = vsel %vm998_vm0, %v5152_v16, %v1244_v54  ;;  %1540 = vrot.lane.b32.xlu1 %v1673_v35, %s4931_s23  ;;  %v903_v35 = vpop.f32.mrf.mxu0  ;;  %v986_v44 = vmax.f32 %v902_v19, 0.0  ;;  %v5536_v54 = vrot.slane %v5331_v41, 3 }
 0x1bc   : > { %v1368_v57 = vsel %vm1196_vm8, %v1366_v38, %v1254_v62  ;;  %1551 = vrot.lane.b32.xlu0 %v5432_v49, %s4929_s21 }
 0x1bd   : > { %v1370_v60 = vsel %vm1199_vm9, %v1368_v57, %v1263_v50  ;;  %v1136_v40 = vpop.permute.xlu1 %1135  ;;  %1037 = vst.msk [vmem:[#allocation2 + $0x130] sm:$0xff] %vm998_vm0, %v986_v44  ;;  %v1853_v50 = vrot.slane %v5489_v1, 3 }
 0x1be   : > { %v1398_v53 = vrot.slane %v1370_v60, 7  ;;  %v1208_v63 = vsel %vm998_vm0, %v5152_v16, %v1136_v40  ;;  %v1155_v0 = vpop.permute.xlu0 %1154  ;;  %v897_v16 = vadd.f32 %v5515_v18, %v896_v14  ;;  %v1878_v14 = vrot.slane %v5331_v41, 5 }
 0x1bf   : > { %v1210_v13 = vsel %vm1196_vm8, %v1208_v63, %v1146_v9  ;;  %1849 = vrot.lane.b32.xlu1 %v1845_v55, %s4929_s21  ;;  %v1855_v38 = vsel %vm1082_vm3, %v1853_v50, %v5536_v54 }
 0x1c0   : > { %v1403_v62 = vsel %vm1120_vm7, %v1398_v53, %v1402_v25  ;;  %1418 = vst [vmem:[#allocation3 + $0x120] sm:$0xfe] %v1398_v53  ;;  %v1212_v49 = vsel %vm1199_vm9, %v1210_v13, %v1155_v0  ;;  %1676 = vrot.lane.b32.xlu0 %v1672_v20, %s4931_s23  ;;  %v985_v23 = vmax.f32 %v897_v16, 0.0 }
 0x1c1   : > { %1422 = vst [vmem:[#allocation3 + $0x80] sm:$0x3] %v1403_v62  ;;  %1222 = vst [vmem:[#allocation3 + $0x10] sm:$0xff] %v1212_v49  ;;  %v1288_v9 = vpop.permute.xlu1 %1287  ;;  %v904_v49 = vpop.f32.mrf.mxu0 }
 0x1c2   : > { %v1290_v21 = vpop.permute.xlu0 %1289  ;;  %1036 = vst.msk [vmem:[#allocation2 + $0x128] sm:$0xff] %vm998_vm0, %v985_v23  ;;  %v905_v41 = vadd.f32 %v5515_v18, %v904_v49 }
 0x1c3   : > { %1713 = vrot.lane.b32.xlu1 %v1712_v22, %s4929_s21  ;;  %v906_v19 = vpop.f32.mrf.mxu0 }
 0x1c4   : > { %1542 = vrot.lane.b32.xlu0 %v1672_v20, %s4931_s23  ;;  %v5550_v25 = vld [vmem:[#allocation2 + $0x130] sm:$0xff]  ;;  %v987_v42 = vmax.f32 %v905_v41, 0.0 }
 0x1c5   : > { %v1180_v30 = vpop.permute.xlu1 %1179 }
 0x1c6   : > { %v1182_v39 = vpop.permute.xlu0 %1181  ;;  %1038 = vst.msk [vmem:[#allocation2 + $0x138] sm:$0xff] %vm998_vm0, %v987_v42 }
 0x1c7   : > { %1705 = vrot.lane.b32.xlu1 %v1701_v32, %s4931_s23 }
 0x1c8   : > { %1692 = vrot.lane.b32.xlu0 %v1691_v59, %s4930_s22 }
 0x1c9   : > { %v1299_v20 = vpop.permute.xlu1 %1298  ;;  %v5553_v0 = vld [vmem:[#allocation2 + $0x128] sm:$0xff] }
 0x1ca   : > { %v1281_v37 = vpop.permute.xlu0 %1280  ;;  %v2457_v16 = vrot.slane %v5553_v0, 4 }
 0x1cb   : > { %1837 = vrot.lane.b32.xlu1 %v5532_v48, %s4931_s23  ;;  %v1373_v57 = vsel %vm998_vm0, %v5167_v29, %v1281_v37 }
 0x1cc   : > { %1558 = vrot.lane.b32.xlu0 %v1691_v59, %s4930_s22  ;;  %v1375_v12 = vsel %vm1196_vm8, %v1373_v57, %v1290_v21 }
 0x1cd   : > { %v1191_v7 = vpop.permute.xlu1 %1190  ;;  %v1377_v61 = vsel %vm1199_vm9, %v1375_v12, %v1299_v20  ;;  %v2788_v12 = vld [vmem:[#allocation3 + $0x120] sm:$0xff] }
 0x1ce   : > { %v1173_v8 = vpop.permute.xlu0 %1172  ;;  %v1404_v44 = vrot.slane %v1377_v61, 7 }
 0x1cf   : > { %v1215_v60 = vsel %vm998_vm0, %v5167_v29, %v1173_v8  ;;  %1856 = vrot.lane.b32.xlu1 %v1855_v38, %s4930_s22  ;;  %v5558_v29 = vrot.slane %v5334_v45, 5 }
 0x1d0   : > { %v1217_v40 = vsel %vm1196_vm8, %v1215_v60, %v1182_v39  ;;  %1715 = vrot.lane.b32.xlu0 %v1845_v55, %s4929_s21  ;;  %v5564_v55 = vrot.slane %v5550_v25, 4 }
 0x1d1   : > { %v1219_v53 = vsel %vm1199_vm9, %v1217_v40, %v1191_v7  ;;  %v1171_v63 = vpop.permute.xlu1 %1170  ;;  %v1880_v4 = vsel %vm1110_vm5, %v1878_v14, %v5558_v29  ;;  %v909_v7 = vpop.f32.mrf.mxu0 }
 0x1d2   : > { %1227 = vst [vmem:[#allocation3 + $0x100] sm:$0x1] %v1219_v53  ;;  %v1279_v13 = vpop.permute.xlu0 %1278  ;;  %v5577_v35 = vsel %vm1093_vm4, %v2457_v16, %v5564_v55  ;;  %v910_v60 = vadd.f32 %v5515_v18, %v909_v7 }
 0x1d3   : > { %v1372_v62 = vsel %vm998_vm0, %v5174_v33, %v1279_v13  ;;  %1722 = vrot.lane.b32.xlu1 %v1855_v38, %s4930_s22 }
 0x1d4   : > { %1847 = vrot.lane.b32.xlu0 %v1712_v22, %s4929_s21  ;;  %v1374_v23 = vsel %vm1196_vm8, %v1372_v62, %v1288_v9  ;;  %v1214_v22 = vsel %vm998_vm0, %v5174_v33, %v1171_v63  ;;  %v1826_v33 = vld [vmem:[#allocation2 + $0xc0] sm:$0xff]  ;;  %v988_v53 = vmax.f32 %v910_v60, 0.0 }
 0x1d5   : > { %v5569_v21 = vpop.permute.xlu1 %1453  ;;  %v1216_v37 = vsel %vm1196_vm8, %v1214_v22, %v1180_v30  ;;  %v5593_v57 = vrot.slane %v1826_v33, 7  ;;  %v5602_v16 = vrot.slane %v1826_v33, 6 }
 0x1d6   : > { %v1297_v24 = vpop.permute.xlu0 %1296  ;;  %1039 = vst.msk [vmem:[#allocation2 + $0x140] sm:$0xff] %vm998_vm0, %v988_v53  ;;  %v5630_v53 = vld [vmem:[#allocation2 + $0xd0] sm:$0xff] }
 0x1d7   : > { %v1376_v39 = vsel %vm1199_vm9, %v1374_v23, %v1297_v24  ;;  %1881 = vrot.lane.b32.xlu1 %v1880_v4, %s4929_s21  ;;  %v1869_v24 = vrot.slane %v5334_v45, 6 }
 0x1d8   : > { %v1399_v59 = vrot.slane %v1376_v39, 7  ;;  %1839 = vrot.lane.b32.xlu0 %v1701_v32, %s4931_s23  ;;  %v911_v32 = vpop.f32.mrf.mxu0 }
 0x1d9   : > { %v5584_v9 = vpop.permute.xlu1 %1317 }
 0x1da   : > { %v1405_v20 = vsel %vm1120_vm7, %v1399_v59, %v1404_v44  ;;  %1419 = vst [vmem:[#allocation3 + $0x38] sm:$0xfe] %v1399_v59  ;;  %v1189_v50 = vpop.permute.xlu0 %1188  ;;  %v912_v30 = vpop.f32.mrf.mxu0 }
 0x1db   : > { %1423 = vst [vmem:[#allocation3 + $0x108] sm:$0x3] %v1405_v20  ;;  %v1218_v8 = vsel %vm1199_vm9, %v1216_v37, %v1189_v50  ;;  %1747 = vrot.lane.b32.xlu1 %v1880_v4, %s4929_s21  ;;  %v913_v63 = vadd.f32 %v5515_v18, %v912_v30 }
 0x1dc   : > { %1223 = vst [vmem:[#allocation3 + $0x48] sm:$0xff] %v1218_v8  ;;  %1858 = vrot.lane.b32.xlu0 %v5536_v54, %s4930_s22  ;;  %v914_v13 = vpop.f32.mrf.mxu0 }
 0x1dd   : > { %v1310_v38 = vpop.permute.xlu1 %1309  ;;  %v989_v49 = vmax.f32 %v913_v63, 0.0 }
 0x1de   : > { %v1320_v40 = vpop.permute.xlu0 %1319  ;;  %v917_v4 = vpop.f32.mrf.mxu0 }
 0x1df   : > { %1892 = vrot.lane.b32.xlu1 %v5593_v57, %s4930_s22  ;;  %1040 = vst.msk [vmem:[#allocation2 + $0x148] sm:$0xff] %vm998_vm0, %v989_v49  ;;  %v918_v19 = vadd.f32 %v5515_v18, %v917_v4 }
 0x1e0   : > { %1724 = vrot.lane.b32.xlu0 %v5536_v54, %s4930_s22  ;;  %v2828_v54 = vpack.c.bf16 %v2788_v12, %v5422_v27  ;;  %v919_v22 = vpop.f32.mrf.mxu0  ;;  %v1871_v27 = vsel %vm1100_vm6, %v1869_v24, %v5602_v16  ;;  %v1379_v12 = vsel %vm998_vm0, %v5266_v43, %v1310_v38 }
 0x1e1   : > { %v1442_v14 = vpop.permute.xlu1 %1441  ;;  %v2789_v62 = vld [vmem:[#allocation3 + $0x38] sm:$0xff]  ;;  %v990_v42 = vmax.f32 %v918_v19, 0.0 }
 0x1e2   : > { %v1564_v61 = vsel %vm998_vm0, %v5280_v52, %v1442_v14  ;;  %v1452_v41 = vpop.permute.xlu0 %1451  ;;  %v2829_v23 = vpack.c.bf16 %v2789_v62, %v5448_v46  ;;  %v920_v20 = vpop.f32.mrf.mxu0  ;;  %v5636_v14 = vld [vmem:[#allocation2 + $0xc8] sm:$0xff] }
 0x1e3   : > { %1758 = vrot.lane.b32.xlu1 %v5593_v57, %s4930_s22  ;;  %v1566_v39 = vsel %vm1196_vm8, %v1564_v61, %v1452_v41  ;;  %1041 = vst.msk [vmem:[#allocation2 + $0x150] sm:$0xff] %vm998_vm0, %v990_v42  ;;  %v1381_v41 = vsel %vm1196_vm8, %v1379_v12, %v1320_v40 }
 0x1e4   : > { %1703 = vrot.lane.b32.xlu0 %v5532_v48, %s4931_s23  ;;  %3147 = vmatprep.mubr.bf16.mxu1 %v2829_v23  ;;  %v921_v48 = vadd.f32 %v5515_v18, %v920_v20  ;;  %v922_v33 = vpop.f32.mrf.mxu0 }
 0x1e5   : > { %v1461_v46 = vpop.permute.xlu1 %1460  ;;  %3148 = vmatmul.mubr.bf16.vlgmr.msra.gmra.mxu1 %v2828_v54  ;;  %v2042_v54 = vrot.slane %v5636_v14, 1  ;;  %v2051_v33 = vrot.slane %v5630_v53, 3 }
 0x1e6   : > { %v1568_v44 = vsel %vm1199_vm9, %v1566_v39, %v1461_v46  ;;  %v1444_v59 = vpop.permute.xlu0 %1443  ;;  %v991_v8 = vmax.f32 %v921_v48, 0.0  ;;  %v925_v63 = vpop.f32.mrf.mxu0 }
 0x1e7   : > { %v1596_v37 = vrot.slane %v1568_v44, 6  ;;  %v1565_v50 = vsel %vm998_vm0, %v5266_v43, %v1444_v59  ;;  %1872 = vrot.lane.b32.xlu1 %v1871_v27, %s4931_s23  ;;  %v1909_v43 = vrot.slane %v5630_v53, 1  ;;  %v1887_v44 = vrot.slane %v5334_v45, 7 }
 0x1e8   : > { %1883 = vrot.lane.b32.xlu0 %v5558_v29, %s4929_s21  ;;  %v1567_v60 = vsel %vm1196_vm8, %v1565_v50, %v5569_v21  ;;  %1042 = vst.msk [vmem:[#allocation2 + $0x158] sm:$0xff] %vm998_vm0, %v991_v8  ;;  %v927_v21 = vpop.f32.mrf.mxu0 }
 0x1e9   : > { %1616 = vst [vmem:[#allocation3 + $0x80] sm:$0xfc] %v1596_v37  ;;  %v1308_v7 = vpop.permute.xlu1 %1307  ;;  %v2044_v46 = vsel %vm1072_vm1, %v2042_v54, %v1909_v43  ;;  %v1889_v45 = vsel %vm1120_vm7, %v1887_v44, %v5593_v57  ;;  %v1898_v21 = vrot.slane %v5630_v53, 2 }
 0x1ea   : > { %v1378_v32 = vsel %vm998_vm0, %v5280_v52, %v1308_v7  ;;  %v1463_v30 = vpop.permute.xlu0 %1462  ;;  %v926_v52 = vadd.f32 %v5515_v18, %v925_v63  ;;  %v928_v42 = vpop.f32.mrf.mxu0  ;;  %v5664_v7 = vrot.slane %v5363_v17, 3 }
 0x1eb   : > { %v1569_v13 = vsel %vm1199_vm9, %v1567_v60, %v1463_v30  ;;  %1738 = vrot.lane.b32.xlu1 %v1871_v27, %s4931_s23  ;;  %v1380_v49 = vsel %vm1196_vm8, %v1378_v32, %v5584_v9  ;;  %v929_v59 = vadd.f32 %v5515_v18, %v928_v42  ;;  %v5674_v60 = vld [vmem:[#allocation2 + $0x150] sm:$0xff] }
 0x1ec   : > { %v1600_v62 = vrot.slane %v1569_v13, 6  ;;  %1749 = vrot.lane.b32.xlu0 %v5558_v29, %s4929_s21  ;;  %v992_v38 = vmax.f32 %v926_v52, 0.0  ;;  %v930_v27 = vpop.f32.mrf.mxu0  ;;  %v2655_v52 = vrot.slane %v5674_v60, 4  ;;  %v2053_v57 = vsel %vm1082_vm3, %v2051_v33, %v5664_v7 }
 0x1ed   : > { %v1327_v61 = vpop.permute.xlu1 %1326  ;;  %v993_v50 = vmax.f32 %v929_v59, 0.0 }
 0x1ee   : > { %v1601_v23 = vsel %vm1100_vm6, %v1596_v37, %v1600_v62  ;;  %v1382_v24 = vsel %vm1199_vm9, %v1380_v49, %v1327_v61  ;;  %v1329_v4 = vpop.permute.xlu0 %1328  ;;  %1043 = vst.msk [vmem:[#allocation2 + $0x160] sm:$0xff] %vm998_vm0, %v992_v38  ;;  %v2033_v37 = vrot.slane %v5363_v17, 2  ;;  %v933_v8 = vpop.f32.mrf.mxu0 }
 0x1ef   : > { %1620 = vst [vmem:[#allocation3 + $0x18] sm:$0x7] %v1601_v23  ;;  %v1400_v19 = vrot.slane %v1382_v24, 7  ;;  %v1383_v29 = vsel %vm1199_vm9, %v1381_v41, %v1329_v4  ;;  %1913 = vrot.lane.b32.xlu1 %v1909_v43, %s4929_s21  ;;  %v5666_v32 = vld [vmem:[#allocation2 + $0x158] sm:$0xff]  ;;  %1044 = vst.msk [vmem:[#allocation2 + $0x168] sm:$0xff] %vm998_vm0, %v993_v50 }
 0x1f0   : > { %v1406_v9 = vrot.slane %v1383_v29, 7  ;;  %1874 = vrot.lane.b32.xlu0 %v5602_v16, %s4931_s23  ;;  %v935_v30 = vpop.f32.mrf.mxu0  ;;  %v5677_v63 = vrot.slane %v5666_v32, 4  ;;  %v1900_v41 = vsel %vm1061_vm2, %v1898_v21, %v2033_v37  ;;  %v2077_v29 = vrot.slane %v5371_v26, 5 }
 0x1f1   : > { %1420 = vst [vmem:[#allocation3 + $0xf8] sm:$0xfe] %v1400_v19  ;;  %v1486_v40 = vpop.permute.xlu1 %1485 }
 0x1f2   : > { %v1407_v22 = vsel %vm1120_vm7, %v1400_v19, %v1406_v9  ;;  %v1488_v39 = vpop.permute.xlu0 %1487  ;;  %v5687_v49 = vsel %vm1093_vm4, %v2655_v52, %v5677_v63  ;;  %v2076_v19 = vrot.slane %v5363_v17, 5 }
 0x1f3   : > { %1424 = vst [vmem:[#allocation3 + $0x138] sm:$0x3] %v1407_v22  ;;  %2045 = vrot.lane.b32.xlu1 %v2044_v46, %s4929_s21 }
 0x1f4   : > { %1740 = vrot.lane.b32.xlu0 %v5602_v16, %s4931_s23  ;;  %v934_v16 = vadd.f32 %v5515_v18, %v933_v8  ;;  %v2024_v8 = vld [vmem:[#allocation2 + $0xe8] sm:$0xff] }
 0x1f5   : > { %v1497_v20 = vpop.permute.xlu1 %1496  ;;  %v5726_v30 = vrot.slane %v2024_v8, 7 }
 0x1f6   : > { %v1354_v48 = vpop.permute.xlu0 %1353  ;;  %v994_v13 = vmax.f32 %v934_v16, 0.0 }
 0x1f7   : > { %2037 = vrot.lane.b32.xlu1 %v2033_v37, %s4931_s23 }
 0x1f8   : > { %1890 = vrot.lane.b32.xlu0 %v1889_v45, %s4930_s22  ;;  %1045 = vst.msk [vmem:[#allocation2 + $0x170] sm:$0xff] %vm998_vm0, %v994_v13 }
 0x1f9   : > { %v1363_v12 = vpop.permute.xlu1 %1362 }
 0x1fa   : > { %v1352_v62 = vpop.permute.xlu0 %1351 }
 0x1fb   : > { %2054 = vrot.lane.b32.xlu1 %v2053_v57, %s4930_s22 }
 0x1fc   : > { %1756 = vrot.lane.b32.xlu0 %v1889_v45, %s4930_s22 }
 0x1fd   : > { %v1477_v61 = vpop.permute.xlu1 %1476 }
 0x1fe   : > { %v1479_v38 = vpop.permute.xlu0 %1478  ;;  %v1570_v9 = vsel %vm998_vm0, %v5236_v15, %v1477_v61  ;;  %v2067_v61 = vrot.slane %v5371_v26, 6 }
 0x1ff   : > { %v1571_v23 = vsel %vm998_vm0, %v5227_v11, %v1479_v38  ;;  %1901 = vrot.lane.b32.xlu1 %v1900_v41, %s4931_s23  ;;  %v2068_v38 = vrot.slane %v2024_v8, 6 }
 0x200   : > { %2047 = vrot.lane.b32.xlu0 %v1909_v43, %s4929_s21  ;;  %v1573_v4 = vsel %vm1196_vm8, %v1571_v23, %v1488_v39  ;;  %v1572_v43 = vsel %vm1196_vm8, %v1570_v9, %v1486_v40  ;;  %v2078_v39 = vsel %vm1110_vm5, %v2076_v19, %v2077_v29  ;;  %v5746_v9 = vld [vmem:[#allocation2 + $0xf8] sm:$0xff] }
 0x201   : > { %v5695_v24 = vpop.permute.xlu1 %1517  ;;  %v1575_v22 = vsel %vm1199_vm9, %v1573_v4, %v1497_v20 }
 0x202   : > { %v1345_v54 = vpop.permute.xlu0 %1344  ;;  %v1602_v27 = vrot.slane %v1575_v22, 6 }
 0x203   : > { %1920 = vrot.lane.b32.xlu1 %v2053_v57, %s4930_s22  ;;  %v1385_v17 = vsel %vm998_vm0, %v5227_v11, %v1345_v54 }
 0x204   : > { %1911 = vrot.lane.b32.xlu0 %v2044_v46, %s4929_s21  ;;  %v1387_v20 = vsel %vm1196_vm8, %v1385_v17, %v1354_v48 }
 0x205   : > { %v5705_v42 = vpop.permute.xlu1 %1649  ;;  %v1389_v45 = vsel %vm1199_vm9, %v1387_v20, %v1363_v12  ;;  %v936_v20 = vpop.f32.mrf.mxu0 }
 0x206   : > { %v1495_v44 = vpop.permute.xlu0 %1494  ;;  %v1408_v57 = vrot.slane %v1389_v45, 7 }
 0x207   : > { %v1574_v59 = vsel %vm1199_vm9, %v1572_v43, %v1495_v44  ;;  %2079 = vrot.lane.b32.xlu1 %v2078_v39, %s4929_s21  ;;  %v5752_v44 = vrot.slane %v5746_v9, 1  ;;  %v938_v8 = vpop.f32.mrf.mxu0 }
 0x208   : > { %v1597_v50 = vrot.slane %v1574_v59, 6  ;;  %2056 = vrot.lane.b32.xlu0 %v5664_v7, %s4930_s22 }
 0x209   : > { %v5715_v46 = vpop.permute.xlu1 %1641 }
 0x20a   : > { %v1603_v40 = vsel %vm1100_vm6, %v1597_v50, %v1602_v27  ;;  %1617 = vst [vmem:[#allocation3 + $0x108] sm:$0xfc] %v1597_v50  ;;  %v1343_v33 = vpop.permute.xlu0 %1342 }
 0x20b   : > { %1621 = vst [vmem:[#allocation3 + $0xc8] sm:$0x7] %v1603_v40  ;;  %v1384_v11 = vsel %vm998_vm0, %v5236_v15, %v1343_v33  ;;  %1945 = vrot.lane.b32.xlu1 %v2078_v39, %s4929_s21  ;;  %v5754_v39 = vld [vmem:[#allocation2 + $0xf0] sm:$0xff]  ;;  %v937_v40 = vadd.f32 %v5515_v18, %v936_v20 }
 0x20c   : > { %1903 = vrot.lane.b32.xlu0 %v2033_v37, %s4931_s23  ;;  %v1386_v48 = vsel %vm1196_vm8, %v1384_v11, %v1352_v62  ;;  %v2106_v27 = vrot.slane %v5754_v39, 1 }
 0x20d   : > { %v5724_v16 = vpop.permute.xlu1 %1658 }
 0x20e   : > { %v1361_v13 = vpop.permute.xlu0 %1360  ;;  %v2108_v45 = vsel %vm1072_vm1, %v2106_v27, %v5752_v44  ;;  %v5802_v27 = vrot.slane %v5454_v3, 3 }
 0x20f   : > { %v1388_v52 = vsel %vm1199_vm9, %v1386_v48, %v1361_v13  ;;  %2090 = vrot.lane.b32.xlu1 %v5726_v30, %s4930_s22  ;;  %v995_v48 = vmax.f32 %v937_v40, 0.0 }
 0x210   : > { %v1401_v15 = vrot.slane %v1388_v52, 7  ;;  %1922 = vrot.lane.b32.xlu0 %v5664_v7, %s4930_s22  ;;  %v2069_v7 = vsel %vm1100_vm6, %v2067_v61, %v2068_v38  ;;  %v2085_v52 = vrot.slane %v5371_v26, 7  ;;  %v2097_v61 = vrot.slane %v5454_v3, 2 }
 0x211   : > { %v1506_v37 = vpop.permute.xlu1 %1505  ;;  %1046 = vst.msk [vmem:[#allocation2 + $0x178] sm:$0xff] %vm998_vm0, %v995_v48 }
 0x212   : > { %v1409_v12 = vsel %vm1120_vm7, %v1401_v15, %v1408_v57  ;;  %1421 = vst [vmem:[#allocation3 + $0x100] sm:$0xfe] %v1401_v15  ;;  %v1652_v21 = vpop.permute.xlu0 %1651  ;;  %v1576_v23 = vsel %vm998_vm0, %v5380_v34, %v1506_v37  ;;  %v941_v57 = vpop.f32.mrf.mxu0 }
 0x213   : > { %1425 = vst [vmem:[#allocation3 + $0xf0] sm:$0x3] %v1409_v12  ;;  %1956 = vrot.lane.b32.xlu1 %v5726_v30, %s4930_s22  ;;  %v942_v37 = vadd.f32 %v5515_v18, %v941_v57  ;;  %v5818_v57 = vrot.slane %v5452_v58, 5 }
 0x214   : > { %2035 = vrot.lane.b32.xlu0 %v1900_v41, %s4931_s23 }
 0x215   : > { %v1525_v62 = vpop.permute.xlu1 %1524 }
 0x216   : > { %v1516_v4 = vpop.permute.xlu0 %1515 }
 0x217   : > { %v1578_v54 = vsel %vm1196_vm8, %v1576_v23, %v1516_v4  ;;  %2070 = vrot.lane.b32.xlu1 %v2069_v7, %s4931_s23 }
 0x218   : > { %v1580_v19 = vsel %vm1199_vm9, %v1578_v54, %v1525_v62  ;;  %2081 = vrot.lane.b32.xlu0 %v2077_v29, %s4929_s21  ;;  %v943_v62 = vpop.f32.mrf.mxu0 }
 0x219   : > { %v1598_v22 = vrot.slane %v1580_v19, 6  ;;  %v5748_v43 = vpop.permute.xlu1 %1683 }
 0x21a   : > { %v1661_v41 = vpop.permute.xlu0 %1660 }
 0x21b   : > { %1618 = vst [vmem:[#allocation3 + $0x138] sm:$0xfc] %v1598_v22  ;;  %1936 = vrot.lane.b32.xlu1 %v2069_v7, %s4931_s23  ;;  %v996_v7 = vmax.f32 %v942_v37, 0.0  ;;  %v5823_v37 = vld [vmem:[#allocation2 + $0x178] sm:$0xff] }
 0x21c   : > { %1947 = vrot.lane.b32.xlu0 %v2077_v29, %s4929_s21 }
 0x21d   : > { %v5757_v17 = vpop.permute.xlu1 %1549  ;;  %1047 = vst.msk [vmem:[#allocation2 + $0x180] sm:$0xff] %vm998_vm0, %v996_v7 }
 0x21e   : > { %v1508_v59 = vpop.permute.xlu0 %1507 }
 0x21f   : > { %v1577_v50 = vsel %vm998_vm0, %v5377_v31, %v1508_v59  ;;  %2245 = vrot.lane.b32.xlu1 %v5752_v44, %s4929_s21 }
 0x220   : > { %2072 = vrot.lane.b32.xlu0 %v2068_v38, %s4931_s23  ;;  %v1579_v29 = vsel %vm1196_vm8, %v1577_v50, %v5695_v24  ;;  %v1763_v24 = vsel %vm998_vm0, %v5377_v31, %v5715_v46  ;;  %v2087_v31 = vsel %vm1120_vm7, %v2085_v52, %v5726_v30  ;;  %v944_v46 = vpop.f32.mrf.mxu0  ;;  %v2274_v52 = vrot.slane %v5454_v3, 5 }
 0x221   : > { %v5766_v33 = vpop.permute.xlu1 %1694  ;;  %v1765_v23 = vsel %vm1196_vm8, %v1763_v24, %v1652_v21 }
 0x222   : > { %v1527_v11 = vpop.permute.xlu0 %1526  ;;  %v1767_v54 = vsel %vm1199_vm9, %v1765_v23, %v1661_v41  ;;  %v946_v30 = vpop.f32.mrf.mxu0  ;;  %v2276_v3 = vsel %vm1110_vm5, %v2274_v52, %v5818_v57  ;;  %v2793_v52 = vld [vmem:[#allocation3 + $0x108] sm:$0xff] }
 0x223   : > { %v1581_v13 = vsel %vm1199_vm9, %v1579_v29, %v1527_v11  ;;  %2109 = vrot.lane.b32.xlu1 %v2108_v45, %s4929_s21  ;;  %v1798_v50 = vrot.slane %v1767_v54, 5 }
 0x224   : > { %v1604_v15 = vrot.slane %v1581_v13, 6  ;;  %1938 = vrot.lane.b32.xlu0 %v2068_v38, %s4931_s23  ;;  %v2230_v38 = vrot.slane %v5746_v9, 2  ;;  %v5826_v24 = vld [vmem:[#allocation2 + $0x180] sm:$0xff] }
 0x225   : > { %v5781_v12 = vpop.permute.xlu1 %1560 }
 0x226   : > { %v1605_v26 = vsel %vm1100_vm6, %v1598_v22, %v1604_v15  ;;  %v1640_v4 = vpop.permute.xlu0 %1639  ;;  %v945_v22 = vadd.f32 %v5515_v18, %v944_v46 }
 0x227   : > { %1622 = vst [vmem:[#allocation3 + $0x70] sm:$0x7] %v1605_v26  ;;  %v1762_v19 = vsel %vm998_vm0, %v5380_v34, %v1640_v4  ;;  %2101 = vrot.lane.b32.xlu1 %v2097_v61, %s4931_s23  ;;  %v2249_v34 = vrot.slane %v5746_v9, 3  ;;  %v2719_v26 = vrot.slane %v5823_v37, 4 }
 0x228   : > { %v1764_v21 = vsel %vm1196_vm8, %v1762_v19, %v5705_v42  ;;  %2088 = vrot.lane.b32.xlu0 %v2087_v31, %s4930_s22  ;;  %v2232_v42 = vsel %vm1061_vm2, %v2230_v38, %v2097_v61  ;;  %v997_v8 = vmax.f32 %v945_v22, 0.0 }
 0x229   : > { %v1766_v41 = vsel %vm1199_vm9, %v1764_v21, %v5724_v16  ;;  %v1675_v59 = vpop.permute.xlu1 %1674  ;;  %v2251_v11 = vsel %vm1082_vm3, %v2249_v34, %v5802_v27  ;;  %v2222_v21 = vld [vmem:[#allocation2 + $0x110] sm:$0xff] }
 0x22a   : > { %v1794_v20 = vrot.slane %v1766_v41, 5  ;;  %v1686_v40 = vpop.permute.xlu0 %1685  ;;  %1048 = vst.msk [vmem:[#allocation2 + $0x188] sm:$0xff] %vm998_vm0, %v997_v8  ;;  %v1768_v4 = vsel %vm998_vm0, %v5307_v10, %v1675_v59  ;;  %v2284_v30 = vrot.slane %v2222_v21, 7 }
 0x22b   : > { %2233 = vrot.lane.b32.xlu1 %v2232_v42, %s4931_s23 }
 0x22c   : > { %v1799_v18 = vsel %vm1110_vm5, %v1794_v20, %v1798_v50  ;;  %1814 = vst [vmem:[#allocation3 + $0x18] sm:$0xf8] %v1794_v20  ;;  %1954 = vrot.lane.b32.xlu0 %v2087_v31, %s4930_s22 }
 0x22d   : > { %1818 = vst [vmem:[#allocation3 + $0x128] sm:$0xf] %v1799_v18  ;;  %v1541_v16 = vpop.permute.xlu1 %1540 }
 0x22e   : > { %v1552_v29 = vpop.permute.xlu0 %1551 }
 0x22f   : > { %2252 = vrot.lane.b32.xlu1 %v2251_v11, %s4930_s22 }
 0x230   : > { %2111 = vrot.lane.b32.xlu0 %v5752_v44, %s4929_s21 }
 0x231   : > { %v5814_v48 = vpop.permute.xlu1 %1849 }
 0x232   : > { %v1677_v13 = vpop.permute.xlu0 %1676 }
 0x233   : > { %v1769_v15 = vsel %vm998_vm0, %v5300_v5, %v1677_v13  ;;  %2118 = vrot.lane.b32.xlu1 %v2251_v11, %s4930_s22  ;;  %v2266_v11 = vrot.slane %v2222_v21, 6  ;;  %v5882_v21 = vld [vmem:[#allocation2 + $0x120] sm:$0xff] }
 0x234   : > { %2243 = vrot.lane.b32.xlu0 %v2108_v45, %s4929_s21  ;;  %v1771_v62 = vsel %vm1196_vm8, %v1769_v15, %v1686_v40  ;;  %v2720_v45 = vrot.slane %v5826_v24, 4 }
 0x235   : > { %v5828_v44 = vpop.permute.xlu1 %1713  ;;  %v1773_v7 = vsel %vm1199_vm9, %v1771_v62, %v5766_v33 }
 0x236   : > { %v1543_v23 = vpop.permute.xlu0 %1542  ;;  %v5848_v19 = vsel %vm1093_vm4, %v2719_v26, %v2720_v45  ;;  %v1800_v33 = vrot.slane %v1773_v7, 5  ;;  %v2792_v26 = vld [vmem:[#allocation3 + $0x80] sm:$0xff] }
 0x237   : > { %v1583_v38 = vsel %vm998_vm0, %v5300_v5, %v1543_v23  ;;  %2277 = vrot.lane.b32.xlu1 %v2276_v3, %s4929_s21  ;;  %v1770_v5 = vsel %vm1196_vm8, %v1768_v4, %v5748_v43 }
 0x238   : > { %2235 = vrot.lane.b32.xlu0 %v2097_v61, %s4931_s23  ;;  %v1585_v31 = vsel %vm1196_vm8, %v1583_v38, %v1552_v29  ;;  %v1582_v61 = vsel %vm998_vm0, %v5307_v10, %v1541_v16  ;;  %v2265_v29 = vrot.slane %v5452_v58, 6 }
 0x239   : > { %v5843_v54 = vpop.permute.xlu1 %1705  ;;  %v1587_v59 = vsel %vm1199_vm9, %v1585_v31, %v5781_v12  ;;  %v1584_v10 = vsel %vm1196_vm8, %v1582_v61, %v5757_v17  ;;  %v2796_v17 = vld [vmem:[#allocation3 + $0x18] sm:$0xff] }
 0x23a   : > { %v1693_v46 = vpop.permute.xlu0 %1692  ;;  %v1606_v40 = vrot.slane %v1587_v59, 6  ;;  %v2267_v23 = vsel %vm1100_vm6, %v2265_v29, %v2266_v11  ;;  %v2832_v38 = vpack.c.bf16 %v2796_v17, %v2792_v26  ;;  %v2429_v29 = vrot.slane %v5553_v0, 2 }
 0x23b   : > { %v1772_v22 = vsel %vm1199_vm9, %v1770_v5, %v1693_v46  ;;  %2143 = vrot.lane.b32.xlu1 %v2276_v3, %s4929_s21 }
 0x23c   : > { %v1795_v41 = vrot.slane %v1772_v22, 5  ;;  %2254 = vrot.lane.b32.xlu0 %v5802_v27, %s4930_s22  ;;  %v5887_v22 = vld [vmem:[#allocation2 + $0x118] sm:$0xff] }
 0x23d   : > { %v1838_v34 = vpop.permute.xlu1 %1837 }
 0x23e   : > { %v1801_v43 = vsel %vm1110_vm5, %v1795_v41, %v1800_v33  ;;  %1815 = vst [vmem:[#allocation3 + $0xc8] sm:$0xf8] %v1795_v41  ;;  %v1559_v50 = vpop.permute.xlu0 %1558 }
 0x23f   : > { %1819 = vst [vmem:[#allocation3 + $0x110] sm:$0xf] %v1801_v43  ;;  %v1586_v20 = vsel %vm1199_vm9, %v1584_v10, %v1559_v50  ;;  %2288 = vrot.lane.b32.xlu1 %v2284_v30, %s4930_s22  ;;  %v2283_v10 = vrot.slane %v5452_v58, 7  ;;  %v1775_v58 = vsel %vm998_vm0, %v5489_v1, %v5843_v54 }
 0x240   : > { %v1599_v8 = vrot.slane %v1586_v20, 6  ;;  %2099 = vrot.lane.b32.xlu0 %v2232_v42, %s4931_s23  ;;  %v1960_v42 = vsel %vm998_vm0, %v5498_v47, %v1838_v34  ;;  %v2438_v34 = vrot.slane %v5887_v22, 1 }
 0x241   : > { %v1857_v18 = vpop.permute.xlu1 %1856 }
 0x242   : > { %v1607_v12 = vsel %vm1100_vm6, %v1599_v8, %v1606_v40  ;;  %1619 = vst [vmem:[#allocation3 + $0xf0] sm:$0xfc] %v1599_v8  ;;  %v1716_v16 = vpop.permute.xlu0 %1715 }
 0x243   : > { %1623 = vst [vmem:[#allocation3 + $0x20] sm:$0x7] %v1607_v12  ;;  %2154 = vrot.lane.b32.xlu1 %v2284_v30, %s4930_s22 }
 0x244   : > { %2279 = vrot.lane.b32.xlu0 %v5818_v57, %s4929_s21 }
 0x245   : > { %v1723_v13 = vpop.permute.xlu1 %1722  ;;  %v2797_v15 = vld [vmem:[#allocation3 + $0xc8] sm:$0xff] }
 0x246   : > { %v1848_v62 = vpop.permute.xlu0 %1847  ;;  %v2833_v3 = vpack.c.bf16 %v2797_v15, %v2793_v52 }
 0x247   : > { %v1962_v4 = vsel %vm1196_vm8, %v1960_v42, %v1848_v62  ;;  %2268 = vrot.lane.b32.xlu1 %v2267_v23, %s4931_s23  ;;  %v5926_v42 = vrot.slane %v5553_v0, 3 }
 0x248   : > { %v1964_v7 = vsel %vm1199_vm9, %v1962_v4, %v1857_v18  ;;  %2145 = vrot.lane.b32.xlu0 %v5818_v57, %s4929_s21  ;;  %3155 = vmatprep.mubr.bf16.mxu1 %v2833_v3  ;;  %v5893_v57 = vrot.slane %v5882_v21, 1  ;;  %v2285_v18 = vsel %vm1120_vm7, %v2283_v10, %v2284_v30  ;;  %v2447_v3 = vrot.slane %v5882_v21, 3 }
 0x249   : > { %v1992_v31 = vrot.slane %v1964_v7, 4  ;;  %v5880_v5 = vpop.permute.xlu1 %1881  ;;  %3156 = vmatmul.mubr.bf16.gmra.mxu1 %v2832_v38 }
 0x24a   : > { %v1840_v46 = vpop.permute.xlu0 %1839  ;;  %v5936_v4 = vsel %vm1082_vm3, %v2447_v3, %v5926_v42 }
 0x24b   : > { %2012 = vst [vmem:[#allocation3 + $0x128] sm:$0xf0] %v1992_v31  ;;  %v1961_v61 = vsel %vm998_vm0, %v5489_v1, %v1840_v46  ;;  %2134 = vrot.lane.b32.xlu1 %v2267_v23, %s4931_s23  ;;  %v2473_v46 = vrot.slane %v5550_v25, 5 }
 0x24c   : > { %2270 = vrot.lane.b32.xlu0 %v2266_v11, %s4931_s23  ;;  %v1963_v41 = vsel %vm1196_vm8, %v1961_v61, %v5814_v48  ;;  %v5906_v48 = vsel %vm1072_vm1, %v2438_v34, %v5893_v57  ;;  %v2472_v61 = vrot.slane %v5553_v0, 5 }
 0x24d   : > { %v5890_v33 = vpop.permute.xlu1 %1747 }
 0x24e   : > { %v1859_v59 = vpop.permute.xlu0 %1858  ;;  %v2474_v10 = vsel %vm1110_vm5, %v2472_v61, %v2473_v46  ;;  %v2481_v61 = vrot.slane %v5550_v25, 7 }
 0x24f   : > { %v1965_v43 = vsel %vm1199_vm9, %v1963_v41, %v1859_v59  ;;  %2443 = vrot.lane.b32.xlu1 %v5893_v57, %s4929_s21 }
 0x250   : > { %v1996_v50 = vrot.slane %v1965_v43, 4  ;;  %2136 = vrot.lane.b32.xlu0 %v2266_v11, %s4931_s23  ;;  %v1777_v11 = vsel %vm1196_vm8, %v1775_v58, %v1716_v16 }
 0x251   : > { %v1893_v20 = vpop.permute.xlu1 %1892 }
 0x252   : > { %v1997_v40 = vsel %vm1093_vm4, %v1992_v31, %v1996_v50  ;;  %v1725_v8 = vpop.permute.xlu0 %1724 }
 0x253   : > { %2016 = vst [vmem:[#allocation3 + $0xa8] sm:$0x1f] %v1997_v40  ;;  %2441 = vrot.lane.b32.xlu1 %v5906_v48, %s4929_s21  ;;  %v1779_v52 = vsel %vm1199_vm9, %v1777_v11, %v1725_v8  ;;  %v2420_v40 = vld [vmem:[#allocation2 + $0x138] sm:$0xff] }
 0x254   : > { %2286 = vrot.lane.b32.xlu0 %v2285_v18, %s4930_s22  ;;  %v1802_v16 = vrot.slane %v1779_v52, 5  ;;  %v2463_v52 = vrot.slane %v5550_v25, 6 }
 0x255   : > { %v1759_v12 = vpop.permute.xlu1 %1758 }
 0x256   : > { %v1704_v17 = vpop.permute.xlu0 %1703 }
 0x257   : > { %v1774_v15 = vsel %vm998_vm0, %v5498_v47, %v1704_v17  ;;  %2433 = vrot.lane.b32.xlu1 %v2429_v29, %s4931_s23  ;;  %v2428_v47 = vrot.slane %v5882_v21, 2  ;;  %v2464_v17 = vrot.slane %v2420_v40, 6 }
 0x258   : > { %v1776_v30 = vsel %vm1196_vm8, %v1774_v15, %v5828_v44  ;;  %2152 = vrot.lane.b32.xlu0 %v2285_v18, %s4930_s22 }
 0x259   : > { %v1778_v1 = vsel %vm1199_vm9, %v1776_v30, %v1723_v13  ;;  %v1873_v54 = vpop.permute.xlu1 %1872  ;;  %v2430_v38 = vsel %vm1061_vm2, %v2428_v47, %v2429_v29  ;;  %v4867_v47 = vld [vmem:[%s6924_s3 + $0xb8] sm:$0xff]  }
 0x25a   : > { %v1796_v62 = vrot.slane %v1778_v1, 5  ;;  %v1884_v23 = vpop.permute.xlu0 %1883  ;;  %v1966_v50 = vsel %vm998_vm0, %v5346_v56, %v1873_v54 }
 0x25b   : > { %2452 = vrot.lane.b32.xlu1 %v5926_v42, %s4930_s22 }
 0x25c   : > { %v1803_v44 = vsel %vm1110_vm5, %v1796_v62, %v1802_v16  ;;  %1816 = vst [vmem:[#allocation3 + $0x70] sm:$0xf8] %v1796_v62  ;;  %2299 = vrot.lane.b32.xlu0 %v2429_v29, %s4931_s23  ;;  %v1968_v29 = vsel %vm1196_vm8, %v1966_v50, %v5880_v5 }
 0x25d   : > { %1820 = vst [vmem:[#allocation3 + $0x8] sm:$0xf] %v1803_v44  ;;  %v1739_v13 = vpop.permute.xlu1 %1738 }
 0x25e   : > { %v1750_v26 = vpop.permute.xlu0 %1749 }
 0x25f   : > { %2450 = vrot.lane.b32.xlu1 %v5936_v4, %s4930_s22 }
 0x260   : > { %2431 = vrot.lane.b32.xlu0 %v2430_v38, %s4931_s23 }
 0x261   : > { %v5942_v7 = vpop.permute.xlu1 %1913 }
 0x262   : > { %v1875_v31 = vpop.permute.xlu0 %1874 }
 0x263   : > { %v1967_v41 = vsel %vm998_vm0, %v5340_v51, %v1875_v31  ;;  %2297 = vrot.lane.b32.xlu1 %v2430_v38, %s4931_s23  ;;  %v5992_v31 = vld [vmem:[#allocation2 + $0x148] sm:$0xff] }
 0x264   : > { %2477 = vrot.lane.b32.xlu0 %v2473_v46, %s4929_s21  ;;  %v1969_v34 = vsel %vm1196_vm8, %v1967_v41, %v1884_v23  ;;  %v5979_v23 = vrot.slane %v2420_v40, 7  ;;  %v5999_v41 = vld [vmem:[#allocation2 + $0x140] sm:$0xff] }
 0x265   : > { %v5950_v59 = vpop.permute.xlu1 %2045  ;;  %v1971_v8 = vsel %vm1199_vm9, %v1969_v34, %v1893_v20 }
 0x266   : > { %v1741_v43 = vpop.permute.xlu0 %1740  ;;  %v1998_v30 = vrot.slane %v1971_v8, 4  ;;  %v6013_v25 = vsel %vm1120_vm7, %v2481_v61, %v5979_v23  ;;  %v4869_v8 = vld [vmem:[%s6924_s3 + $0xb0] sm:$0xff]   ;;  %v4873_v61 = vld [vmem:[%s6924_s3 + $0xa0] sm:$0xff]  }
 0x267   : > { %v1781_v0 = vsel %vm998_vm0, %v5340_v51, %v1741_v43  ;;  %2475 = vrot.lane.b32.xlu1 %v2474_v10, %s4929_s21  ;;  %v1780_v51 = vsel %vm998_vm0, %v5346_v56, %v1739_v13  ;;  %v2465_v56 = vsel %vm1100_vm6, %v2463_v52, %v2464_v17  ;;  %v6003_v43 = vrot.slane %v5992_v31, 1 }
 0x268   : > { %2343 = vrot.lane.b32.xlu0 %v2473_v46, %s4929_s21  ;;  %v1783_v58 = vsel %vm1196_vm8, %v1781_v0, %v1750_v26  ;;  %v1782_v16 = vsel %vm1196_vm8, %v1780_v51, %v5890_v33  ;;  %v4868_v46 = vld [vmem:[%s6924_s3 + $0xf0] sm:$0xff]   ;;  %v2636_v0 = vrot.slane %v5999_v41, 1  ;;  %v6028_v51 = vrot.slane %v5666_v32, 5 }
 0x269   : > { %v5961_v18 = vpop.permute.xlu1 %2037  ;;  %v1785_v1 = vsel %vm1199_vm9, %v1783_v58, %v1759_v12  ;;  %v4866_v12 = vld [vmem:[%s6924_s3 + $0xf8] sm:$0xff]  }
 0x26a   : > { %v1891_v11 = vpop.permute.xlu0 %1890  ;;  %v1804_v44 = vrot.slane %v1785_v1, 5  ;;  %4593 = vmatprep.subr.bf16.mxu1 %v4866_v12  ;;  %v6025_v52 = vsel %vm1072_vm1, %v2636_v0, %v6003_v43  ;;  %v4872_v12 = vld [vmem:[%s6924_s3 + $0xe0] sm:$0xff]  }
 0x26b   : > { %v1970_v15 = vsel %vm1199_vm9, %v1968_v29, %v1891_v11  ;;  %2341 = vrot.lane.b32.xlu1 %v2474_v10, %s4929_s21  ;;  %4594 = vmatpush3.bf16.msra.mxu1 %v4867_v47 }
 0x26c   : > { %v1993_v20 = vrot.slane %v1970_v15, 4  ;;  %2468 = vrot.lane.b32.xlu0 %v2464_v17, %s4931_s23  ;;  %4595 = vmatprep.subr.bf16.mxu1 %v4868_v46  ;;  %v4870_v15 = vld [vmem:[%s6924_s3 + $0xe8] sm:$0xff]   ;;  %v2626_v46 = vrot.slane %v5992_v31, 2 }
 0x26d   : > { %v5973_v54 = vpop.permute.xlu1 %2054 }
 0x26e   : > { %v1999_v5 = vsel %vm1093_vm4, %v1993_v20, %v1998_v30  ;;  %2013 = vst [vmem:[#allocation3 + $0x110] sm:$0xf0] %v1993_v20  ;;  %v1757_v62 = vpop.permute.xlu0 %1756  ;;  %v2670_v30 = vrot.slane %v5674_v60, 5  ;;  %v4871_v20 = vld [vmem:[%s6924_s3 + $0xa8] sm:$0xff]  }
 0x26f   : > { %2017 = vst [vmem:[#allocation3 + $0x158] sm:$0x1f] %v1999_v5  ;;  %v1784_v3 = vsel %vm1199_vm9, %v1782_v16, %v1757_v62  ;;  %2466 = vrot.lane.b32.xlu1 %v2465_v56, %s4931_s23  ;;  %4596 = vmatpush3.bf16.msra.mxu1 %v4869_v8  ;;  %v6044_v5 = vrot.slane %v5674_v60, 2 }
 0x270   : > { %v1797_v33 = vrot.slane %v1784_v3, 5  ;;  %2486 = vrot.lane.b32.xlu0 %v5979_v23, %s4930_s22  ;;  %4597 = vmatprep.subr.bf16.mxu1 %v4870_v15  ;;  %v2618_v3 = vld [vmem:[#allocation2 + $0x160] sm:$0xff] }
 0x271   : > { %v1902_v13 = vpop.permute.xlu1 %1901  ;;  %v6089_v15 = vrot.slane %v2618_v3, 7 }
 0x272   : > { %v1805_v26 = vsel %vm1110_vm5, %v1797_v33, %v1804_v44  ;;  %1817 = vst [vmem:[#allocation3 + $0x20] sm:$0xf8] %v1797_v33  ;;  %v2048_v38 = vpop.permute.xlu0 %2047  ;;  %v1972_v10 = vsel %vm998_vm0, %v5636_v14, %v1902_v13  ;;  %v6062_v44 = vrot.slane %v5674_v60, 3 }
 0x273   : > { %1821 = vst [vmem:[#allocation3 + $0x98] sm:$0xf] %v1805_v26  ;;  %2332 = vrot.lane.b32.xlu1 %v2465_v56, %s4931_s23  ;;  %4598 = vmatpush3.bf16.msra.mxu1 %v4871_v20  ;;  %v6052_v56 = vsel %vm1110_vm5, %v2670_v30, %v6028_v51  ;;  %v6066_v26 = vrot.slane %v2618_v3, 6  ;;  %v4874_v30 = vld [vmem:[%s6924_s3 + $0xd8] sm:$0xff]  }
 0x274   : > { %2334 = vrot.lane.b32.xlu0 %v2464_v17, %s4931_s23  ;;  %4599 = vmatprep.subr.bf16.mxu1 %v4872_v12 }
 0x275   : > { %v1921_v34 = vpop.permute.xlu1 %1920 }
 0x276   : > { %v1912_v50 = vpop.permute.xlu0 %1911 }
 0x277   : > { %v1974_v40 = vsel %vm1196_vm8, %v1972_v10, %v1912_v50  ;;  %2641 = vrot.lane.b32.xlu1 %v6003_v43, %s4929_s21  ;;  %4600 = vmatpush3.bf16.msra.mxu1 %v4873_v61  ;;  %v2645_v50 = vrot.slane %v5992_v31, 3 }
 0x278   : > { %v1976_v58 = vsel %vm1199_vm9, %v1974_v40, %v1921_v34  ;;  %2484 = vrot.lane.b32.xlu0 %v6013_v25, %s4930_s22  ;;  %4601 = vmatprep.subr.bf16.mxu1 %v4874_v30 }
 0x279   : > { %v1994_v29 = vrot.slane %v1976_v58, 4  ;;  %v6021_v11 = vpop.permute.xlu1 %2079  ;;  %v6087_v58 = vsel %vm1061_vm2, %v2626_v46, %v6044_v5  ;;  %v6111_v12 = vsel %vm1082_vm3, %v2645_v50, %v6062_v44 }
 0x27a   : > { %v2057_v17 = vpop.permute.xlu0 %2056 }
 0x27b   : > { %2014 = vst [vmem:[#allocation3 + $0x8] sm:$0xf0] %v1994_v29  ;;  %2639 = vrot.lane.b32.xlu1 %v6025_v52, %s4929_s21 }
 0x27c   : > { %2675 = vrot.lane.b32.xlu0 %v6028_v51, %s4929_s21 }
 0x27d   : > { %v6041_v1 = vpop.permute.xlu1 %1945 }
 0x27e   : > { %v1904_v16 = vpop.permute.xlu0 %1903 }
 0x27f   : > { %v1973_v62 = vsel %vm998_vm0, %v5630_v53, %v1904_v16  ;;  %2631 = vrot.lane.b32.xlu1 %v6044_v5, %s4931_s23 }
 0x280   : > { %2673 = vrot.lane.b32.xlu0 %v6052_v56, %s4929_s21  ;;  %v1975_v33 = vsel %vm1196_vm8, %v1973_v62, %v5942_v7  ;;  %v2159_v7 = vsel %vm998_vm0, %v5630_v53, %v5961_v18 }
 0x281   : > { %v6059_v47 = vpop.permute.xlu1 %2090  ;;  %v2161_v0 = vsel %vm1196_vm8, %v2159_v7, %v2048_v38  ;;  %v2661_v38 = vrot.slane %v5666_v32, 6  ;;  %v4879_v7 = vld [vmem:[%s6924_s3 + $0x88] sm:$0xff]  }
 0x282   : > { %v1923_v13 = vpop.permute.xlu0 %1922  ;;  %v2163_v53 = vsel %vm1199_vm9, %v2161_v0, %v2057_v17 }
 0x283   : > { %v1977_v34 = vsel %vm1199_vm9, %v1975_v33, %v1923_v13  ;;  %2650 = vrot.lane.b32.xlu1 %v6062_v44, %s4930_s22  ;;  %v2194_v16 = vrot.slane %v2163_v53, 3  ;;  %v6120_v33 = vsel %vm1100_vm6, %v2661_v38, %v6066_v26  ;;  %v4877_v13 = vld [vmem:[%s6924_s3 + $0x90] sm:$0xff]  }
 0x284   : > { %v2000_v60 = vrot.slane %v1977_v34, 4  ;;  %2666 = vrot.lane.b32.xlu0 %v6066_v26, %s4931_s23 }
 0x285   : > { %v6080_v10 = vpop.permute.xlu1 %1956 }
 0x286   : > { %v2001_v40 = vsel %vm1093_vm4, %v1994_v29, %v2000_v60  ;;  %v2036_v8 = vpop.permute.xlu0 %2035  ;;  %v4875_v29 = vld [vmem:[%s6924_s3 + $0x98] sm:$0xff]   ;;  %v4878_v60 = vld [vmem:[%s6924_s3 + $0xc8] sm:$0xff]  }
 0x287   : > { %2018 = vst [vmem:[#allocation3 + $0xd8] sm:$0x1f] %v2001_v40  ;;  %v2158_v18 = vsel %vm998_vm0, %v5636_v14, %v2036_v8  ;;  %2629 = vrot.lane.b32.xlu1 %v6087_v58, %s4931_s23  ;;  %4602 = vmatpush3.bf16.msra.mxu1 %v4875_v29  ;;  %v4881_v8 = vld [vmem:[%s6924_s3 + $0x80] sm:$0xff]  }
 0x288   : > { %v2160_v20 = vsel %vm1196_vm8, %v2158_v18, %v5950_v59  ;;  %2684 = vrot.lane.b32.xlu0 %v6089_v15, %s4930_s22  ;;  %v4876_v59 = vld [vmem:[%s6924_s3 + $0xd0] sm:$0xff]  }
 0x289   : > { %v2162_v17 = vsel %vm1199_vm9, %v2160_v20, %v5973_v54  ;;  %v2071_v14 = vpop.permute.xlu1 %2070  ;;  %v2679_v54 = vrot.slane %v5666_v32, 7  ;;  %4603 = vmatprep.subr.bf16.mxu1 %v4876_v59 }
 0x28a   : > { %v2190_v62 = vrot.slane %v2162_v17, 3  ;;  %v2082_v3 = vpop.permute.xlu0 %2081  ;;  %v2164_v38 = vsel %vm998_vm0, %v5384_v36, %v2071_v14 }
 0x28b   : > { %2648 = vrot.lane.b32.xlu1 %v6111_v12, %s4930_s22  ;;  %4604 = vmatpush3.bf16.msra.mxu1 %v4877_v13  ;;  %v6136_v32 = vsel %vm1120_vm7, %v2679_v54, %v6089_v15  ;;  %v2166_v17 = vsel %vm1196_vm8, %v2164_v38, %v6021_v11 }
 0x28c   : > { %v2195_v46 = vsel %vm1082_vm3, %v2190_v62, %v2194_v16  ;;  %2210 = vst [vmem:[#allocation3 + $0xa8] sm:$0xe0] %v2190_v62  ;;  %2664 = vrot.lane.b32.xlu0 %v6120_v33, %s4931_s23  ;;  %4605 = vmatprep.subr.bf16.mxu1 %v4878_v60 }
 0x28d   : > { %2214 = vst [vmem:[#allocation3 + $0x150] sm:$0x3f] %v2195_v46  ;;  %v1937_v61 = vpop.permute.xlu1 %1936  ;;  %v2801_v46 = vld [vmem:[#allocation3 + $0x110] sm:$0xff] }
 0x28e   : > { %v1948_v34 = vpop.permute.xlu0 %1947 }
 0x28f   : > { %2309 = vrot.lane.b32.xlu1 %v5893_v57, %s4929_s21  ;;  %4606 = vmatpush3.bf16.msra.mxu1 %v4879_v7  ;;  %v4880_v57 = vld [vmem:[%s6924_s3 + $0xc0] sm:$0xff]   ;;  %v2800_v7 = vld [vmem:[#allocation3 + $0x128] sm:$0xff] }
 0x290   : > { %2682 = vrot.lane.b32.xlu0 %v6136_v32, %s4930_s22  ;;  %4607 = vmatprep.subr.bf16.mxu1 %v4880_v57 }
 0x291   : > { %v6143_v50 = vpop.permute.xlu1 %2245 }
 0x292   : > { %v2073_v0 = vpop.permute.xlu0 %2072 }
 0x293   : > { %v2165_v40 = vsel %vm998_vm0, %v5374_v28, %v2073_v0  ;;  %2352 = vrot.lane.b32.xlu1 %v5979_v23, %s4930_s22  ;;  %4608 = vmatpush3.bf16.msra.mxu1 %v4881_v8 }
 0x294   : > { %2307 = vrot.lane.b32.xlu0 %v5906_v48, %s4929_s21  ;;  %v2167_v53 = vsel %vm1196_vm8, %v2165_v40, %v2082_v3 }
 0x295   : > { %v6157_v30 = vpop.permute.xlu1 %2109  ;;  %v2169_v48 = vsel %vm1199_vm9, %v2167_v53, %v6059_v47 }
 0x296   : > { %v1939_v18 = vpop.permute.xlu0 %1938 }
 0x297   : > { %v1979_v23 = vsel %vm998_vm0, %v5374_v28, %v1939_v18  ;;  %2539 = vrot.lane.b32.xlu1 %v6052_v56, %s4929_s21  ;;  %v1978_v28 = vsel %vm998_vm0, %v5384_v36, %v1937_v61 }
 0x298   : > { %2350 = vrot.lane.b32.xlu0 %v6013_v25, %s4930_s22  ;;  %v1981_v20 = vsel %vm1196_vm8, %v1979_v23, %v1948_v34  ;;  %v2196_v25 = vrot.slane %v2169_v48, 3  ;;  %v1980_v36 = vsel %vm1196_vm8, %v1978_v28, %v6041_v1  ;;  %v2804_v1 = vld [vmem:[#allocation3 + $0xa8] sm:$0xff]  ;;  %v6222_v23 = vld [vmem:[#allocation2 + $0x168] sm:$0xff]  ;;  %v2734_v28 = vrot.slane %v5823_v37, 5 }
 0x299   : > { %v6170_v29 = vpop.permute.xlu1 %2101  ;;  %v1983_v47 = vsel %vm1199_vm9, %v1981_v20, %v6080_v10  ;;  %v2836_v57 = vpack.c.bf16 %v2804_v1, %v2800_v7  ;;  %v2743_v1 = vrot.slane %v5826_v24, 7 }
 0x29a   : > { %v2089_v14 = vpop.permute.xlu0 %2088 }
 0x29b   : > { %v2168_v16 = vsel %vm1199_vm9, %v2166_v17, %v2089_v14  ;;  %2316 = vrot.lane.b32.xlu1 %v5936_v4, %s4930_s22  ;;  %v2002_v4 = vrot.slane %v1983_v47, 4  ;;  %v6231_v14 = vld [vmem:[#allocation2 + $0x188] sm:$0xff]  ;;  %v2725_v47 = vrot.slane %v5826_v24, 6 }
 0x29c   : > { %v2191_v56 = vrot.slane %v2168_v16, 3  ;;  %2495 = vrot.lane.b32.xlu0 %v6087_v58, %s4931_s23 }
 0x29d   : > { %v2234_v62 = vpop.permute.xlu1 %2233 }
 0x29e   : > { %v2197_v11 = vsel %vm1082_vm3, %v2191_v56, %v2196_v25  ;;  %2211 = vst [vmem:[#allocation3 + $0x158] sm:$0xe0] %v2191_v56  ;;  %v1955_v3 = vpop.permute.xlu0 %1954 }
 0x29f   : > { %2215 = vst [vmem:[#allocation3 + $0x78] sm:$0x3f] %v2197_v11  ;;  %v1982_v59 = vsel %vm1199_vm9, %v1980_v36, %v1955_v3  ;;  %2505 = vrot.lane.b32.xlu1 %v6025_v52, %s4929_s21 }
 0x2a0   : > { %v1995_v54 = vrot.slane %v1982_v59, 4  ;;  %2120 = vrot.lane.b32.xlu0 %v5802_v27, %s4930_s22  ;;  %v2356_v27 = vsel %vm998_vm0, %v5754_v39, %v2234_v62 }
 0x2a1   : > { %v2253_v10 = vpop.permute.xlu1 %2252 }
 0x2a2   : > { %v2003_v58 = vsel %vm1093_vm4, %v1995_v54, %v2002_v4  ;;  %2015 = vst [vmem:[#allocation3 + $0x98] sm:$0xf0] %v1995_v54  ;;  %v6193_v13 = vpop.permute.xlu0 %2111 }
 0x2a3   : > { %2019 = vst [vmem:[#allocation3 + $0xe8] sm:$0x1f] %v2003_v58  ;;  %2514 = vrot.lane.b32.xlu1 %v6111_v12, %s4930_s22  ;;  %v2710_v58 = vrot.slane %v5823_v37, 3 }
 0x2a4   : > { %2318 = vrot.lane.b32.xlu0 %v5926_v42, %s4930_s22 }
 0x2a5   : > { %v2119_v52 = vpop.permute.xlu1 %2118  ;;  %v2805_v61 = vld [vmem:[#allocation3 + $0x158] sm:$0xff] }
 0x2a6   : > { %v2244_v34 = vpop.permute.xlu0 %2243  ;;  %v2837_v60 = vpack.c.bf16 %v2805_v61, %v2801_v46 }
 0x2a7   : > { %v2358_v0 = vsel %vm1196_vm8, %v2356_v27, %v2244_v34  ;;  %2497 = vrot.lane.b32.xlu1 %v6044_v5, %s4931_s23 }
 0x2a8   : > { %v2360_v12 = vsel %vm1199_vm9, %v2358_v0, %v2253_v10  ;;  %2532 = vrot.lane.b32.xlu0 %v6066_v26, %s4931_s23  ;;  %3163 = vmatprep.mubr.bf16.mxu1 %v2837_v60 }
 0x2a9   : > { %v2388_v42 = vrot.slane %v2360_v12, 2  ;;  %v6207_v40 = vpop.permute.xlu1 %2277  ;;  %3164 = vmatmul.mubr.bf16.gmra.mxu1 %v2836_v57 }
 0x2aa   : > { %v2236_v8 = vpop.permute.xlu0 %2235 }
 0x2ab   : > { %2408 = vst [vmem:[#allocation3 + $0x150] sm:$0xc0] %v2388_v42  ;;  %v2357_v53 = vsel %vm998_vm0, %v5746_v9, %v2236_v8  ;;  %2507 = vrot.lane.b32.xlu1 %v6003_v43, %s4929_s21  ;;  %v6224_v9 = vld [vmem:[#allocation2 + $0x170] sm:$0xff] }
 0x2ac   : > { %2541 = vrot.lane.b32.xlu0 %v6028_v51, %s4929_s21  ;;  %v2359_v26 = vsel %vm1196_vm8, %v2357_v53, %v6143_v50  ;;  %v2700_v50 = vrot.slane %v6222_v23, 1  ;;  %v2701_v17 = vrot.slane %v6224_v9, 1  ;;  %v2690_v36 = vrot.slane %v6224_v9, 2 }
 0x2ad   : > { %v6215_v5 = vpop.permute.xlu1 %2143  ;;  %v2709_v10 = vrot.slane %v6224_v9, 3 }
 0x2ae   : > { %v2255_v18 = vpop.permute.xlu0 %2254  ;;  %v2702_v11 = vsel %vm1072_vm1, %v2700_v50, %v2701_v17 }
 0x2af   : > { %v2361_v38 = vsel %vm1199_vm9, %v2359_v26, %v2255_v18  ;;  %2530 = vrot.lane.b32.xlu1 %v6120_v33, %s4931_s23  ;;  %v2711_v27 = vsel %vm1082_vm3, %v2709_v10, %v2710_v58 }
 0x2b0   : > { %v2392_v48 = vrot.slane %v2361_v38, 2  ;;  %2550 = vrot.lane.b32.xlu0 %v6089_v15, %s4930_s22  ;;  %v2735_v15 = vrot.slane %v5826_v24, 5  ;;  %v4557_v24 = vpop.f32.mrf.mxu1 }
 0x2b1   : > { %v2289_v43 = vpop.permute.xlu1 %2288 }
 0x2b2   : > { %v2393_v51 = vsel %vm1061_vm2, %v2388_v42, %v2392_v48  ;;  %v2100_v20 = vpop.permute.xlu0 %2099 }
 0x2b3   : > { %2412 = vst [vmem:[#allocation3 + $0x118] sm:$0x7f] %v2393_v51  ;;  %v2170_v33 = vsel %vm998_vm0, %v5754_v39, %v2100_v20  ;;  %2516 = vrot.lane.b32.xlu1 %v6062_v44, %s4930_s22  ;;  %v2726_v39 = vrot.slane %v6231_v14, 6 }
 0x2b4   : > { %v2172_v16 = vsel %vm1196_vm8, %v2170_v33, %v6157_v30  ;;  %2548 = vrot.lane.b32.xlu0 %v6136_v32, %s4930_s22  ;;  %v2691_v30 = vrot.slane %v5823_v37, 2  ;;  %v2736_v32 = vsel %vm1110_vm5, %v2734_v28, %v2735_v15  ;;  %vm3296_vm5 = vcmask 516096  }
 0x2b5   : > { %v6244_v25 = vsel %vm1199_vm9, %v2172_v16, %v2119_v52  ;;  %v2155_v56 = vpop.permute.xlu1 %2154  ;;  %v2727_v59 = vsel %vm1100_vm6, %v2725_v47, %v2726_v39  ;;  %v2744_v52 = vrot.slane %v6231_v14, 7  ;;  %vm3627_vm6 = vcmask 518144  }
 0x2b6   : > { %v2192_v44 = vrot.slane %v6244_v25, 3  ;;  %v2280_v62 = vpop.permute.xlu0 %2279  ;;  %v2692_v54 = vsel %vm1061_vm2, %v2690_v36, %v2691_v30 }
 0x2b7   : > { %2703 = vrot.lane.b32.xlu1 %v2702_v11, %s4929_s21  ;;  %v2745_v60 = vsel %vm1120_vm7, %v2743_v1, %v2744_v52  ;;  %vm3691_vm7 = vcmask 523267  }
 0x2b8   : > { %2212 = vst [vmem:[#allocation3 + $0xd8] sm:$0xe0] %v2192_v44  ;;  %2737 = vrot.lane.b32.xlu0 %v2736_v32, %s4929_s21 }
 0x2b9   : > { %v2269_v3 = vpop.permute.xlu1 %2268 }
 0x2ba   : > { %v2146_v4 = vpop.permute.xlu0 %2145  ;;  %v2362_v57 = vsel %vm998_vm0, %v5464_v6, %v2269_v3 }
 0x2bb   : > { %2693 = vrot.lane.b32.xlu1 %v2692_v54, %s4931_s23  ;;  %v2364_v26 = vsel %vm1196_vm8, %v2362_v57, %v6207_v40 }
 0x2bc   : > { %2728 = vrot.lane.b32.xlu0 %v2727_v59, %s4931_s23 }
 0x2bd   : > { %v2135_v46 = vpop.permute.xlu1 %2134 }
 0x2be   : > { %v2271_v61 = vpop.permute.xlu0 %2270  ;;  %v2176_v38 = vsel %vm998_vm0, %v5464_v6, %v2135_v46 }
 0x2bf   : > { %v2363_v34 = vsel %vm998_vm0, %v5458_v2, %v2271_v61  ;;  %2712 = vrot.lane.b32.xlu1 %v2711_v27, %s4930_s22  ;;  %v2178_v40 = vsel %vm1196_vm8, %v2176_v38, %v6215_v5 }
 0x2c0   : > { %2746 = vrot.lane.b32.xlu0 %v2745_v60, %s4930_s22  ;;  %v2365_v7 = vsel %vm1196_vm8, %v2363_v34, %v2280_v62 }
 0x2c1   : > { %v2444_v37 = vpop.permute.xlu1 %2443  ;;  %v2367_v42 = vsel %vm1199_vm9, %v2365_v7, %v2289_v43 }
 0x2c2   : > { %v2137_v0 = vpop.permute.xlu0 %2136 }
 0x2c3   : > { %v2177_v12 = vsel %vm998_vm0, %v5458_v2, %v2137_v0  ;;  %2695 = vrot.lane.b32.xlu1 %v2691_v30, %s4931_s23  ;;  %v2394_v2 = vrot.slane %v2367_v42, 2 }
 0x2c4   : > { %2730 = vrot.lane.b32.xlu0 %v2726_v39, %s4931_s23  ;;  %v2179_v53 = vsel %vm1196_vm8, %v2177_v12, %v2146_v4 }
 0x2c5   : > { %v2442_v8 = vpop.permute.xlu1 %2441  ;;  %v2181_v43 = vsel %vm1199_vm9, %v2179_v53, %v2155_v56 }
 0x2c6   : > { %v2287_v18 = vpop.permute.xlu0 %2286 }
 0x2c7   : > { %v2366_v48 = vsel %vm1199_vm9, %v2364_v26, %v2287_v18  ;;  %2705 = vrot.lane.b32.xlu1 %v2701_v17, %s4929_s21  ;;  %v2200_v17 = vrot.slane %v2181_v43, 3 }
 0x2c8   : > { %v2389_v51 = vrot.slane %v2366_v48, 2  ;;  %2739 = vrot.lane.b32.xlu0 %v2735_v15, %s4929_s21 }
 0x2c9   : > { %v2434_v20 = vpop.permute.xlu1 %2433 }
 0x2ca   : > { %v2395_v50 = vsel %vm1061_vm2, %v2389_v51, %v2394_v2  ;;  %2409 = vst [vmem:[#allocation3 + $0x78] sm:$0xc0] %v2389_v51  ;;  %v2153_v14 = vpop.permute.xlu0 %2152  ;;  %v2555_v56 = vsel %vm998_vm0, %v5882_v21, %v2434_v20 }
 0x2cb   : > { %2413 = vst [vmem:[#allocation3 + $0x130] sm:$0x7f] %v2395_v50  ;;  %v2180_v6 = vsel %vm1199_vm9, %v2178_v40, %v2153_v14  ;;  %2714 = vrot.lane.b32.xlu1 %v2710_v58, %s4930_s22  ;;  %v2557_v47 = vsel %vm1196_vm8, %v2555_v56, %v2444_v37 }
 0x2cc   : > { %v2193_v33 = vrot.slane %v2180_v6, 3  ;;  %2748 = vrot.lane.b32.xlu0 %v2744_v52, %s4930_s22 }
 0x2cd   : > { %v2453_v28 = vpop.permute.xlu1 %2452 }
 0x2ce   : > { %v2201_v15 = vsel %vm1082_vm3, %v2193_v33, %v2200_v17  ;;  %2213 = vst [vmem:[#allocation3 + $0xe8] sm:$0xe0] %v2193_v33  ;;  %v6295_v16 = vpop.permute.xlu0 %2299  ;;  %v2559_v62 = vsel %vm1199_vm9, %v2557_v47, %v2453_v28 }
 0x2cf   : > { %2217 = vst [vmem:[#allocation3] sm:$0x3f] %v2201_v15  ;;  %v2590_v3 = vrot.slane %v2559_v62, 1  ;;  %v2808_v15 = vld [vmem:[#allocation3 + $0x150] sm:$0xff] }
 0x2d1   : > { %v2451_v5 = vpop.permute.xlu1 %2450  ;;  %v2809_v14 = vld [vmem:[#allocation3 + $0x78] sm:$0xff] }
 0x2d2   : > { %v2432_v39 = vpop.permute.xlu0 %2431 }
 0x2d3   : > { %v2554_v11 = vsel %vm998_vm0, %v5887_v22, %v2432_v39 }
 0x2d4   : > { %v2556_v36 = vsel %vm1196_vm8, %v2554_v11, %v2442_v8 }
 0x2d5   : > { %v2558_v30 = vsel %vm1199_vm9, %v2556_v36, %v2451_v5  ;;  %v6305_v32 = vpop.permute.xlu1 %2297  ;;  %v2807_v25 = vld [vmem:[#allocation3 + $0xe8] sm:$0xff] }
 0x2d6   : > { %v2586_v59 = vrot.slane %v2558_v30, 1  ;;  %v2478_v4 = vpop.permute.xlu0 %2477 }
 0x2d8   : > { %v6308_v54 = vsel %vm1072_vm1, %v2586_v59, %v2590_v3  ;;  %2606 = vst [vmem:[#allocation3 + $0x118] sm:$0x80] %v2586_v59 }
 0x2d9   : > { %v2476_v10 = vpop.permute.xlu1 %2475 }
 0x2da   : > { %v6310_v58 = vpop.permute.xlu0 %2343 }
 0x2dd   : > { %v6312_v1 = vpop.permute.xlu1 %2341 }
 0x2de   : > { %v2469_v52 = vpop.permute.xlu0 %2468 }
 0x2df   : > { %v2561_v27 = vsel %vm998_vm0, %v5564_v55, %v2469_v52  ;;  %v2812_v20 = vld [vmem:[#allocation3 + $0x118] sm:$0xff] }
 0x2e0   : > { %v2563_v7 = vsel %vm1196_vm8, %v2561_v27, %v2478_v4  ;;  %v2840_v5 = vpack.c.bf16 %v2812_v20, %v2808_v15 }
 0x2e1   : > { %v2467_v46 = vpop.permute.xlu1 %2466 }
 0x2e2   : > { %v2487_v61 = vpop.permute.xlu0 %2486  ;;  %v2560_v37 = vsel %vm998_vm0, %v5577_v35, %v2467_v46 }
 0x2e3   : > { %v2565_v0 = vsel %vm1199_vm9, %v2563_v7, %v2487_v61  ;;  %v2562_v12 = vsel %vm1196_vm8, %v2560_v37, %v2476_v10 }
 0x2e4   : > { %v2592_v53 = vrot.slane %v2565_v0, 1 }
 0x2e5   : > { %v2333_v34 = vpop.permute.xlu1 %2332 }
 0x2e6   : > { %v2335_v60 = vpop.permute.xlu0 %2334 }
 0x2e7   : > { %v2375_v0 = vsel %vm998_vm0, %v5564_v55, %v2335_v60 }
 0x2e9   : > { %v2642_v57 = vpop.permute.xlu1 %2641 }
 0x2ea   : > { %v2485_v42 = vpop.permute.xlu0 %2484 }
 0x2eb   : > { %v2564_v8 = vsel %vm1199_vm9, %v2562_v12, %v2485_v42 }
 0x2ec   : > { %v2587_v26 = vrot.slane %v2564_v8, 1 }
 0x2ed   : > { %v2640_v18 = vpop.permute.xlu1 %2639 }
 0x2ee   : > { %v2593_v38 = vsel %vm1072_vm1, %v2587_v26, %v2592_v53  ;;  %2607 = vst [vmem:[#allocation3 + $0x130] sm:$0x80] %v2587_v26  ;;  %v2676_v48 = vpop.permute.xlu0 %2675  ;;  %v2374_v53 = vsel %vm998_vm0, %v5577_v35, %v2333_v34  ;;  %v2377_v26 = vsel %vm1196_vm8, %v2375_v0, %v6310_v58  ;;  %v2368_v35 = vsel %vm998_vm0, %v5887_v22, %v6305_v32 }
 0x2ef   : > { %v2376_v55 = vsel %vm1196_vm8, %v2374_v53, %v6312_v1 }
 0x2f1   : > { %v2632_v2 = vpop.permute.xlu1 %2631 }
 0x2f2   : > { %v2753_v51 = vsel %vm998_vm0, %v5992_v31, %v2632_v2  ;;  %v2674_v43 = vpop.permute.xlu0 %2673  ;;  %v2791_v2 = vld [vmem:[#allocation3 + $0x100] sm:$0xff] }
 0x2f3   : > { %v2755_v50 = vsel %vm1196_vm8, %v2753_v51, %v2642_v57 }
 0x2f5   : > { %v2651_v40 = vpop.permute.xlu1 %2650  ;;  %v2813_v6 = vld [vmem:[#allocation3 + $0x130] sm:$0xff] }
 0x2f6   : > { %v2757_v17 = vsel %vm1199_vm9, %v2755_v50, %v2651_v40  ;;  %v2667_v33 = vpop.permute.xlu0 %2666  ;;  %v2841_v28 = vpack.c.bf16 %v2813_v6, %v2809_v14  ;;  %v2787_v50 = vld [vmem:[#allocation3 + $0x48] sm:$0xff] }
 0x2f7   : > { %2780 = vst [vmem:[#allocation3 + $0x68] sm:$0x1] %v2757_v17  ;;  %v2759_v56 = vsel %vm998_vm0, %v5677_v63, %v2667_v33  ;;  %v2831_v6 = vpack.c.bf16 %v2791_v2, %v2787_v50  ;;  %v4919_v33 = vld [vmem:[#allocation2 + $0xf8] sm:$0xff] }
 0x2f8   : > { %3171 = vmatprep.mubr.bf16.mxu1 %v2841_v28  ;;  %v2761_v62 = vsel %vm1196_vm8, %v2759_v56, %v2676_v48  ;;  %v2171_v22 = vsel %vm998_vm0, %v4919_v33, %v6170_v29  ;;  %v2790_v56 = vld [vmem:[#allocation3 + $0xf8] sm:$0xff]  ;;  %v2802_v2 = vld [vmem:[#allocation3 + $0x8] sm:$0xff] }
 0x2f9   : > { %v2630_v47 = vpop.permute.xlu1 %2629  ;;  %3172 = vmatmul.mubr.bf16.gmra.mxu1 %v2840_v5  ;;  %v2173_v28 = vsel %vm1196_vm8, %v2171_v22, %v6193_v13 }
 0x2fa   : > { %v2752_v39 = vsel %vm998_vm0, %v5999_v41, %v2630_v47  ;;  %v2685_v11 = vpop.permute.xlu0 %2684  ;;  %v2799_v47 = vld [vmem:[#allocation3 + $0x20] sm:$0xff] }
 0x2fb   : > { %v2763_v36 = vsel %vm1199_vm9, %v2761_v62, %v2685_v11  ;;  %v2754_v30 = vsel %vm1196_vm8, %v2752_v39, %v2640_v18  ;;  %v2786_v11 = vld [vmem:[#allocation3 + $0x10] sm:$0xff] }
 0x2fc   : > { %2781 = vst [vmem:[#allocation3 + $0x140] sm:$0x1] %v2763_v36  ;;  %v2369_v36 = vsel %vm998_vm0, %v5882_v21, %v6295_v16 }
 0x2fd   : > { %v2649_v3 = vpop.permute.xlu1 %2648 }
 0x2fe   : > { %v2756_v59 = vsel %vm1199_vm9, %v2754_v30, %v2649_v3  ;;  %v2665_v4 = vpop.permute.xlu0 %2664  ;;  %v2830_v3 = vpack.c.bf16 %v2790_v56, %v2786_v11 }
 0x2ff   : > { %v2758_v10 = vsel %vm998_vm0, %v5687_v49, %v2665_v4  ;;  %v2844_v12 = vpack.c.bf16 %v2756_v59, %v6308_v54  ;;  %v2824_v54 = vld [vmem:[#allocation3 + $0x68] sm:$0x1]  ;;  %v2795_v59 = vld [vmem:[#allocation3 + $0xf0] sm:$0xff] }
 0x300   : > { %v2760_v46 = vsel %vm1196_vm8, %v2758_v10, %v2674_v43  ;;  %v2848_v20 = vpack.c.bf16 %v2824_v54, %v2824_v54 }
 0x301   : > { %v2310_v52 = vpop.permute.xlu1 %2309 }
 0x302   : > { %v2683_v61 = vpop.permute.xlu0 %2682  ;;  %v2371_v13 = vsel %vm1196_vm8, %v2369_v36, %v2310_v52 }
 0x303   : > { %v2762_v27 = vsel %vm1199_vm9, %v2760_v46, %v2683_v61  ;;  %v2825_v37 = vld [vmem:[#allocation3 + $0x140] sm:$0x1]  ;;  %v2835_v46 = vpack.c.bf16 %v2799_v47, %v2795_v59 }
 0x304   : > { %v2845_v7 = vpack.c.bf16 %v2762_v27, %v2593_v38  ;;  %v2849_v8 = vpack.c.bf16 %v2825_v37, %v2825_v37 }
 0x305   : > { %v2353_v57 = vpop.permute.xlu1 %2352 }
 0x306   : > { %v2308_v42 = vpop.permute.xlu0 %2307  ;;  %3179 = vmatprep.mubr.bf16.mxu1 %v2845_v7  ;;  %v2379_v18 = vsel %vm1199_vm9, %v2377_v26, %v2353_v57  ;;  %v2798_v7 = vld [vmem:[#allocation3 + $0x70] sm:$0xff] }
 0x307   : > { %3180 = vmatmul.mubr.bf16.gmra.mxu1 %v2844_v12  ;;  %v2398_v34 = vrot.slane %v2379_v18, 2  ;;  %v2370_v58 = vsel %vm1196_vm8, %v2368_v35, %v2308_v42  ;;  %v2803_v12 = vld [vmem:[#allocation3 + $0x98] sm:$0xff] }
 0x308   : > { %3187 = vmatprep.mubr.bf16.mxu1 %v2849_v8  ;;  %v2839_v8 = vpack.c.bf16 %v2807_v25, %v2803_v12  ;;  %v2806_v18 = vld [vmem:[#allocation3 + $0xd8] sm:$0xff] }
 0x309   : > { %v6347_v38 = vpop.permute.xlu1 %2539 }
 0x30a   : > { %v2351_v60 = vpop.permute.xlu0 %2350 }
 0x30b   : > { %v2378_v48 = vsel %vm1199_vm9, %v2376_v55, %v2351_v60 }
 0x30c   : > { %v2391_v51 = vrot.slane %v2378_v48, 2 }
 0x30d   : > { %v2317_v43 = vpop.permute.xlu1 %2316 }
 0x30e   : > { %v2399_v40 = vsel %vm1061_vm2, %v2391_v51, %v2398_v34  ;;  %2411 = vst [vmem:[#allocation3] sm:$0xc0] %v2391_v51  ;;  %v2372_v1 = vsel %vm1199_vm9, %v2370_v58, %v2317_v43  ;;  %v2496_v14 = vpop.permute.xlu0 %2495  ;;  %v2838_v58 = vpack.c.bf16 %v2806_v18, %v2802_v2  ;;  %v4885_v2 = vld [vmem:[%s6926_s5 + $0x30] sm:$0xff]  }
 0x30f   : > { %2415 = vst [vmem:[#allocation3 + $0xb8] sm:$0x7f] %v2399_v40  ;;  %v2390_v17 = vrot.slane %v2372_v1, 2  ;;  %3188 = vmatmul.mubr.bf16.gmra.mxu1 %v2848_v20  ;;  %v2566_v39 = vsel %vm998_vm0, %v5999_v41, %v2496_v14 }
 0x310   : > { %3227 = vmatprep.mubr.bf16.mxu1 %v2831_v6 }
 0x311   : > { %2410 = vst [vmem:[#allocation3 + $0x90] sm:$0xc0] %v2390_v17  ;;  %v2506_v32 = vpop.permute.xlu1 %2505 }
 0x312   : > { %v2121_v15 = vpop.permute.xlu0 %2120  ;;  %v2568_v29 = vsel %vm1196_vm8, %v2566_v39, %v2506_v32 }
 0x313   : > { %v2175_v5 = vsel %vm1199_vm9, %v2173_v28, %v2121_v15 }
 0x314   : > { %v2198_v62 = vrot.slane %v2175_v5, 3 }
 0x315   : > { %v2515_v30 = vpop.permute.xlu1 %2514  ;;  %v2811_v5 = vld [vmem:[#allocation3] sm:$0xff] }
 0x316   : > { %v2199_v4 = vsel %vm1082_vm3, %v2192_v44, %v2198_v62  ;;  %v2570_v10 = vsel %vm1199_vm9, %v2568_v29, %v2515_v30  ;;  %v2319_v41 = vpop.permute.xlu0 %2318  ;;  %v2794_v44 = vld [vmem:[#allocation3 + $0x138] sm:$0xff] }
 0x317   : > { %2216 = vst [vmem:[#allocation3 + $0x90] sm:$0x3f] %v2199_v4  ;;  %v2588_v61 = vrot.slane %v2570_v10, 1  ;;  %v2373_v27 = vsel %vm1199_vm9, %v2371_v13, %v2319_v41  ;;  %3228 = vmatmul.mubr.bf16.vlgmr.msra.gmra.mxu1 %v2830_v3  ;;  %v2834_v57 = vpack.c.bf16 %v2798_v7, %v2794_v44 }
 0x318   : > { %v2396_v21 = vrot.slane %v2373_v27, 2  ;;  %3235 = vmatprep.mubr.bf16.mxu1 %v2835_v46 }
 0x319   : > { %2608 = vst [vmem:[#allocation3 + $0x50] sm:$0x80] %v2588_v61  ;;  %v2498_v16 = vpop.permute.xlu1 %2497 }
 0x31a   : > { %v2397_v37 = vsel %vm1061_vm2, %v2390_v17, %v2396_v21  ;;  %v2533_v52 = vpop.permute.xlu0 %2532  ;;  %v2567_v54 = vsel %vm998_vm0, %v5992_v31, %v2498_v16 }
 0x31b   : > { %2414 = vst [vmem:[#allocation3 + $0x50] sm:$0x7f] %v2397_v37  ;;  %v2573_v55 = vsel %vm998_vm0, %v5677_v63, %v2533_v52 }
 0x31d   : > { %v2508_v0 = vpop.permute.xlu1 %2507 }
 0x31e   : > { %v2542_v42 = vpop.permute.xlu0 %2541  ;;  %v2569_v35 = vsel %vm1196_vm8, %v2567_v54, %v2508_v0  ;;  %v2810_v29 = vld [vmem:[#allocation3 + $0x90] sm:$0xff]  ;;  %v4884_v54 = vld [vmem:[%s6926_s5 + $0x70] sm:$0xff]  }
 0x31f   : > { %3236 = vmatmul.mubr.bf16.gmra.mxu1 %v2834_v57  ;;  %v2575_v48 = vsel %vm1196_vm8, %v2573_v55, %v2542_v42  ;;  %v4882_v55 = vld [vmem:[%s6926_s5 + $0x78] sm:$0xff]  }
 0x320   : > { %3243 = vmatprep.mubr.bf16.mxu1 %v2839_v8  ;;  %4645 = vmatprep.subr.bf16.mxu1 %v4882_v55 }
 0x321   : > { %v2531_v53 = vpop.permute.xlu1 %2530 }
 0x322   : > { %v2551_v26 = vpop.permute.xlu0 %2550  ;;  %v2572_v60 = vsel %vm998_vm0, %v5687_v49, %v2531_v53  ;;  %v2814_v28 = vld [vmem:[#allocation3 + $0x50] sm:$0xff] }
 0x323   : > { %v2577_v34 = vsel %vm1199_vm9, %v2575_v48, %v2551_v26  ;;  %v2574_v63 = vsel %vm1196_vm8, %v2572_v60, %v6347_v38  ;;  %v4883_v60 = vld [vmem:[%s6926_s5 + $0x38] sm:$0xff]  }
 0x324   : > { %v2596_v31 = vrot.slane %v2577_v34, 1  ;;  %4646 = vmatpush3.bf16.msra.mxu1 %v4883_v60 }
 0x325   : > { %v2517_v51 = vpop.permute.xlu1 %2516  ;;  %4647 = vmatprep.subr.bf16.mxu1 %v4884_v54 }
 0x326   : > { %v2571_v43 = vsel %vm1199_vm9, %v2569_v35, %v2517_v51  ;;  %v2549_v20 = vpop.permute.xlu0 %2548  ;;  %v4886_v35 = vld [vmem:[%s6926_s5 + $0x68] sm:$0xff]  }
 0x327   : > { %v2594_v50 = vrot.slane %v2571_v43, 1  ;;  %v2576_v49 = vsel %vm1199_vm9, %v2574_v63, %v2549_v20  ;;  %3244 = vmatmul.mubr.bf16.gmra.mxu1 %v2838_v58  ;;  %v4887_v51 = vld [vmem:[%s6926_s5 + $0x28] sm:$0xff]   ;;  %v4888_v58 = vld [vmem:[%s6926_s5 + $0x60] sm:$0xff]  }
 0x328   : > { %v2589_v40 = vrot.slane %v2576_v49, 1  ;;  %4648 = vmatpush3.bf16.msra.mxu1 %v4885_v2  ;;  %v4889_v63 = vld [vmem:[%s6926_s5 + $0x20] sm:$0xff]  }
 0x329   : > { %v2595_v1 = vsel %vm1072_vm1, %v2588_v61, %v2594_v50  ;;  %v2704_v14 = vpop.permute.xlu1 %2703  ;;  %4649 = vmatprep.subr.bf16.mxu1 %v4886_v35 }
 0x32a   : > { %v2597_v6 = vsel %vm1072_vm1, %v2589_v40, %v2596_v31  ;;  %2609 = vst [vmem:[#allocation3 + $0xb8] sm:$0x80] %v2589_v40  ;;  %v2738_v17 = vpop.permute.xlu0 %2737  ;;  %vm3621_vm1 = vcmask 523268  }
 0x32c   : > { %4650 = vmatpush3.bf16.msra.mxu1 %v4887_v51 }
 0x32d   : > { %v2694_v33 = vpop.permute.xlu1 %2693  ;;  %4651 = vmatprep.subr.bf16.mxu1 %v4888_v58 }
 0x32e   : > { %v2764_v22 = vsel %vm998_vm0, %v6222_v23, %v2694_v33  ;;  %v2729_v32 = vpop.permute.xlu0 %2728  ;;  %v2842_v23 = vpack.c.bf16 %v2814_v28, %v2810_v29 }
 0x32f   : > { %v2770_v38 = vsel %vm998_vm0, %v5848_v19, %v2729_v32  ;;  %v2766_v15 = vsel %vm1196_vm8, %v2764_v22, %v2704_v14 }
 0x330   : > { %v2772_v62 = vsel %vm1196_vm8, %v2770_v38, %v2738_v17  ;;  %4652 = vmatpush3.bf16.msra.mxu1 %v4889_v63  ;;  %v6457_v38 = vld [vmem:[%s6925_s4] ss:$0 sm:$0xff] }
 0x331   : > { %v2713_v56 = vpop.permute.xlu1 %2712  ;;  %v2815_v47 = vld [vmem:[#allocation3 + $0xb8] sm:$0xff] }
 0x332   : > { %v2768_v39 = vsel %vm1199_vm9, %v2766_v15, %v2713_v56  ;;  %v2747_v11 = vpop.permute.xlu0 %2746  ;;  %v2843_v36 = vpack.c.bf16 %v2815_v47, %v2811_v5 }
 0x333   : > { %v2774_v30 = vsel %vm1199_vm9, %v2772_v62, %v2747_v11  ;;  %v2846_v10 = vpack.c.bf16 %v2768_v39, %v2595_v1 }
 0x334   : > { %3251 = vmatprep.mubr.bf16.mxu1 %v2843_v36  ;;  %v2847_v3 = vpack.c.bf16 %v2774_v30, %v2597_v6 }
 0x335   : > { %v2696_v59 = vpop.permute.xlu1 %2695  ;;  %3252 = vmatmul.mubr.bf16.gmra.mxu1 %v2842_v23 }
 0x336   : > { %v2731_v19 = vpop.permute.xlu0 %2730  ;;  %3259 = vmatprep.mubr.bf16.mxu1 %v2847_v3  ;;  %v2765_v41 = vsel %vm998_vm0, %v6224_v9, %v2696_v59 }
 0x337   : > { %v2771_v46 = vsel %vm998_vm0, %v2720_v45, %v2731_v19  ;;  %v4558_v45 = vpop.f32.mrf.mxu1  ;;  %vm3557_vm0 = vcmask 519168  }
 0x338   : > { %v4559_v32 = vadd.f32 %v4558_v45, %v4557_v24 }
 0x339   : > { %v2706_v13 = vpop.permute.xlu1 %2705  ;;  %v4560_v0 = vpop.f32.mrf.mxu1 }
 0x33a   : > { %v2740_v4 = vpop.permute.xlu0 %2739  ;;  %v2767_v61 = vsel %vm1196_vm8, %v2765_v41, %v2706_v13  ;;  %v3150_v56 = vadd.f32 %v4559_v32, %v6457_v38 }
 0x33b   : > { %v2773_v21 = vsel %vm1196_vm8, %v2771_v46, %v2740_v4  ;;  %v4561_v57 = vpop.f32.mrf.mxu1 }
 0x33c   : > { %v4562_v5 = vadd.f32 %v4561_v57, %v4560_v0 }
 0x33d   : > { %v2715_v27 = vpop.permute.xlu1 %2714  ;;  %3260 = vmatmul.mubr.bf16.gmra.mxu1 %v2846_v10  ;;  %v4563_v12 = vpop.f32.mrf.mxu1 }
 0x33e   : > { %v2769_v16 = vsel %vm1199_vm9, %v2767_v61, %v2715_v27  ;;  %v2749_v37 = vpop.permute.xlu0 %2748  ;;  %v3153_v36 = vadd.f32 %v4562_v5, %v6457_v38 }
 0x33f   : > { %2782 = vst [vmem:[#allocation3 + $0xc0] sm:$0x1] %v2769_v16  ;;  %v2775_v52 = vsel %vm1199_vm9, %v2773_v21, %v2749_v37  ;;  %v4564_v42 = vpop.f32.mrf.mxu1  ;;  %vm3697_vm9 = vcmask 517120  }
 0x340   : > { %2783 = vst [vmem:[#allocation3 + $0x30] sm:$0x1] %v2775_v52  ;;  %v4565_v29 = vadd.f32 %v4564_v42, %v4563_v12 }
 0x341   : > { %v4566_v8 = vpop.f32.mrf.mxu1 }
 0x342   : > { %v3158_v13 = vadd.f32 %v4565_v29, %v6457_v38 }
 0x343   : > { %v4567_v53 = vpop.f32.mrf.mxu1 }
 0x344   : > { %v4568_v4 = vadd.f32 %v4567_v53, %v4566_v8  ;;  %v4892_v53 = vld [vmem:[%s6926_s5 + $0x50] sm:$0xff]  }
 0x346   : > { %v2826_v7 = vld [vmem:[#allocation3 + $0xc0] sm:$0x1]  ;;  %v3161_v21 = vadd.f32 %v4568_v4, %v6457_v38 }
 0x347   : > { %v2827_v25 = vld [vmem:[#allocation3 + $0x30] sm:$0x1]  ;;  %v2850_v44 = vpack.c.bf16 %v2826_v7, %v2826_v7 }
 0x348   : > { %v2851_v9 = vpack.c.bf16 %v2827_v25, %v2827_v25 }
 0x34a   : > { %3267 = vmatprep.mubr.bf16.mxu1 %v2851_v9  ;;  %v4890_v9 = vld [vmem:[%s6926_s5 + $0x58] sm:$0xff]  }
 0x34b   : > { %3268 = vmatmul.mubr.bf16.gmra.mxu1 %v2850_v44  ;;  %v4891_v44 = vld [vmem:[%s6926_s5 + $0x18] sm:$0xff]   ;;  %4653 = vmatprep.subr.bf16.mxu1 %v4890_v9 }
 0x34c   : > { %4654 = vmatpush3.bf16.msra.mxu1 %v4891_v44 }
 0x34d   : > { %4655 = vmatprep.subr.bf16.mxu1 %v4892_v53 }
 0x369   : > { %v4569_v26 = vpop.f32.mrf.mxu1 }
 0x36b   : > { %v4570_v18 = vpop.f32.mrf.mxu1 }
 0x36c   : > { %v4571_v16 = vadd.f32 %v4570_v18, %v4569_v26  ;;  %v4893_v26 = vld [vmem:[%s6926_s5 + $0x10] sm:$0xff]  }
 0x36d   : > { %v6417_v48 = vpop.f32.mrf.mxu1  ;;  %4656 = vmatpush3.bf16.msra.mxu1 %v4893_v26 }
 0x36e   : > { %v3166_v45 = vadd.f32 %v4571_v16, %v6457_v38 }
 0x36f   : > { %v4573_v34 = vpop.f32.mrf.mxu1 }
 0x370   : > { %v4574_v0 = vadd.f32 %v4573_v34, %v6417_v48 }
 0x372   : > { %v3169_v55 = vadd.f32 %v4574_v0, %v6457_v38 }
 0x3b9   : > { %v6431_v43 = vpop.f32.mrf.mxu1 }
 0x3bb   : > { %v6436_v20 = vpop.f32.mrf.mxu1 }
 0x3bd   : > { %v6438_v50 = vpop.f32.mrf.mxu1 }
 0x3bf   : > { %v6440_v49 = vpop.f32.mrf.mxu1 }
 0x3c7   : > { %v6442_v31 = vpop.f32.mrf.mxu1 }
 0x3c9   : > { %v6444_v40 = vpop.f32.mrf.mxu1 }
 0x3cb   : > { %v6446_v1 = vpop.f32.mrf.mxu1 }
 0x3cd   : > { %v6448_v14 = vpop.f32.mrf.mxu1 }
 0x3cf   : > { %v6450_v6 = vpop.f32.mrf.mxu1 }
 0x3d1   : > { %v6452_v17 = vpop.f32.mrf.mxu1 }
 0x3d3   : > { %v4590_v33 = vpop.f32.mrf.mxu1 }
 0x3d5   : > { %v4591_v22 = vpop.f32.mrf.mxu1 }
 0x3d7   : > { %v4609_v28 = vpop.f32.mrf.mxu1 }
 0x3d9   : > { %v4610_v15 = vpop.f32.mrf.mxu1 }
 0x3da   : > { %v4611_v47 = vadd.f32 %v4610_v15, %v4609_v28 }
 0x3db   : > { %v4612_v39 = vpop.f32.mrf.mxu1 }
 0x3dc   : > { %v3230_v62 = vadd.f32 %v4611_v47, %v3150_v56  ;;  %v4577_v56 = vadd.f32 %v6436_v20, %v6431_v43  ;;  %v4580_v20 = vadd.f32 %v6440_v49, %v6438_v50 }
 0x3dd   : > { %v4613_v11 = vpop.f32.mrf.mxu1 }
 0x3de   : > { %v3275_v30 = vmax.f32 %v3230_v62, 0.0  ;;  %v4614_v23 = vadd.f32 %v4613_v11, %v4612_v39  ;;  %v4894_v39 = vld [vmem:[%s6926_s5 + $0x48] sm:$0xff]  }
 0x3df   : > { %v4615_v3 = vpop.f32.mrf.mxu1  ;;  %v4895_v62 = vld [vmem:[%s6926_s5 + $0x8] sm:$0xff]   ;;  %4657 = vmatprep.subr.bf16.mxu1 %v4894_v39 }
 0x3e0   : > { %3286 = vst.msk [vmem:[#allocation4] sm:$0xff] %vm1196_vm8, %v3275_v30  ;;  %v3233_v59 = vadd.f32 %v4614_v23, %v3153_v36  ;;  %4658 = vmatpush3.bf16.msra.mxu1 %v4895_v62 }
 0x3e1   : > { %v4616_v19 = vpop.f32.mrf.mxu1 }
 0x3e2   : > { %v3276_v10 = vmax.f32 %v3233_v59, 0.0  ;;  %v4617_v41 = vadd.f32 %v4616_v19, %v4615_v3 }
 0x3e3   : > { %v4618_v46 = vpop.f32.mrf.mxu1 }
 0x3e4   : > { %3287 = vst.msk [vmem:[#allocation4 + $0x8] sm:$0xff] %vm1196_vm8, %v3276_v10  ;;  %v3238_v61 = vadd.f32 %v4617_v41, %v3158_v13  ;;  %v3174_v13 = vadd.f32 %v4577_v56, %v6457_v38 }
 0x3e5   : > { %v4619_v27 = vpop.f32.mrf.mxu1 }
 0x3e6   : > { %v3277_v37 = vmax.f32 %v3238_v61, 0.0  ;;  %v4620_v52 = vadd.f32 %v4619_v27, %v4618_v46 }
 0x3e7   : > { %v4621_v7 = vpop.f32.mrf.mxu1  ;;  %v6533_v10 = vld [vmem:[#allocation4] sm:$0xff] }
 0x3e8   : > { %3288 = vst.msk [vmem:[#allocation4 + $0x10] sm:$0xff] %vm1196_vm8, %v3277_v37  ;;  %v3241_v25 = vadd.f32 %v4620_v52, %v3161_v21  ;;  %v3177_v21 = vadd.f32 %v4580_v20, %v6457_v38  ;;  %v4896_v37 = vld [vmem:[%s6926_s5 + $0x40] sm:$0xff]   ;;  %v4583_v52 = vadd.f32 %v6444_v40, %v6442_v31  ;;  %v3303_v9 = vrot.slane %v6533_v10, 1 }
 0x3e9   : > { %v4622_v24 = vpop.f32.mrf.mxu1  ;;  %4659 = vmatprep.subr.bf16.mxu1 %v4896_v37  ;;  %v4897_v31 = vld [vmem:[%s6926_s5] sm:$0xff]  }
 0x3ea   : > { %v3278_v57 = vmax.f32 %v3241_v25, 0.0  ;;  %v4623_v12 = vadd.f32 %v4622_v24, %v4621_v7  ;;  %4660 = vmatpush3.bf16.msra.mxu1 %v4897_v31 }
 0x3eb   : > { %v4624_v42 = vpop.f32.mrf.mxu1  ;;  %v6482_v48 = vld [vmem:[#allocation4 + $0x8] sm:$0xff] }
 0x3ec   : > { %3289 = vst.msk [vmem:[#allocation4 + $0x18] sm:$0xff] %vm1196_vm8, %v3278_v57  ;;  %v3246_v8 = vadd.f32 %v4623_v12, %v3166_v45  ;;  %v3309_v58 = vrot.slane %v6482_v48, 2  ;;  %v3312_v49 = vrot.slane %v6482_v48, 1 }
 0x3ed   : > { %v4625_v18 = vpop.f32.mrf.mxu1 }
 0x3ee   : > { %v3279_v60 = vmax.f32 %v3246_v8, 0.0  ;;  %v4626_v54 = vadd.f32 %v4625_v18, %v4624_v42 }
 0x3ef   : > { %v6484_v2 = vld [vmem:[#allocation4 + $0x9] sm:$0xff] }
 0x3f0   : > { %v6486_v35 = vld [vmem:[#allocation4 + $0x10] sm:$0xff]  ;;  %3290 = vst.msk [vmem:[#allocation4 + $0x20] sm:$0xff] %vm1196_vm8, %v3279_v60  ;;  %v3249_v34 = vadd.f32 %v4626_v54, %v3169_v55  ;;  %v3354_v51 = vrot.slane %v6484_v2, 1  ;;  %v3182_v54 = vadd.f32 %v4583_v52, %v6457_v38 }
 0x3f1   : > { %v3317_v63 = vrot.slane %v6486_v35, 2  ;;  %v3335_v36 = vrot.slane %v6486_v35, 4 }
 0x3f2   : > { %v3280_v33 = vmax.f32 %v3249_v34, 0.0  ;;  %3355 = vrot.lane.b32.xlu0 %v3354_v51, %s4929_s21  ;;  %v4586_v34 = vadd.f32 %v6448_v14, %v6446_v1 }
 0x3f3   : > { %v6493_v22 = vld [vmem:[#allocation4 + $0x12] sm:$0xff]  ;;  %v6502_v15 = vsel %vm1061_vm2, %v3309_v58, %v3317_v63 }
 0x3f4   : > { %v6495_v32 = vld [vmem:[#allocation4 + $0x11] sm:$0xff]  ;;  %3291 = vst.msk [vmem:[#allocation4 + $0x28] sm:$0xff] %vm1196_vm8, %v3280_v33  ;;  %v3424_v5 = vrot.slane %v6493_v22, 1 }
 0x3f5   : > { %v6497_v28 = vld [vmem:[#allocation4 + $0x18] sm:$0x7]  ;;  %v3363_v47 = vrot.slane %v6495_v32, 1  ;;  %v4627_v11 = vpop.f32.mrf.mxu1  ;;  %v3360_v33 = vrot.slane %v6495_v32, 2 }
 0x3f6   : > { %v3336_v29 = vrot.slane %v6497_v28, 4  ;;  %v3327_v43 = vrot.slane %v6497_v28, 2  ;;  %3425 = vrot.lane.b32.xlu1 %v3424_v5, %s4929_s21 }
 0x3f7   : > { %3364 = vrot.lane.b32.xlu0 %v3363_v47, %s4929_s21  ;;  %v4628_v30 = vpop.f32.mrf.mxu1  ;;  %v6522_v23 = vld [vmem:[#allocation4 + $0x1a] sm:$0xff] }
 0x3f8   : > { %v6524_v3 = vld [vmem:[#allocation4 + $0x19] sm:$0xff]  ;;  %v3337_v59 = vsel %vm1093_vm4, %v3335_v36, %v3336_v29  ;;  %v6528_v19 = vsel %vm1061_vm2, %v3317_v63, %v3327_v43  ;;  %v4629_v4 = vadd.f32 %v4628_v30, %v4627_v11  ;;  %v3433_v50 = vrot.slane %v6522_v23, 1  ;;  %v6535_v41 = vld [vmem:[#allocation4 + $0x21] sm:$0x7] }
 0x3f9   : > { %3348 = vst.msk [vmem:[#allocation5 + $0x20] sm:$0x7f] %vm3347_vm10, %v3337_v59  ;;  %v4630_v46 = vpop.f32.mrf.mxu1  ;;  %v3386_v61 = vrot.slane %v6524_v3, 4  ;;  %v3387_v27 = vrot.slane %v6535_v41, 4  ;;  %v6551_v44 = vld [vmem:[#allocation4 + $0x1b] sm:$0xff]  ;;  %v3368_v0 = vrot.slane %v6524_v3, 2 }
 0x3fa   : > { %v3254_v16 = vadd.f32 %v4629_v4, %v3174_v13  ;;  %3434 = vrot.lane.b32.xlu1 %v3433_v50, %s4929_s21  ;;  %v3378_v40 = vrot.slane %v6535_v41, 2  ;;  %v3494_v63 = vrot.slane %v6551_v44, 1  ;;  %v3430_v1 = vrot.slane %v6522_v23, 2 }
 0x3fb   : > { %3313 = vrot.lane.b32.xlu0 %v3312_v49, %s4929_s21  ;;  %v4631_v7 = vpop.f32.mrf.mxu1  ;;  %v6548_v25 = vld [vmem:[#allocation4 + $0x23] sm:$0xff]  ;;  %v3388_v24 = vsel %vm1093_vm4, %v3386_v61, %v3387_v27  ;;  %v6588_v43 = vsel %vm1061_vm2, %v3360_v33, %v3368_v0  ;;  %v3185_v13 = vadd.f32 %v4586_v34, %v6457_v38  ;;  %v3381_v34 = vrot.slane %v6535_v41, 3 }
 0x3fc   : > { %v6554_v45 = vld [vmem:[#allocation4 + $0x22] sm:$0xff]  ;;  %v3281_v57 = vmax.f32 %v3254_v16, 0.0  ;;  %v4632_v12 = vadd.f32 %v4631_v7, %v4630_v46  ;;  %v3503_v42 = vrot.slane %v6548_v25, 1  ;;  %v6558_v8 = vld [vmem:[#allocation4 + $0x2a] sm:$0x7]  ;;  %v3401_v26 = vrot.slane %v3388_v24, 1 }
 0x3fd   : > { %v4633_v53 = vpop.f32.mrf.mxu1  ;;  %v3456_v18 = vrot.slane %v6554_v45, 4  ;;  %v3457_v60 = vrot.slane %v6558_v8, 4  ;;  %v6578_v39 = vsel %vm1061_vm2, %v3368_v0, %v3378_v40  ;;  %v3438_v14 = vrot.slane %v6554_v45, 2  ;;  %v4898_v16 = vld [vmem:[%s6926_s5 + $0xf8] sm:$0xff]  }
 0x3fe   : > { %3292 = vst.msk [vmem:[#allocation4 + $0x30] sm:$0xff] %vm1196_vm8, %v3281_v57  ;;  %v3257_v55 = vadd.f32 %v4632_v12, %v3177_v21  ;;  %3304 = vrot.lane.b32.xlu1 %v3303_v9, %s4929_s21  ;;  %v3448_v36 = vrot.slane %v6558_v8, 2  ;;  %v6612_v37 = vld [vmem:[#allocation4 + $0x24] sm:$0xff]  ;;  %4685 = vmatprep.subr.bf16.mxu1 %v4898_v16  ;;  %v4589_v24 = vadd.f32 %v6452_v17, %v6450_v6  ;;  %v3442_v16 = vrot.slane %v6554_v45, 3 }
 0x3ff   : > { %3504 = vrot.lane.b32.xlu0 %v3503_v42, %s4929_s21  ;;  %v4634_v51 = vpop.f32.mrf.mxu1  ;;  %3412 = vst.msk [vmem:[#allocation5 + $0x20] sm:$0x80] %vm3411_vm11, %v3401_v26  ;;  %v3458_v47 = vsel %vm1093_vm4, %v3456_v18, %v3457_v60  ;;  %v6598_v59 = vsel %vm1061_vm2, %v3430_v1, %v3438_v14  ;;  %vm3761_vm10 = vcmask 523266  }
 0x400   : > { %3418 = vst.msk [vmem:[#allocation5 + $0x48] sm:$0x3f] %vm3417_vm12, %v3401_v26  ;;  %v3282_v56 = vmax.f32 %v3257_v55, 0.0  ;;  %v4635_v5 = vadd.f32 %v4634_v51, %v4633_v53  ;;  %v3471_v11 = vrot.slane %v3458_v47, 2  ;;  %v6593_v30 = vsel %vm1061_vm2, %v3438_v14, %v3448_v36 }
 0x401   : > { %v4636_v62 = vpop.f32.mrf.mxu1  ;;  %v3564_v53 = vrot.slane %v6612_v37, 1  ;;  %v3190_v51 = vadd.f32 %v4589_v24, %v6457_v38 }
 0x402   : > { %3293 = vst.msk [vmem:[#allocation4 + $0x38] sm:$0xff] %vm1196_vm8, %v3282_v56  ;;  %v3262_v29 = vadd.f32 %v4635_v5, %v3182_v54  ;;  %v3372_v54 = vrot.slane %v6524_v3, 3 }
 0x403   : > { %3495 = vrot.lane.b32.xlu0 %v3494_v63, %s4929_s21  ;;  %v4637_v20 = vpop.f32.mrf.mxu1  ;;  %3482 = vst.msk [vmem:[#allocation5 + $0x48] sm:$0xc0] %vm3481_vm13, %v3471_v11 }
 0x404   : > { %3488 = vst.msk [vmem:[#allocation5 + $0x70] sm:$0x1f] %vm3487_vm14, %v3471_v11  ;;  %v3283_v4 = vmax.f32 %v3262_v29, 0.0  ;;  %v4638_v50 = vadd.f32 %v4637_v20, %v4636_v62 }
 0x405   : > { %v6601_v49 = vld [vmem:[#allocation4 + $0x2c] sm:$0xff] }
 0x406   : > { %v6603_v46 = vld [vmem:[#allocation4 + $0x2b] sm:$0xff]  ;;  %3294 = vst.msk [vmem:[#allocation4 + $0x40] sm:$0xff] %vm1196_vm8, %v3283_v4  ;;  %v3265_v61 = vadd.f32 %v4638_v50, %v3185_v13  ;;  %v3573_v27 = vrot.slane %v6601_v49, 1  ;;  %v6607_v21 = vld [vmem:[#allocation4 + $0x33] sm:$0x7]  ;;  %v3500_v4 = vrot.slane %v6548_v25, 2 }
 0x407   : > { %v3526_v52 = vrot.slane %v6603_v46, 4  ;;  %v3527_v7 = vrot.slane %v6607_v21, 4  ;;  %v3508_v42 = vrot.slane %v6603_v46, 2  ;;  %v3518_v31 = vrot.slane %v6607_v21, 2  ;;  %v6631_v17 = vld [vmem:[#allocation4 + $0x2d] sm:$0xff] }
 0x408   : > { %v3284_v9 = vmax.f32 %v3265_v61, 0.0  ;;  %3574 = vrot.lane.b32.xlu1 %v3573_v27, %s4929_s21  ;;  %v3634_v11 = vrot.slane %v6631_v17, 1  ;;  %v3382_v27 = vsel %vm1082_vm3, %v3372_v54, %v3381_v34  ;;  %v3570_v24 = vrot.slane %v6601_v49, 2 }
 0x409   : > { %v6619_v0 = vld [vmem:[#allocation4 + $0x35] sm:$0xff]  ;;  %v3528_v57 = vsel %vm1093_vm4, %v3526_v52, %v3527_v7  ;;  %v6650_v3 = vsel %vm1061_vm2, %v3508_v42, %v3518_v31  ;;  %v6674_v31 = vsel %vm1061_vm2, %v3500_v4, %v3508_v42 }
 0x40a   : > { %v6622_v12 = vld [vmem:[#allocation4 + $0x34] sm:$0xff]  ;;  %3295 = vst.msk [vmem:[#allocation4 + $0x48] sm:$0xff] %vm1196_vm8, %v3284_v9  ;;  %v3643_v40 = vrot.slane %v6619_v0, 1  ;;  %v3541_v26 = vrot.slane %v3528_v57, 3  ;;  %v6629_v18 = vld [vmem:[#allocation4 + $0x3c] sm:$0x7] }
 0x40b   : > { %v4639_v6 = vpop.f32.mrf.mxu1  ;;  %v3596_v55 = vrot.slane %v6622_v12, 4  ;;  %v3597_v60 = vrot.slane %v6629_v18, 4  ;;  %v6654_v29 = vld [vmem:[#allocation4 + $0x36] sm:$0xff]  ;;  %v3578_v50 = vrot.slane %v6622_v12, 2  ;;  %v3588_v57 = vrot.slane %v6629_v18, 2 }
 0x40c   : > { %3644 = vrot.lane.b32.xlu0 %v3643_v40, %s4929_s21  ;;  %3565 = vrot.lane.b32.xlu1 %v3564_v53, %s4929_s21  ;;  %3552 = vst.msk [vmem:[#allocation5 + $0x70] sm:$0xe0] %vm3551_vm15, %v3541_v26  ;;  %v3704_v40 = vrot.slane %v6654_v29, 1  ;;  %v3451_v53 = vrot.slane %v6558_v8, 3 }
 0x40d   : > { %3558 = vst.msk [vmem:[#allocation5 + $0x98] sm:$0xf] %vm3557_vm0, %v3541_v26  ;;  %v4640_v63 = vpop.f32.mrf.mxu1  ;;  %v6642_v56 = vld [vmem:[#allocation4 + $0x3e] sm:$0xff]  ;;  %v3598_v5 = vsel %vm1093_vm4, %v3596_v55, %v3597_v60  ;;  %v6680_v55 = vsel %vm1061_vm2, %v3578_v50, %v3588_v57  ;;  %v6685_v60 = vsel %vm1061_vm2, %v3570_v24, %v3578_v50 }
 0x40e   : > { %v6645_v47 = vld [vmem:[#allocation4 + $0x3d] sm:$0xff]  ;;  %v6647_v62 = vld [vmem:[#allocation4 + $0x45] sm:$0x7]  ;;  %v4641_v41 = vadd.f32 %v4640_v63, %v4639_v6  ;;  %v3713_v14 = vrot.slane %v6642_v56, 1  ;;  %v3611_v36 = vrot.slane %v3598_v5, 4  ;;  %v3640_v6 = vrot.slane %v6619_v0, 2 }
 0x40f   : > { %v4642_v38 = vpop.f32.mrf.mxu1  ;;  %v3666_v20 = vrot.slane %v6645_v47, 4  ;;  %v3667_v13 = vrot.slane %v6647_v62, 4  ;;  %v3648_v34 = vrot.slane %v6645_v47, 2  ;;  %v3710_v8 = vrot.slane %v6642_v56, 2 }
 0x410   : > { %v3270_v61 = vadd.f32 %v4641_v41, %v3190_v51  ;;  %3635 = vrot.lane.b32.xlu0 %v3634_v11, %s4929_s21  ;;  %3714 = vrot.lane.b32.xlu1 %v3713_v14, %s4929_s21  ;;  %3622 = vst.msk [vmem:[#allocation5 + $0x98] sm:$0xf0] %vm3621_vm1, %v3611_v36  ;;  %v3658_v42 = vrot.slane %v6647_v62, 2  ;;  %v3371_v63 = vrot.slane %v6495_v32, 3  ;;  %v3330_v38 = vrot.slane %v6497_v28, 3 }
 0x411   : > { %3628 = vst.msk [vmem:[#allocation5 + $0xc0] sm:$0x7] %vm3627_vm6, %v3611_v36  ;;  %v6666_v52 = vld [vmem:[#allocation4 + $0x46] sm:$0xff]  ;;  %v4643_v7 = vpop.f32.mrf.mxu1  ;;  %v3668_v9 = vsel %vm1093_vm4, %v3666_v20, %v3667_v13  ;;  %v6700_v5 = vsel %vm1061_vm2, %v3640_v6, %v3648_v34  ;;  %v3452_v36 = vsel %vm1082_vm3, %v3442_v16, %v3451_v53  ;;  %v3321_v20 = vrot.slane %v6486_v35, 3 }
 0x412   : > { %v3285_v45 = vmax.f32 %v3270_v61, 0.0  ;;  %v3681_v26 = vrot.slane %v3668_v9, 5  ;;  %v3718_v51 = vrot.slane %v6666_v52, 2  ;;  %v6703_v41 = vsel %vm1061_vm2, %v3648_v34, %v3658_v42 }
 0x413   : > { %v3373_v14 = vsel %vm1082_vm3, %v3371_v63, %v3372_v54  ;;  %v3441_v13 = vrot.slane %v6522_v23, 3  ;;  %v3331_v61 = vsel %vm1082_vm3, %v3321_v20, %v3330_v38  ;;  %v3512_v7 = vrot.slane %v6603_v46, 3 }
 0x414   : > { %3297 = vst.msk [vmem:[#allocation4 + $0x50] sm:$0x1] %vm3296_vm5, %v3285_v45  ;;  %3383 = vrot.lane.b32.xlu0 %v3382_v27, %s4929_s21  ;;  %3705 = vrot.lane.b32.xlu1 %v3704_v40, %s4929_s21  ;;  %v6708_v11 = vsel %vm1061_vm2, %v3710_v8, %v3718_v51  ;;  %v3521_v54 = vrot.slane %v6607_v21, 3  ;;  %v3736_v9 = vrot.slane %v6666_v52, 4  ;;  %v3320_v35 = vrot.slane %v6482_v48, 3 }
 0x415   : > { %3692 = vst.msk [vmem:[#allocation5 + $0xc0] sm:$0xf8] %vm3691_vm7, %v3681_v26  ;;  %v3443_v27 = vsel %vm1082_vm3, %v3441_v13, %v3442_v16  ;;  %v3582_v53 = vrot.slane %v6622_v12, 3  ;;  %v3511_v34 = vrot.slane %v6548_v25, 3  ;;  %v3652_v63 = vrot.slane %v6645_v47, 3 }
 0x416   : > { %3698 = vst.msk [vmem:[#allocation5 + $0xe8] sm:$0x3] %vm3697_vm9, %v3681_v26  ;;  %v3322_v40 = vsel %vm1082_vm3, %v3320_v35, %v3321_v20  ;;  %v3522_v21 = vsel %vm1082_vm3, %v3512_v7, %v3521_v54  ;;  %v3591_v26 = vrot.slane %v6629_v18, 3  ;;  %v3581_v12 = vrot.slane %v6601_v49, 3 }
 0x417   : > { %v3513_v42 = vsel %vm1082_vm3, %v3511_v34, %v3512_v7  ;;  %v3651_v20 = vrot.slane %v6619_v0, 3  ;;  %v3722_v47 = vrot.slane %v6666_v52, 3  ;;  %v3359_v52 = vrot.slane %v6484_v2, 2  ;;  %v4903_v0 = vld [vmem:[%s6926_s5 + $0xa8] sm:$0xff]  }
 0x418   : > { %3374 = vrot.lane.b32.xlu0 %v3373_v14, %s4929_s21  ;;  %3453 = vrot.lane.b32.xlu1 %v3452_v36, %s4929_s21  ;;  %v3661_v14 = vrot.slane %v6647_v62, 3  ;;  %v3583_v18 = vsel %vm1082_vm3, %v3581_v12, %v3582_v53  ;;  %v3569_v25 = vrot.slane %v6612_v37, 2 }
 0x419   : > { %v3653_v62 = vsel %vm1082_vm3, %v3651_v20, %v3652_v63 }
 0x41a   : > { %v3662_v36 = vsel %vm1082_vm3, %v3652_v63, %v3661_v14 }
 0x41b   : > { %v3702_v50 = vld [vmem:[#allocation4 + $0x4e] sm:$0x7] }
 0x41c   : > { %v3737_v28 = vrot.slane %v3702_v50, 4  ;;  %3332 = vrot.lane.b32.xlu0 %v3331_v61, %s4929_s21  ;;  %3444 = vrot.lane.b32.xlu1 %v3443_v27, %s4929_s21  ;;  %v3728_v57 = vrot.slane %v3702_v50, 2  ;;  %v3731_v38 = vrot.slane %v3702_v50, 3  ;;  %v3721_v61 = vrot.slane %v6642_v56, 3  ;;  %v4905_v56 = vld [vmem:[%s6926_s5 + $0xa0] sm:$0xff]  }
 0x41e   : > { %v3738_v45 = vsel %vm1093_vm4, %v3736_v9, %v3737_v28  ;;  %v6728_v16 = vsel %vm1061_vm2, %v3718_v51, %v3728_v57  ;;  %v3592_v51 = vsel %vm1082_vm3, %v3582_v53, %v3591_v26  ;;  %v3732_v13 = vsel %vm1082_vm3, %v3722_v47, %v3731_v38 }
 0x41f   : > { %v3751_v46 = vrot.slane %v3738_v45, 6  ;;  %v3723_v50 = vsel %vm1082_vm3, %v3721_v61, %v3722_v47  ;;  %v3361_v28 = vsel %vm1061_vm2, %v3359_v52, %v3360_v33  ;;  %v3308_v53 = vrot.slane %v6533_v10, 2  ;;  %v4901_v52 = vld [vmem:[%s6926_s5 + $0xb0] sm:$0xff]  }
 0x420   : > { %3523 = vrot.lane.b32.xlu0 %v3522_v21, %s4929_s21  ;;  %3323 = vrot.lane.b32.xlu1 %v3322_v40, %s4929_s21  ;;  %v3429_v21 = vrot.slane %v6493_v22, 2  ;;  %v3571_v61 = vsel %vm1061_vm2, %v3569_v25, %v3570_v24 }
 0x421   : > { %3762 = vst.msk [vmem:[#allocation5 + $0xe8] sm:$0xfc] %vm3761_vm10, %v3751_v46  ;;  %v3310_v33 = vsel %vm1061_vm2, %v3308_v53, %v3309_v58  ;;  %v4904_v53 = vld [vmem:[%s6926_s5 + $0xe0] sm:$0xff]  }
 0x422   : > { %3767 = vst.msk [vmem:[#allocation5 + $0x110] sm:$0x1] %vm3296_vm5, %v3751_v46 }
 0x424   : > { %3514 = vrot.lane.b32.xlu0 %v3513_v42, %s4929_s21  ;;  %3593 = vrot.lane.b32.xlu1 %v3592_v51, %s4929_s21  ;;  %v3499_v51 = vrot.slane %v6551_v44, 2 }
 0x426   : > { %v3501_v23 = vsel %vm1061_vm2, %v3499_v51, %v3500_v4 }
 0x428   : > { %3584 = vrot.lane.b32.xlu1 %v3583_v18, %s4929_s21  ;;  %3663 = vrot.lane.b32.xlu0 %v3662_v36, %s4929_s21 }
 0x42c   : > { %3654 = vrot.lane.b32.xlu0 %v3653_v62, %s4929_s21  ;;  %3733 = vrot.lane.b32.xlu1 %v3732_v13, %s4929_s21 }
 0x430   : > { %3724 = vrot.lane.b32.xlu1 %v3723_v50, %s4929_s21  ;;  %v4900_v50 = vld [vmem:[%s6926_s5 + $0xf0] sm:$0xff]  }
 0x464   : > { %v3356_v27 = vpop.permute.xlu0 %3355 }
 0x465   : > { %v3389_v7 = vsel %vm1196_vm8, %v6484_v2, %v3356_v27  ;;  %v3431_v2 = vsel %vm1061_vm2, %v3429_v21, %v3430_v1 }
 0x466   : > { %v3397_v54 = vrot.slane %v3389_v7, 1 }
 0x468   : > { %3407 = vst [vmem:[#allocation5] sm:$0x80] %v3397_v54  ;;  %3413 = vst [vmem:[#allocation5 + $0x28] sm:$0x3f] %v3397_v54  ;;  %v3426_v9 = vpop.permute.xlu1 %3425  ;;  %v3639_v54 = vrot.slane %v6631_v17, 2 }
 0x469   : > { %v3365_v35 = vpop.permute.xlu0 %3364  ;;  %v3459_v57 = vsel %vm1196_vm8, %v6493_v22, %v3426_v9 }
 0x46a   : > { %v3390_v45 = vsel %vm1196_vm8, %v3361_v28, %v3365_v35  ;;  %v3467_v40 = vrot.slane %v3459_v57, 2  ;;  %v3641_v24 = vsel %vm1061_vm2, %v3639_v54, %v3640_v6  ;;  %v4902_v28 = vld [vmem:[%s6926_s5 + $0xe8] sm:$0xff]  }
 0x46b   : > { %v3398_v46 = vrot.slane %v3390_v45, 1 }
 0x46c   : > { %3477 = vst [vmem:[#allocation5 + $0x28] sm:$0xc0] %v3467_v40  ;;  %3483 = vst [vmem:[#allocation5 + $0x50] sm:$0x1f] %v3467_v40  ;;  %v3435_v32 = vpop.permute.xlu1 %3434 }
 0x46d   : > { %3408 = vst [vmem:[#allocation5 + $0x8] sm:$0x80] %v3398_v46  ;;  %3414 = vst [vmem:[#allocation5 + $0x30] sm:$0x3f] %v3398_v46  ;;  %v3314_v26 = vpop.permute.xlu0 %3313  ;;  %v3460_v34 = vsel %vm1196_vm8, %v3431_v2, %v3435_v32  ;;  %v3709_v46 = vrot.slane %v6654_v29, 2 }
 0x46e   : > { %v3340_v22 = vsel %vm1196_vm8, %v3310_v33, %v3314_v26  ;;  %v3468_v42 = vrot.slane %v3460_v34, 2 }
 0x46f   : > { %3344 = vst [vmem:[#allocation5 + $0x8] sm:$0x7f] %v3340_v22  ;;  %v3711_v21 = vsel %vm1061_vm2, %v3709_v46, %v3710_v8 }
 0x470   : > { %3478 = vst [vmem:[#allocation5 + $0x30] sm:$0xc0] %v3468_v42  ;;  %3484 = vst [vmem:[#allocation5 + $0x58] sm:$0x1f] %v3468_v42  ;;  %v3305_v63 = vpop.permute.xlu1 %3304 }
 0x471   : > { %v3505_v1 = vpop.permute.xlu0 %3504  ;;  %v3339_v48 = vsel %vm1196_vm8, %v6533_v10, %v3305_v63  ;;  %v4899_v10 = vld [vmem:[%s6926_s5 + $0xb8] sm:$0xff]  }
 0x472   : > { %v3530_v58 = vsel %vm1196_vm8, %v3501_v23, %v3505_v1  ;;  %3343 = vst [vmem:[#allocation5] sm:$0x7f] %v3339_v48 }
 0x473   : > { %v3538_v14 = vrot.slane %v3530_v58, 3  ;;  %v3773_v62 = vld [vmem:[#allocation5 + $0x28] sm:$0xff] }
 0x475   : > { %3548 = vst [vmem:[#allocation5 + $0x80] ss:$-36 sps:$4 sm:$0xef] %v3538_v14   ;;  %v3496_v12 = vpop.permute.xlu0 %3495 }
 0x476   : > { %v3529_v18 = vsel %vm1196_vm8, %v6551_v44, %v3496_v12  ;;  %v3769_v38 = vld [vmem:[#allocation5 + $0x8] sm:$0xff]  ;;  %v4907_v12 = vld [vmem:[%s6926_s5 + $0x98] sm:$0xff]  }
 0x477   : > { %v3537_v36 = vrot.slane %v3529_v18, 3  ;;  %v3774_v20 = vld [vmem:[#allocation5 + $0x30] sm:$0xff] }
 0x478   : > { %v3804_v4 = vpack.c.bf16 %v3774_v20, %v3769_v38 }
 0x479   : > { %3547 = vst [vmem:[#allocation5 + $0x78] ss:$-36 sps:$4 sm:$0xef] %v3537_v36   ;;  %v3768_v47 = vld [vmem:[#allocation5] sm:$0xff] }
 0x47a   : > { %v3575_v13 = vpop.permute.xlu1 %3574  ;;  %4162 = vmatprep.mubr.bf16.mxu1 %v3804_v4  ;;  %v3803_v44 = vpack.c.bf16 %v3773_v62, %v3768_v47 }
 0x47b   : > { %v3600_v27 = vsel %vm1196_vm8, %v3571_v61, %v3575_v13 }
 0x47c   : > { %v3608_v7 = vrot.slane %v3600_v27, 4  ;;  %4163 = vmatmul.mubr.bf16.vlgmr.msra.gmra.mxu1 %v3803_v44  ;;  %v3779_v34 = vld [vmem:[#allocation5 + $0x58] sm:$0xff] }
 0x47d   : > { %4686 = vmatpush3.bf16.msra.mxu1 %v4899_v10  ;;  %v4909_v10 = vld [vmem:[%s6926_s5 + $0x90] sm:$0xff]  }
 0x47e   : > { %3618 = vst [vmem:[#allocation5 + $0xa8] ss:$-36 sps:$4 sm:$0xf7] %v3608_v7   ;;  %v3566_v49 = vpop.permute.xlu1 %3565  ;;  %v3645_v9 = vpop.permute.xlu0 %3644  ;;  %4687 = vmatprep.subr.bf16.mxu1 %v4900_v50 }
 0x47f   : > { %v3599_v35 = vsel %vm1196_vm8, %v6612_v37, %v3566_v49  ;;  %v3670_v57 = vsel %vm1196_vm8, %v3641_v24, %v3645_v9  ;;  %v4911_v49 = vld [vmem:[%s6926_s5 + $0x88] sm:$0xff]  }
 0x480   : > { %v3607_v45 = vrot.slane %v3599_v35, 4  ;;  %v3678_v40 = vrot.slane %v3670_v57, 5  ;;  %v3778_v58 = vld [vmem:[#allocation5 + $0x50] sm:$0xff] }
 0x481   : > { %4688 = vmatpush3.bf16.msra.mxu1 %v4901_v52 }
 0x482   : > { %3617 = vst [vmem:[#allocation5 + $0xa0] ss:$-36 sps:$4 sm:$0xf7] %v3607_v45   ;;  %3688 = vst [vmem:[#allocation5 + $0xa8] sm:$0xf8] %v3678_v40  ;;  %v3715_v6 = vpop.permute.xlu1 %3714  ;;  %v3636_v37 = vpop.permute.xlu0 %3635  ;;  %4689 = vmatprep.subr.bf16.mxu1 %v4902_v28 }
 0x483   : > { %3694 = vst [vmem:[#allocation5 + $0xd0] sm:$0x3] %v3678_v40  ;;  %v3740_v2 = vsel %vm1196_vm8, %v3711_v21, %v3715_v6  ;;  %v3669_v32 = vsel %vm1196_vm8, %v6631_v17, %v3636_v37  ;;  %v4906_v17 = vld [vmem:[%s6926_s5 + $0xd8] sm:$0xff]   ;;  %v4913_v40 = vld [vmem:[%s6926_s5 + $0x80] sm:$0xff]  }
 0x484   : > { %v3748_v33 = vrot.slane %v3740_v2, 6  ;;  %v3677_v26 = vrot.slane %v3669_v32, 5 }
 0x485   : > { %v3784_v22 = vld [vmem:[#allocation5 + $0x80] sm:$0xff]  ;;  %4690 = vmatpush3.bf16.msra.mxu1 %v4903_v0 }
 0x486   : > { %3758 = vst [vmem:[#allocation5 + $0xd0] sm:$0xfc] %v3748_v33  ;;  %3764 = vst [vmem:[#allocation5 + $0xf8] sm:$0x1] %v3748_v33  ;;  %v3706_v8 = vpop.permute.xlu1 %3705  ;;  %v3384_v42 = vpop.permute.xlu0 %3383  ;;  %v3809_v51 = vpack.c.bf16 %v3784_v22, %v3779_v34  ;;  %4691 = vmatprep.subr.bf16.mxu1 %v4904_v53 }
 0x487   : > { %3687 = vst [vmem:[#allocation5 + $0xa0] sm:$0xf8] %v3677_v26  ;;  %3693 = vst [vmem:[#allocation5 + $0xc8] sm:$0x3] %v3677_v26  ;;  %v3739_v63 = vsel %vm1196_vm8, %v6654_v29, %v3706_v8  ;;  %v3392_v23 = vsel %vm1196_vm8, %v6578_v39, %v3384_v42  ;;  %v4908_v39 = vld [vmem:[%s6926_s5 + $0xd0] sm:$0xff]  }
 0x488   : > { %v3747_v1 = vrot.slane %v3739_v63, 6  ;;  %v3400_v48 = vrot.slane %v3392_v23, 1  ;;  %4170 = vmatprep.mubr.bf16.mxu1 %v3809_v51 }
 0x489   : > { %v3783_v14 = vld [vmem:[#allocation5 + $0x78] sm:$0xff]  ;;  %4692 = vmatpush3.bf16.msra.mxu1 %v4905_v56  ;;  %v3789_v47 = vld [vmem:[#allocation5 + $0xa8] sm:$0xff] }
 0x48a   : > { %3757 = vst [vmem:[#allocation5 + $0xc8] sm:$0xfc] %v3747_v1  ;;  %3763 = vst [vmem:[#allocation5 + $0xf0] sm:$0x1] %v3747_v1  ;;  %v3454_v18 = vpop.permute.xlu1 %3453  ;;  %v3375_v36 = vpop.permute.xlu0 %3374  ;;  %v3808_v29 = vpack.c.bf16 %v3783_v14, %v3778_v58  ;;  %4693 = vmatprep.subr.bf16.mxu1 %v4906_v17 }
 0x48b   : > { %3410 = vst [vmem:[#allocation5 + $0x18] sm:$0x80] %v3400_v48  ;;  %3416 = vst [vmem:[#allocation5 + $0x40] sm:$0x3f] %v3400_v48  ;;  %v3462_v38 = vsel %vm1196_vm8, %v6593_v30, %v3454_v18  ;;  %v3391_v20 = vsel %vm1196_vm8, %v6588_v43, %v3375_v36  ;;  %v4910_v43 = vld [vmem:[%s6926_s5 + $0xc8] sm:$0xff]  }
 0x48c   : > { %v3470_v25 = vrot.slane %v3462_v38, 2  ;;  %v3399_v4 = vrot.slane %v3391_v20, 1  ;;  %4171 = vmatmul.mubr.bf16.gmra.mxu1 %v3808_v29  ;;  %v4916_v29 = vld [vmem:[%s6926_s5 + $0x108] sm:$0xff]  }
 0x48d   : > { %v3794_v62 = vld [vmem:[#allocation5 + $0xd0] sm:$0xff]  ;;  %4694 = vmatpush3.bf16.msra.mxu1 %v4907_v12  ;;  %v3799_v7 = vld [vmem:[#allocation5 + $0xf8] sm:$0x1] }
 0x48e   : > { %3480 = vst [vmem:[#allocation5 + $0x40] sm:$0xc0] %v3470_v25  ;;  %3486 = vst [vmem:[#allocation5 + $0x68] sm:$0x1f] %v3470_v25  ;;  %v3445_v13 = vpop.permute.xlu1 %3444  ;;  %v3333_v61 = vpop.permute.xlu0 %3332  ;;  %v3814_v30 = vpack.c.bf16 %v3794_v62, %v3789_v47  ;;  %4695 = vmatprep.subr.bf16.mxu1 %v4908_v39  ;;  %v3788_v54 = vld [vmem:[#allocation5 + $0xa0] sm:$0xff]  ;;  %v3819_v57 = vpack.c.bf16 %v3799_v7, %v3799_v7 }
 0x48f   : > { %3409 = vst [vmem:[#allocation5 + $0x10] sm:$0x80] %v3399_v4  ;;  %3415 = vst [vmem:[#allocation5 + $0x38] sm:$0x3f] %v3399_v4  ;;  %v3461_v44 = vsel %vm1196_vm8, %v6598_v59, %v3445_v13  ;;  %v3342_v50 = vsel %vm1196_vm8, %v6528_v19, %v3333_v61  ;;  %v4912_v19 = vld [vmem:[%s6926_s5 + $0xc0] sm:$0xff]  }
 0x490   : > { %v3469_v27 = vrot.slane %v3461_v44, 2  ;;  %3346 = vst [vmem:[#allocation5 + $0x18] sm:$0x7f] %v3342_v50  ;;  %4178 = vmatprep.mubr.bf16.mxu1 %v3814_v30  ;;  %v3777_v44 = vld [vmem:[#allocation5 + $0x48] sm:$0xff] }
 0x491   : > { %v3793_v52 = vld [vmem:[#allocation5 + $0xc8] sm:$0xff]  ;;  %4696 = vmatpush3.bf16.msra.mxu1 %v4909_v10  ;;  %v3798_v21 = vld [vmem:[#allocation5 + $0xf0] sm:$0x1] }
 0x492   : > { %3479 = vst [vmem:[#allocation5 + $0x38] sm:$0xc0] %v3469_v27  ;;  %3485 = vst [vmem:[#allocation5 + $0x60] sm:$0x1f] %v3469_v27  ;;  %v3324_v24 = vpop.permute.xlu1 %3323  ;;  %v3524_v9 = vpop.permute.xlu0 %3523  ;;  %v3813_v28 = vpack.c.bf16 %v3793_v52, %v3788_v54  ;;  %4697 = vmatprep.subr.bf16.mxu1 %v4910_v43  ;;  %v3818_v26 = vpack.c.bf16 %v3798_v21, %v3798_v21  ;;  %v3772_v27 = vld [vmem:[#allocation5 + $0x20] sm:$0xff]  ;;  %v3787_v54 = vld [vmem:[#allocation5 + $0x98] sm:$0xff] }
 0x493   : > { %v3341_v59 = vsel %vm1196_vm8, %v6502_v15, %v3324_v24  ;;  %v3532_v35 = vsel %vm1196_vm8, %v6650_v3, %v3524_v9  ;;  %v4914_v15 = vld [vmem:[%s6926_s5 + $0x118] sm:$0xff]   ;;  %v3807_v7 = vpack.c.bf16 %v3777_v44, %v3772_v27  ;;  %v3797_v52 = vld [vmem:[#allocation5 + $0xe8] sm:$0xff]  ;;  %v3792_v9 = vld [vmem:[#allocation5 + $0xc0] sm:$0xff] }
 0x494   : > { %3345 = vst [vmem:[#allocation5 + $0x10] sm:$0x7f] %v3341_v59  ;;  %v3540_v45 = vrot.slane %v3532_v35, 3  ;;  %4179 = vmatmul.mubr.bf16.gmra.mxu1 %v3813_v28  ;;  %v3817_v28 = vpack.c.bf16 %v3797_v52, %v3792_v9 }
 0x495   : > { %4186 = vmatprep.mubr.bf16.mxu1 %v3819_v57  ;;  %4698 = vmatpush3.bf16.msra.mxu1 %v4911_v49  ;;  %v3776_v34 = vld [vmem:[#allocation5 + $0x40] sm:$0xff]  ;;  %v3782_v49 = vld [vmem:[#allocation5 + $0x70] sm:$0xff] }
 0x496   : > { %3550 = vst [vmem:[#allocation5 + $0x90] ss:$-36 sps:$4 sm:$0xef] %v3540_v45   ;;  %v3594_v46 = vpop.permute.xlu1 %3593  ;;  %v3515_v0 = vpop.permute.xlu0 %3514  ;;  %4699 = vmatprep.subr.bf16.mxu1 %v4912_v19  ;;  %v3812_v24 = vpack.c.bf16 %v3787_v54, %v3782_v49  ;;  %v3802_v19 = vld [vmem:[#allocation5 + $0x110] sm:$0x1] }
 0x497   : > { %v3602_v3 = vsel %vm1196_vm8, %v6680_v55, %v3594_v46  ;;  %v3531_v6 = vsel %vm1196_vm8, %v6674_v31, %v3515_v0  ;;  %v3771_v2 = vld [vmem:[#allocation5 + $0x18] sm:$0xff]  ;;  %v3822_v59 = vpack.c.bf16 %v3802_v19, %v3802_v19 }
 0x498   : > { %v3610_v37 = vrot.slane %v3602_v3, 4  ;;  %v3539_v53 = vrot.slane %v3531_v6, 3  ;;  %v3806_v56 = vpack.c.bf16 %v3776_v34, %v3771_v2 }
 0x499   : > { %4700 = vmatpush3.bf16.msra.mxu1 %v4913_v40 }
 0x49a   : > { %3620 = vst [vmem:[#allocation5 + $0xb8] ss:$-36 sps:$4 sm:$0xf7] %v3610_v37   ;;  %3549 = vst [vmem:[#allocation5 + $0x88] ss:$-36 sps:$4 sm:$0xef] %v3539_v53   ;;  %v3585_v32 = vpop.permute.xlu1 %3584  ;;  %v3664_v33 = vpop.permute.xlu0 %3663  ;;  %4733 = vmatprep.subr.bf16.mxu1 %v4914_v15 }
 0x49b   : > { %v3601_v22 = vsel %vm1196_vm8, %v6685_v60, %v3585_v32  ;;  %v3672_v55 = vsel %vm1196_vm8, %v6703_v41, %v3664_v33  ;;  %v3770_v60 = vld [vmem:[#allocation5 + $0x10] sm:$0xff]  ;;  %v3775_v41 = vld [vmem:[#allocation5 + $0x38] sm:$0xff] }
 0x49c   : > { %v3609_v31 = vrot.slane %v3601_v22, 4  ;;  %v3680_v8 = vrot.slane %v3672_v55, 5  ;;  %4187 = vmatmul.mubr.bf16.gmra.mxu1 %v3818_v26  ;;  %v3805_v12 = vpack.c.bf16 %v3775_v41, %v3770_v60 }
 0x49d   : > { %4226 = vmatprep.mubr.bf16.mxu1 %v3806_v56  ;;  %v3781_v48 = vld [vmem:[#allocation5 + $0x68] sm:$0xff] }
 0x49e   : > { %3619 = vst [vmem:[#allocation5 + $0xb0] ss:$-36 sps:$4 sm:$0xf7] %v3609_v31   ;;  %3690 = vst [vmem:[#allocation5 + $0xb8] sm:$0xf8] %v3680_v8  ;;  %v3734_v42 = vpop.permute.xlu1 %3733  ;;  %v3655_v51 = vpop.permute.xlu0 %3654 }
 0x49f   : > { %3696 = vst [vmem:[#allocation5 + $0xe0] sm:$0x3] %v3680_v8  ;;  %v3742_v17 = vsel %vm1196_vm8, %v6728_v16, %v3734_v42  ;;  %v3671_v63 = vsel %vm1196_vm8, %v6700_v5, %v3655_v51  ;;  %v4915_v16 = vld [vmem:[%s6926_s5 + $0x110] sm:$0xff]  }
 0x4a0   : > { %v3750_v23 = vrot.slane %v3742_v17, 6  ;;  %v3679_v1 = vrot.slane %v3671_v63, 5 }
 0x4a1   : > { %v3786_v58 = vld [vmem:[#allocation5 + $0x90] sm:$0xff]  ;;  %v3780_v38 = vld [vmem:[#allocation5 + $0x60] sm:$0xff] }
 0x4a2   : > { %3760 = vst [vmem:[#allocation5 + $0xe0] sm:$0xfc] %v3750_v23  ;;  %3766 = vst [vmem:[#allocation5 + $0x108] sm:$0x1] %v3750_v23  ;;  %v3725_v14 = vpop.permute.xlu1 %3724  ;;  %v3811_v18 = vpack.c.bf16 %v3786_v58, %v3781_v48 }
 0x4a3   : > { %3689 = vst [vmem:[#allocation5 + $0xb0] sm:$0xf8] %v3679_v1  ;;  %3695 = vst [vmem:[#allocation5 + $0xd8] sm:$0x3] %v3679_v1  ;;  %v3741_v5 = vsel %vm1196_vm8, %v6708_v11, %v3725_v14  ;;  %v4917_v11 = vld [vmem:[%s6926_s5 + $0x100] sm:$0xff]  }
 0x4a4   : > { %v3749_v36 = vrot.slane %v3741_v5, 6  ;;  %4227 = vmatmul.mubr.bf16.vlgmr.msra.gmra.mxu1 %v3805_v12  ;;  %v4498_v12 = vld [vmem:[%s6927_s6] ss:$0 sm:$0xff] }
 0x4a5   : > { %4734 = vmatpush3.bf16.msra.mxu1 %v4914_v15  ;;  %4234 = vmatprep.mubr.bf16.mxu1 %v3811_v18  ;;  %v3785_v39 = vld [vmem:[#allocation5 + $0x88] sm:$0xff]  ;;  %v3791_v20 = vld [vmem:[#allocation5 + $0xb8] sm:$0xff] }
 0x4a6   : > { %3759 = vst [vmem:[#allocation5 + $0xd8] sm:$0xfc] %v3749_v36  ;;  %3765 = vst [vmem:[#allocation5 + $0x100] sm:$0x1] %v3749_v36  ;;  %4735 = vmatprep.subr.bf16.mxu1 %v4915_v16  ;;  %v3810_v4 = vpack.c.bf16 %v3785_v39, %v3780_v38 }
 0x4a9   : > { %4736 = vmatpush3.bf16.msra.mxu1 %v4915_v16  ;;  %v3796_v25 = vld [vmem:[#allocation5 + $0xe0] sm:$0xff]  ;;  %v3801_v10 = vld [vmem:[#allocation5 + $0x108] sm:$0x1] }
 0x4aa   : > { %v3816_v47 = vpack.c.bf16 %v3796_v25, %v3791_v20  ;;  %4737 = vmatprep.subr.bf16.mxu1 %v4916_v29  ;;  %v3790_v13 = vld [vmem:[#allocation5 + $0xb0] sm:$0xff]  ;;  %v3821_v30 = vpack.c.bf16 %v3801_v10, %v3801_v10 }
 0x4ac   : > { %4235 = vmatmul.mubr.bf16.gmra.mxu1 %v3810_v4 }
 0x4ad   : > { %4242 = vmatprep.mubr.bf16.mxu1 %v3816_v47  ;;  %4738 = vmatpush3.bf16.msra.mxu1 %v4916_v29  ;;  %v3795_v62 = vld [vmem:[#allocation5 + $0xd8] sm:$0xff]  ;;  %v3800_v43 = vld [vmem:[#allocation5 + $0x100] sm:$0x1] }
 0x4ae   : > { %4739 = vmatprep.subr.bf16.mxu1 %v4917_v11  ;;  %v3815_v61 = vpack.c.bf16 %v3795_v62, %v3790_v13  ;;  %v3820_v50 = vpack.c.bf16 %v3800_v43, %v3800_v43 }
 0x4b1   : > { %4740 = vmatpush3.bf16.msra.mxu1 %v4917_v11 }
 0x4b4   : > { %4243 = vmatmul.mubr.bf16.gmra.mxu1 %v3815_v61 }
 0x4b5   : > { %4250 = vmatprep.mubr.bf16.mxu1 %v3821_v30 }
 0x4bc   : > { %4251 = vmatmul.mubr.bf16.gmra.mxu1 %v3820_v50 }
 0x4bd   : > { %4741 = vmatprep.mubr.msk.bf16.mxu1 %vm1196_vm8, %v3807_v7 }
 0x4c4   : > { %4742 = vmatmul.mubr.msk.bf16.vlgmr.msra.gmra.mxu1 %vm1196_vm8, %v3812_v24 }
 0x4c5   : > { %4745 = vmatprep.mubr.msk.bf16.mxu1 %vm1196_vm8, %v3817_v28 }
 0x4cc   : > { %4746 = vmatmul.mubr.msk.bf16.gmra.mxu1 %vm1196_vm8, %v3822_v59 }
 0x53c   : > { %v4661_v35 = vpop.f32.mrf.mxu1 }
 0x53e   : > { %v4662_v57 = vpop.f32.mrf.mxu1 }
 0x53f   : > { %v4663_v58 = vadd.f32 %v4662_v57, %v4661_v35 }
 0x540   : > { %v4664_v45 = vpop.f32.mrf.mxu1 }
 0x541   : > { %v4165_v38 = vadd.f32 %v4663_v58, %v4498_v12 }
 0x542   : > { %v4665_v40 = vpop.f32.mrf.mxu1 }
 0x543   : > { %v4666_v29 = vadd.f32 %v4665_v40, %v4664_v45 }
 0x545   : > { %v4168_v61 = vadd.f32 %v4666_v29, %v4498_v12 }
 0x54c   : > { %v4667_v46 = vpop.f32.mrf.mxu1 }
 0x54e   : > { %v4668_v0 = vpop.f32.mrf.mxu1 }
 0x54f   : > { %v4669_v41 = vadd.f32 %v4668_v0, %v4667_v46 }
 0x550   : > { %v4670_v15 = vpop.f32.mrf.mxu1 }
 0x551   : > { %v4173_v16 = vadd.f32 %v4669_v41, %v4498_v12 }
 0x552   : > { %v4671_v3 = vpop.f32.mrf.mxu1 }
 0x553   : > { %v4672_v5 = vadd.f32 %v4671_v3, %v4670_v15 }
 0x554   : > { %v4673_v6 = vpop.f32.mrf.mxu1 }
 0x555   : > { %v4176_v11 = vadd.f32 %v4672_v5, %v4498_v12 }
 0x556   : > { %v4674_v21 = vpop.f32.mrf.mxu1 }
 0x557   : > { %v4675_v30 = vadd.f32 %v4674_v21, %v4673_v6 }
 0x558   : > { %v4676_v37 = vpop.f32.mrf.mxu1 }
 0x559   : > { %v4181_v19 = vadd.f32 %v4675_v30, %v4498_v12 }
 0x55a   : > { %v4677_v53 = vpop.f32.mrf.mxu1 }
 0x55b   : > { %v4678_v35 = vadd.f32 %v4677_v53, %v4676_v37 }
 0x55c   : > { %v4679_v2 = vpop.f32.mrf.mxu1 }
 0x55e   : > { %v4680_v32 = vpop.f32.mrf.mxu1 }
 0x55f   : > { %v4681_v4 = vadd.f32 %v4680_v32, %v4679_v2  ;;  %v4184_v2 = vadd.f32 %v4678_v35, %v4498_v12 }
 0x560   : > { %v4682_v33 = vpop.f32.mrf.mxu1 }
 0x561   : > { %v4189_v54 = vadd.f32 %v4681_v4, %v4498_v12 }
 0x562   : > { %v4683_v26 = vpop.f32.mrf.mxu1 }
 0x564   : > { %v4701_v34 = vpop.f32.mrf.mxu1 }
 0x566   : > { %v4702_v22 = vpop.f32.mrf.mxu1 }
 0x567   : > { %v4703_v36 = vadd.f32 %v4702_v22, %v4701_v34 }
 0x568   : > { %v4704_v55 = vpop.f32.mrf.mxu1 }
 0x569   : > { %v4229_v13 = vadd.f32 %v4703_v36, %v4165_v38 }
 0x56a   : > { %v4705_v56 = vpop.f32.mrf.mxu1 }
 0x56b   : > { %v4706_v62 = vadd.f32 %v4705_v56, %v4704_v55 }
 0x56c   : > { %v4707_v31 = vpop.f32.mrf.mxu1 }
 0x56d   : > { %v4232_v28 = vadd.f32 %v4706_v62, %v4168_v61 }
 0x56e   : > { %v4708_v8 = vpop.f32.mrf.mxu1 }
 0x56f   : > { %v4709_v14 = vadd.f32 %v4708_v8, %v4707_v31 }
 0x570   : > { %v4710_v42 = vpop.f32.mrf.mxu1 }
 0x571   : > { %v4237_v25 = vadd.f32 %v4709_v14, %v4173_v16 }
 0x572   : > { %v4711_v51 = vpop.f32.mrf.mxu1 }
 0x573   : > { %v4712_v20 = vadd.f32 %v4711_v51, %v4710_v42 }
 0x574   : > { %v4713_v17 = vpop.f32.mrf.mxu1 }
 0x575   : > { %v4240_v7 = vadd.f32 %v4712_v20, %v4176_v11 }
 0x576   : > { %v4714_v63 = vpop.f32.mrf.mxu1 }
 0x577   : > { %v4715_v49 = vadd.f32 %v4714_v63, %v4713_v17 }
 0x578   : > { %v4716_v60 = vpop.f32.mrf.mxu1 }
 0x579   : > { %v4245_v6 = vadd.f32 %v4715_v49, %v4181_v19 }
 0x57a   : > { %v4717_v23 = vpop.f32.mrf.mxu1 }
 0x57b   : > { %v4718_v0 = vadd.f32 %v4717_v23, %v4716_v60 }
 0x57c   : > { %v4719_v1 = vpop.f32.mrf.mxu1 }
 0x57d   : > { %v4248_v26 = vadd.f32 %v4718_v0, %v4184_v2 }
 0x57e   : > { %v4720_v48 = vpop.f32.mrf.mxu1 }
 0x57f   : > { %v4721_v44 = vadd.f32 %v4720_v48, %v4719_v1 }
 0x580   : > { %v4722_v18 = vpop.f32.mrf.mxu1 }
 0x581   : > { %v4253_v40 = vadd.f32 %v4721_v44, %v4189_v54 }
 0x582   : > { %v4723_v39 = vpop.f32.mrf.mxu1 }
 0x584   : > { %v4743_v47 = vpop.f32.mrf.mxu1 }
 0x585   : > { %v4301_v10 = vadd.f32 %v4743_v47, %v4237_v25 }
 0x586   : > { %v4292_v43 = vpop.f32.mrf.mxu1 }
 0x587   : > { %v4324_v50 = vmax.f32 %v4301_v10, 0.0  ;;  %v4293_v27 = vadd.f32 %v4292_v43, %v4229_v13 }
 0x588   : > { %v4744_v52 = vpop.f32.mrf.mxu1 }
 0x589   : > { %4331 = vst.msk [vmem:[%s6902_s12 + $0x10] sm:$0xff] %vm1196_vm8, %v4324_v50  ;;  %v4322_v24 = vmax.f32 %v4293_v27, 0.0  ;;  %v4304_v9 = vadd.f32 %v4744_v52, %v4240_v7 }
 0x58a   : > { %v4295_v59 = vpop.f32.mrf.mxu1 }
 0x58b   : > { %4329 = vst.msk [vmem:[%s6902_s12] sm:$0xff] %vm1196_vm8, %v4322_v24  ;;  %v4325_v57 = vmax.f32 %v4304_v9, 0.0  ;;  %v4296_v45 = vadd.f32 %v4295_v59, %v4232_v28 }
 0x58c   : > { %v4747_v46 = vpop.f32.mrf.mxu1 }
 0x58d   : > { %4332 = vst.msk [vmem:[%s6902_s12 + $0x18] sm:$0xff] %vm1196_vm8, %v4325_v57  ;;  %v4323_v15 = vmax.f32 %v4296_v45, 0.0  ;;  %v4317_v3 = vadd.f32 %v4747_v46, %v4253_v40 }
 0x58e   : > { %v4308_v21 = vpop.f32.mrf.mxu1 }
 0x58f   : > { %4330 = vst.msk [vmem:[%s6902_s12 + $0x8] sm:$0xff] %vm1196_vm8, %v4323_v15  ;;  %v4328_v37 = vmax.f32 %v4317_v3, 0.0  ;;  %v4309_v53 = vadd.f32 %v4308_v21, %v4245_v6 }
 0x590   : > { %v4748_v32 = vpop.f32.mrf.mxu1 }
 0x591   : > { %4335 = vst.msk [vmem:[%s6902_s12 + $0x30] sm:$0x1] %vm3296_vm5, %v4328_v37  ;;  %v4326_v33 = vmax.f32 %v4309_v53, 0.0 }
 0x592   : > { %v4311_v34 = vpop.f32.mrf.mxu1 }
 0x593   : > { %4333 = vst.msk [vmem:[%s6902_s12 + $0x20] sm:$0xff] %vm1196_vm8, %v4326_v33  ;;  %v4312_v22 = vadd.f32 %v4311_v34, %v4248_v26 }
 0x595   : > { %v4327_v55 = vmax.f32 %v4312_v22, 0.0 }
 0x597   : > { %4334 = vst.msk [vmem:[%s6902_s12 + $0x28] sm:$0xff] %vm1196_vm8, %v4327_v55 }
 0x598 PF: > { %s17_s24 = sadd.s32 1, %s4926_s24  }
 0x599   : > { %p14_p4 = scmp.ge.s32.totalorder %s17_s24, 4  }
 0x59b   :  { %16 = sbr.rel (!%p14_p4) target bundleno = 1 (0x1), region = 78 }

</bundles_post_ra>
